<compile_context>
chip_gen: v6e
topology: v6e:2x2x1
jax: 0.10.0
libtpu: 0.0.40
codegen_flags: <defaults>
</compile_context>

<pallas_src>
import functools
import math

import numpy as np
import jax
import jax.numpy as jnp
from jax.experimental import pallas as pl
from jax.experimental.pallas import tpu as pltpu


_TAPS = tuple((oy, ox) for oy in (-1, 0, 1) for ox in (-1, 0, 1))
_CENTER_TAP = 4  # (oy, ox) == (0, 0) needs no border mask
_LAYER_ORDER = ("enc1a", "enc1b", "enc2a", "enc2b", "dec1", "out")


# ----------------------------- in-kernel helpers -----------------------------

def _conv3x3(parts, w_ref, b_ref, mask_ref, patches_ref, *,
             r0, co, cin_pad, W, n, relu, **_):
    """3x3 'same' conv on (c, n) flattened maps as ONE im2col MXU matmul.

    parts    : list of (c_i, n) f32 maps whose channels are stacked (the skip
               concat of the decoder is expressed here, no jnp.concatenate).
    w_ref    : packed bf16 weights; rows [r0:r0+co], cols [0:9*cin_pad] ordered
               (tap*cin_pad + ci) with ci running over the stacked parts.
    mask_ref : (9, n) 0/1 combined border masks (kills circular-roll wrap and
               cross-image leakage from the batch-in-lanes packing).
    Taps are stored straight into the persistent bf16 `patches_ref` scratch;
    zero-padded channel rows stay 0 from the one-time scratch clear and have
    zero weights, so they contribute exactly 0.
    """
    for t, (oy, ox) in enumerate(_TAPS):
        s = oy * W + ox                                   # source offset
        off = t * cin_pad
        for f in parts:
            tap = f if s == 0 else pltpu.roll(f, (-s) % n, axis=1)
            if t != _CENTER_TAP:
                tap = tap * mask_ref[t:t + 1, :]          # one mask mul / tap
            c = f.shape[0]
            patches_ref[off:off + c, 0:n] = tap.astype(jnp.bfloat16)
            off += c
    K = 9 * cin_pad
    out = jnp.dot(w_ref[r0:r0 + co, 0:K], patches_ref[0:K, 0:n],
                  preferred_element_type=jnp.float32)
    out = out + b_ref[r0:r0 + co, 0:1]
    return jnp.maximum(out, 0.0) if relu else out


# -------------------------------- fused kernel --------------------------------

def _fused_unet_spectral_d_kernel(
        x_ref, w_ref, b_ref, mfull_ref, mhalf_ref, pool_ref, up_ref,
        d_ref, patches_ref, *, B, H, W, meta):
    Hh, Wh = H // 2, W // 2
    nf = B * H * W
    nh = B * Hh * Wh

    # One-time clear: zero-padded input-channel rows must be 0 (not stale VMEM)
    # so their zero weights contribute exactly 0 (0 * NaN would poison the dot).
    patches_ref[...] = jnp.zeros_like(patches_ref)

    conv = functools.partial(_conv3x3, w_ref=w_ref, b_ref=b_ref,
                             patches_ref=patches_ref)

    x = x_ref[...]                                                 # (cin, nf)

    # ----- UNet2D_32-style 2-level net producing 3 channels [S, L1, L2] -----
    # TODO(synk): UNet2D_32 internals are not in the provided source; this is a
    # representative 2-level conv/pool/upsample UNet with base=16 channels.
    e1 = conv([x], mask_ref=mfull_ref, W=W, n=nf, relu=True, **meta["enc1a"])
    e1 = conv([e1], mask_ref=mfull_ref, W=W, n=nf, relu=True, **meta["enc1b"])

    # 2x2 / stride-2 max-pool: max of 4 shifted copies + 0/1 selection matmul.
    m = jnp.maximum(
        jnp.maximum(e1, pltpu.roll(e1, (-1) % nf, axis=1)),
        jnp.maximum(pltpu.roll(e1, (-W) % nf, axis=1),
                    pltpu.roll(e1, (-(W + 1)) % nf, axis=1)))
    p2 = jnp.dot(m.astype(jnp.bfloat16), pool_ref[...],
                 preferred_element_type=jnp.float32)               # (b, nh)

    e2 = conv([p2], mask_ref=mhalf_ref, W=Wh, n=nh, relu=True, **meta["enc2a"])
    e2 = conv([e2], mask_ref=mhalf_ref, W=Wh, n=nh, relu=True, **meta["enc2b"])

    # Nearest-neighbour 2x upsample (0/1 selection matmul).  The skip concat is
    # folded into dec1's tap writes via parts=[up, e1].
    up = jnp.dot(e2.astype(jnp.bfloat16), up_ref[...],
                 preferred_element_type=jnp.float32)               # (2b, nf)
    d1 = conv([up, e1], mask_ref=mfull_ref, W=W, n=nf, relu=True, **meta["dec1"])

    # 1x1 output conv -> raw (3, nf).
    md = meta["out"]
    raw = jnp.dot(w_ref[md["r0"]:md["r0"] + md["co"], 0:md["cin"]],
                  d1.astype(jnp.bfloat16),
                  preferred_element_type=jnp.float32)
    raw = raw + b_ref[md["r0"]:md["r0"] + md["co"], 0:1]

    # ----- actv_D:  D = U diag(relu(L1), relu(L2)) U^T,  U = cayley_map(S) ---
    s = raw[0:1, :]
    l1 = jnp.maximum(raw[1:2, :], 0.0)
    l2 = jnp.maximum(raw[2:3, :], 0.0)
    s2 = s * s
    inv = pl.reciprocal(1.0 + s2, approx=True)                     # EUP slot
    # TODO(synk): cayley_map source not provided; U = (I - A)(I + A)^-1 with
    # A = [[0, S], [-S, 0]] is assumed (a rotation; D is PSD either way).
    u00 = (1.0 - s2) * inv
    u01 = -2.0 * s * inv
    u10 = 2.0 * s * inv
    u11 = u00
    d_ref[0:1, :] = u00 * u00 * l1 + u01 * u01 * l2                # Dxx
    d_ref[1:2, :] = u00 * u10 * l1 + u01 * u11 * l2                # Dxy
    d_ref[2:3, :] = u10 * u10 * l1 + u11 * u11 * l2                # Dyy


# --------------------------- host-side constant tables ------------------------

def _tap_masks(H, W, B):
    """(9, B*H*W) combined 0/1 masks, one per 3x3 tap, replicated per image."""
    row = np.arange(H * W) // W
    col = np.arange(H * W) % W
    masks = np.ones((9, H * W), np.float32)
    for t, (oy, ox) in enumerate(_TAPS):
        m = np.ones(H * W, np.float32)
        if oy == -1:
            m = m * (row >= 1)
        if oy == 1:
            m = m * (row <= H - 2)
        if ox == -1:
            m = m * (col >= 1)
        if ox == 1:
            m = m * (col <= W - 2)
        masks[t] = m
    return np.tile(masks, (1, B))


def _pool_select_matrix(H, W, B):
    """(B*H*W, B*H/2*W/2) block-diagonal 0/1 selection for 2x2 stride-2 pool."""
    Ho, Wo = H // 2, W // 2
    ni, no = H * W, Ho * Wo
    m = np.zeros((B * ni, B * no), np.float32)
    for b in range(B):
        for o in range(no):
            yo, xo = divmod(o, Wo)
            m[b * ni + (2 * yo) * W + 2 * xo, b * no + o] = 1.0
    return m


def _upsample_matrix(H, W, B):
    """(B*H/2*W/2, B*H*W) block-diagonal 0/1 nearest-neighbour 2x upsample."""
    Ho, Wo = H // 2, W // 2
    ni, no = Ho * Wo, H * W
    m = np.zeros((B * ni, B * no), np.float32)
    for b in range(B):
        for i in range(no):
            y, x = divmod(i, W)
            m[b * ni + (y // 2) * Wo + (x // 2), b * no + i] = 1.0
    return m


# ------------------------- packed weight / bias tables -------------------------

def _layer_meta(params):
    """Static row offsets & padded channel counts for the packed weight table."""
    meta, r0, max_k3 = {}, 0, 0
    for name in _LAYER_ORDER:
        co, ci, kh, kw = params[name]["w"].shape
        if kh == 3:
            cin_pad = -(-ci // 16) * 16   # bf16-tile aligned rows per tap
            K = 9 * cin_pad
            max_k3 = max(max_k3, K)
        else:                              # 1x1 output conv (no patches buffer)
            cin_pad = ci
            K = ci
        meta[name] = dict(r0=r0, co=co, cin=ci, cin_pad=cin_pad, K=K)
        r0 += -(-co // 8) * 8
    total_rows = -(-r0 // 8) * 8
    max_k = max(md["K"] for md in meta.values())
    return meta, total_rows, max_k, max_k3


def _pack_params(params, meta, total_rows, max_k):
    """Pack all conv weights into one bf16 (rows, max_k) table, biases into f32."""
    w_all = jnp.zeros((total_rows, max_k), jnp.bfloat16)
    b_all = jnp.zeros((total_rows, 1), jnp.float32)
    for name in _LAYER_ORDER:
        md = meta[name]
        w = params[name]["w"]                               # torch OIHW
        co, ci, kh, kw = w.shape
        wt = jnp.transpose(w, (0, 2, 3, 1)).reshape(co, kh * kw, ci)
        if md["cin_pad"] > ci:
            wt = jnp.pad(wt, ((0, 0), (0, 0), (0, md["cin_pad"] - ci)))
        wt = wt.reshape(co, md["K"]).astype(jnp.bfloat16)
        w_all = w_all.at[md["r0"]:md["r0"] + co, 0:md["K"]].set(wt)
        b_all = b_all.at[md["r0"]:md["r0"] + co, 0].set(
            params[name]["b"].astype(jnp.float32))
    return w_all, b_all


# --------------------------------- wrapper ------------------------------------

@jax.jit
def unet2d_spectral_d_forward(params, x_nchw):
    """Mirrors UNet2D_spectralD.forward: returns [D] with D: (B, 3, H, W)."""
    B, cin, H, W = x_nchw.shape
    nf = B * H * W
    nh = B * (H // 2) * (W // 2)
    # Batch folded into the lane axis so every map is >=128 lanes wide.
    assert nf % 128 == 0 and nh % 128 == 0, \
        "B*H*W and B*(H/2)*(W/2) must be multiples of 128"

    meta, total_rows, max_k, max_k3 = _layer_meta(params)
    w_all, b_all = _pack_params(params, meta, total_rows, max_k)

    # (B, C, H, W) -> (C, B*H*W): image b occupies lanes [b*H*W, (b+1)*H*W).
    x_flat = jnp.transpose(x_nchw.astype(jnp.float32), (1, 0, 2, 3)).reshape(cin, nf)

    mfull = jnp.asarray(_tap_masks(H, W, B))                      # (9, nf) f32
    mhalf = jnp.asarray(_tap_masks(H // 2, W // 2, B))            # (9, nh) f32
    pool = jnp.asarray(_pool_select_matrix(H, W, B), jnp.bfloat16)
    up = jnp.asarray(_upsample_matrix(H, W, B), jnp.bfloat16)

    kernel = functools.partial(_fused_unet_spectral_d_kernel,
                               B=B, H=H, W=W, meta=meta)

    inputs = (x_flat, w_all, b_all, mfull, mhalf, pool, up)

    def _full(a):  # whole-array block; single grid step
        return pl.BlockSpec(a.shape, lambda i: (0, 0))

    d_flat = pl.pallas_call(
        kernel,
        out_shape=jax.ShapeDtypeStruct((3, nf), jnp.float32),
        grid=(1,),   # everything fits in VMEM; whole batch packed into lanes
        in_specs=[_full(a) for a in inputs],
        out_specs=pl.BlockSpec((3, nf), lambda i: (0, 0)),
        scratch_shapes=[pltpu.VMEM((max_k3, nf), jnp.bfloat16)],   # im2col patches
        compiler_params=pltpu.CompilerParams(
            dimension_semantics=("arbitrary",)),
    )(*inputs)

    # (3, B*H*W) -> (B, 3, H, W) to match torch.stack([Dxx, Dxy, Dyy], dim=1).
    return [jnp.transpose(d_flat.reshape(3, B, H, W), (1, 0, 2, 3))]


# ---------------------------- params + JAX reference ---------------------------

def init_params(key, in_channels=2, out_channels=3, base=16):
    ks = jax.random.split(key, 6)

    def conv_p(k, kk, ci, co):
        kw, kb = jax.random.split(k)
        w = jax.random.normal(kw, (co, ci, kk, kk), jnp.float32) / math.sqrt(kk * kk * ci)
        b = 0.01 * jax.random.normal(kb, (co,), jnp.float32)
        return {"w": w, "b": b}

    return {
        "enc1a": conv_p(ks[0], 3, in_channels, base),
        "enc1b": conv_p(ks[1], 3, base, base),
        "enc2a": conv_p(ks[2], 3, base, 2 * base),
        "enc2b": conv_p(ks[3], 3, 2 * base, 2 * base),
        "dec1":  conv_p(ks[4], 3, 3 * base, base),
        "out":   conv_p(ks[5], 1, base, out_channels),
    }


@jax.jit
def _reference_forward(params, x):
    """Pure-XLA reference of the identical network (for correctness check)."""
    prec = jax.lax.Precision.HIGHEST

    def conv(h, p, relu):
        y = jax.lax.conv_general_dilated(
            h, p["w"], window_strides=(1, 1), padding="SAME",
            dimension_numbers=("NCHW", "OIHW", "NCHW"), precision=prec)
        y = y + p["b"].reshape(1, -1, 1, 1)
        return jnp.maximum(y, 0.0) if relu else y

    e1 = conv(x, params["enc1a"], True)
    e1 = conv(e1, params["enc1b"], True)
    p2 = jax.lax.reduce_window(e1, -jnp.inf, jax.lax.max,
                               (1, 1, 2, 2), (1, 1, 2, 2), "VALID")
    e2 = conv(p2, params["enc2a"], True)
    e2 = conv(e2, params["enc2b"], True)
    up = jnp.repeat(jnp.repeat(e2, 2, axis=2), 2, axis=3)
    cat = jnp.concatenate([up, e1], axis=1)
    d1 = conv(cat, params["dec1"], True)
    raw = conv(d1, params["out"], False)

    s = raw[:, 0]
    l1 = jnp.maximum(raw[:, 1], 0.0)
    l2 = jnp.maximum(raw[:, 2], 0.0)
    s2 = s * s
    inv = 1.0 / (1.0 + s2)
    u00 = (1.0 - s2) * inv
    u01 = -2.0 * s * inv
    u10 = 2.0 * s * inv
    u11 = u00
    dxx = u00 * u00 * l1 + u01 * u01 * l2
    dxy = u00 * u10 * l1 + u01 * u11 * l2
    dyy = u10 * u10 * l1 + u11 * u11 * l2
    return [jnp.stack([dxx, dxy, dyy], axis=1)]


# ----------------------------------- main --------------------------------------

if __name__ == "__main__":
    # args.data_dim = [16, 16] (< 64 branch -> UNet2D_32), in_channels = 2.
    B, Cin, H, W = 2, 2, 16, 16

    key = jax.random.PRNGKey(0)
    k_x, k_p = jax.random.split(key)
    x = jax.random.normal(k_x, (B, Cin, H, W), jnp.float32)
    params = init_params(k_p, in_channels=Cin, out_channels=3, base=16)

    Ds = unet2d_spectral_d_forward(params, x)
    for D in Ds:
        jax.block_until_ready(D)

    D = Ds[0]
    assert D.shape == (B, 3, H, W)

    # Correctness: compare the fused Pallas kernel against the pure-XLA reference
    # (loose tol absorbs bf16 MXU inputs + approx reciprocal vs HIGHEST-precision).
    D_ref = _reference_forward(params, x)[0]
    np.testing.assert_allclose(np.asarray(D), np.asarray(D_ref),
                               rtol=5e-2, atol=5e-2)

    print("KERNEL_OK")
</pallas_src>

<mosaic_0001>
module attributes {stable_mosaic.version = 11 : i64} {
  func.func @_fused_unet_spectral_d_kernel(%arg0: i32, %arg1: memref<2x512xf32, #tpu.memory_space<vmem>>, %arg2: memref<120x432xbf16, #tpu.memory_space<vmem>>, %arg3: memref<120x1xf32, #tpu.memory_space<vmem>>, %arg4: memref<9x512xf32, #tpu.memory_space<vmem>>, %arg5: memref<9x128xf32, #tpu.memory_space<vmem>>, %arg6: memref<512x128xbf16, #tpu.memory_space<vmem>>, %arg7: memref<128x512xbf16, #tpu.memory_space<vmem>>, %arg8: memref<3x512xf32, #tpu.memory_space<vmem>>, %arg9: memref<432x512xbf16, #tpu.memory_space<vmem>>) attributes {dimension_semantics = [#tpu.dimension_semantics<arbitrary>], iteration_bounds = array<i64: 1>, scalar_prefetch = 0 : i64, scratch_operands = 1 : i64, tpu.core_type = #tpu.core_type<tc>, window_params = [{pipeline_mode = #tpu.pipeline_mode<synchronous>, transform_indices = @transform_0, window_bounds = array<i64: 2, 512>}, {pipeline_mode = #tpu.pipeline_mode<synchronous>, transform_indices = @transform_1, window_bounds = array<i64: 120, 432>}, {pipeline_mode = #tpu.pipeline_mode<synchronous>, transform_indices = @transform_2, window_bounds = array<i64: 120, 1>}, {pipeline_mode = #tpu.pipeline_mode<synchronous>, transform_indices = @transform_3, window_bounds = array<i64: 9, 512>}, {pipeline_mode = #tpu.pipeline_mode<synchronous>, transform_indices = @transform_4, window_bounds = array<i64: 9, 128>}, {pipeline_mode = #tpu.pipeline_mode<synchronous>, transform_indices = @transform_5, window_bounds = array<i64: 512, 128>}, {pipeline_mode = #tpu.pipeline_mode<synchronous>, transform_indices = @transform_6, window_bounds = array<i64: 128, 512>}, {pipeline_mode = #tpu.pipeline_mode<synchronous>, transform_indices = @transform_7, window_bounds = array<i64: 3, 512>}]} {
    %cst = arith.constant 0.000000e+00 : bf16
    %0 = vector.broadcast %cst : bf16 to vector<432x512xbf16>
    %c0 = arith.constant 0 : index
    %c0_0 = arith.constant 0 : index
    %1 = vector.load %arg9[%c0, %c0_0] : memref<432x512xbf16, #tpu.memory_space<vmem>>, vector<432x512xbf16>
    tpu.vector_store %arg9[%c0, %c0_0], %0 {strides = array<i32>} : memref<432x512xbf16, #tpu.memory_space<vmem>>, vector<432x512xbf16>,
    %c0_1 = arith.constant 0 : index
    %c0_2 = arith.constant 0 : index
    %2 = vector.load %arg1[%c0_1, %c0_2] : memref<2x512xf32, #tpu.memory_space<vmem>>, vector<2x512xf32>
    %c17_i32 = arith.constant 17 : i32
    %3 = tpu.dynamic_rotate %2 by %c17_i32 dim 1 : vector<2x512xf32>, i32 -> vector<2x512xf32>
    %c0_3 = arith.constant 0 : index
    %c0_4 = arith.constant 0 : index
    %4 = vector.load %arg4[%c0_3, %c0_4] : memref<9x512xf32, #tpu.memory_space<vmem>>, vector<1x512xf32>
    %5 = vector.broadcast %4 : vector<1x512xf32> to vector<2x512xf32>
    %6 = arith.mulf %3, %5 : vector<2x512xf32>
    %7 = arith.truncf %6 : vector<2x512xf32> to vector<2x512xbf16>
    %c0_5 = arith.constant 0 : index
    %c0_6 = arith.constant 0 : index
    %8 = vector.load %arg9[%c0_5, %c0_6] : memref<432x512xbf16, #tpu.memory_space<vmem>>, vector<2x512xbf16>
    tpu.vector_store %arg9[%c0_5, %c0_6], %7 {strides = array<i32>} : memref<432x512xbf16, #tpu.memory_space<vmem>>, vector<2x512xbf16>,
    %c16_i32 = arith.constant 16 : i32
    %9 = tpu.dynamic_rotate %2 by %c16_i32 dim 1 : vector<2x512xf32>, i32 -> vector<2x512xf32>
    %c1 = arith.constant 1 : index
    %c0_7 = arith.constant 0 : index
    %10 = vector.load %arg4[%c1, %c0_7] : memref<9x512xf32, #tpu.memory_space<vmem>>, vector<1x512xf32>
    %11 = vector.broadcast %10 : vector<1x512xf32> to vector<2x512xf32>
    %12 = arith.mulf %9, %11 : vector<2x512xf32>
    %13 = arith.truncf %12 : vector<2x512xf32> to vector<2x512xbf16>
    %c16 = arith.constant 16 : index
    %c0_8 = arith.constant 0 : index
    %14 = vector.load %arg9[%c16, %c0_8] : memref<432x512xbf16, #tpu.memory_space<vmem>>, vector<2x512xbf16>
    tpu.vector_store %arg9[%c16, %c0_8], %13 {strides = array<i32>} : memref<432x512xbf16, #tpu.memory_space<vmem>>, vector<2x512xbf16>,
    %c15_i32 = arith.constant 15 : i32
    %15 = tpu.dynamic_rotate %2 by %c15_i32 dim 1 : vector<2x512xf32>, i32 -> vector<2x512xf32>
    %c2 = arith.constant 2 : index
    %c0_9 = arith.constant 0 : index
    %16 = vector.load %arg4[%c2, %c0_9] : memref<9x512xf32, #tpu.memory_space<vmem>>, vector<1x512xf32>
    %17 = vector.broadcast %16 : vector<1x512xf32> to vector<2x512xf32>
    %18 = arith.mulf %15, %17 : vector<2x512xf32>
    %19 = arith.truncf %18 : vector<2x512xf32> to vector<2x512xbf16>
    %c32 = arith.constant 32 : index
    %c0_10 = arith.constant 0 : index
    %20 = vector.load %arg9[%c32, %c0_10] : memref<432x512xbf16, #tpu.memory_space<vmem>>, vector<2x512xbf16>
    tpu.vector_store %arg9[%c32, %c0_10], %19 {strides = array<i32>} : memref<432x512xbf16, #tpu.memory_space<vmem>>, vector<2x512xbf16>,
    %c1_i32 = arith.constant 1 : i32
    %21 = tpu.dynamic_rotate %2 by %c1_i32 dim 1 : vector<2x512xf32>, i32 -> vector<2x512xf32>
    %c3 = arith.constant 3 : index
    %c0_11 = arith.constant 0 : index
    %22 = vector.load %arg4[%c3, %c0_11] : memref<9x512xf32, #tpu.memory_space<vmem>>, vector<1x512xf32>
    %23 = vector.broadcast %22 : vector<1x512xf32> to vector<2x512xf32>
    %24 = arith.mulf %21, %23 : vector<2x512xf32>
    %25 = arith.truncf %24 : vector<2x512xf32> to vector<2x512xbf16>
    %c48 = arith.constant 48 : index
    %c0_12 = arith.constant 0 : index
    %26 = vector.load %arg9[%c48, %c0_12] : memref<432x512xbf16, #tpu.memory_space<vmem>>, vector<2x512xbf16>
    tpu.vector_store %arg9[%c48, %c0_12], %25 {strides = array<i32>} : memref<432x512xbf16, #tpu.memory_space<vmem>>, vector<2x512xbf16>,
    %27 = arith.truncf %2 : vector<2x512xf32> to vector<2x512xbf16>
    %c64 = arith.constant 64 : index
    %c0_13 = arith.constant 0 : index
    %28 = vector.load %arg9[%c64, %c0_13] : memref<432x512xbf16, #tpu.memory_space<vmem>>, vector<2x512xbf16>
    tpu.vector_store %arg9[%c64, %c0_13], %27 {strides = array<i32>} : memref<432x512xbf16, #tpu.memory_space<vmem>>, vector<2x512xbf16>,
    %c511_i32 = arith.constant 511 : i32
    %29 = tpu.dynamic_rotate %2 by %c511_i32 dim 1 : vector<2x512xf32>, i32 -> vector<2x512xf32>
    %c5 = arith.constant 5 : index
    %c0_14 = arith.constant 0 : index
    %30 = vector.load %arg4[%c5, %c0_14] : memref<9x512xf32, #tpu.memory_space<vmem>>, vector<1x512xf32>
    %31 = vector.broadcast %30 : vector<1x512xf32> to vector<2x512xf32>
    %32 = arith.mulf %29, %31 : vector<2x512xf32>
    %33 = arith.truncf %32 : vector<2x512xf32> to vector<2x512xbf16>
    %c80 = arith.constant 80 : index
    %c0_15 = arith.constant 0 : index
    %34 = vector.load %arg9[%c80, %c0_15] : memref<432x512xbf16, #tpu.memory_space<vmem>>, vector<2x512xbf16>
    tpu.vector_store %arg9[%c80, %c0_15], %33 {strides = array<i32>} : memref<432x512xbf16, #tpu.memory_space<vmem>>, vector<2x512xbf16>,
    %c497_i32 = arith.constant 497 : i32
    %35 = tpu.dynamic_rotate %2 by %c497_i32 dim 1 : vector<2x512xf32>, i32 -> vector<2x512xf32>
    %c6 = arith.constant 6 : index
    %c0_16 = arith.constant 0 : index
    %36 = vector.load %arg4[%c6, %c0_16] : memref<9x512xf32, #tpu.memory_space<vmem>>, vector<1x512xf32>
    %37 = vector.broadcast %36 : vector<1x512xf32> to vector<2x512xf32>
    %38 = arith.mulf %35, %37 : vector<2x512xf32>
    %39 = arith.truncf %38 : vector<2x512xf32> to vector<2x512xbf16>
    %c96 = arith.constant 96 : index
    %c0_17 = arith.constant 0 : index
    %40 = vector.load %arg9[%c96, %c0_17] : memref<432x512xbf16, #tpu.memory_space<vmem>>, vector<2x512xbf16>
    tpu.vector_store %arg9[%c96, %c0_17], %39 {strides = array<i32>} : memref<432x512xbf16, #tpu.memory_space<vmem>>, vector<2x512xbf16>,
    %c496_i32 = arith.constant 496 : i32
    %41 = tpu.dynamic_rotate %2 by %c496_i32 dim 1 : vector<2x512xf32>, i32 -> vector<2x512xf32>
    %c7 = arith.constant 7 : index
    %c0_18 = arith.constant 0 : index
    %42 = vector.load %arg4[%c7, %c0_18] : memref<9x512xf32, #tpu.memory_space<vmem>>, vector<1x512xf32>
    %43 = vector.broadcast %42 : vector<1x512xf32> to vector<2x512xf32>
    %44 = arith.mulf %41, %43 : vector<2x512xf32>
    %45 = arith.truncf %44 : vector<2x512xf32> to vector<2x512xbf16>
    %c112 = arith.constant 112 : index
    %c0_19 = arith.constant 0 : index
    %46 = vector.load %arg9[%c112, %c0_19] : memref<432x512xbf16, #tpu.memory_space<vmem>>, vector<2x512xbf16>
    tpu.vector_store %arg9[%c112, %c0_19], %45 {strides = array<i32>} : memref<432x512xbf16, #tpu.memory_space<vmem>>, vector<2x512xbf16>,
    %c495_i32 = arith.constant 495 : i32
    %47 = tpu.dynamic_rotate %2 by %c495_i32 dim 1 : vector<2x512xf32>, i32 -> vector<2x512xf32>
    %c8 = arith.constant 8 : index
    %c0_20 = arith.constant 0 : index
    %48 = vector.load %arg4[%c8, %c0_20] : memref<9x512xf32, #tpu.memory_space<vmem>>, vector<1x512xf32>
    %49 = vector.broadcast %48 : vector<1x512xf32> to vector<2x512xf32>
    %50 = arith.mulf %47, %49 : vector<2x512xf32>
    %51 = arith.truncf %50 : vector<2x512xf32> to vector<2x512xbf16>
    %c128 = arith.constant 128 : index
    %c0_21 = arith.constant 0 : index
    %52 = vector.load %arg9[%c128, %c0_21] : memref<432x512xbf16, #tpu.memory_space<vmem>>, vector<2x512xbf16>
    tpu.vector_store %arg9[%c128, %c0_21], %51 {strides = array<i32>} : memref<432x512xbf16, #tpu.memory_space<vmem>>, vector<2x512xbf16>,
    %c0_22 = arith.constant 0 : index
    %c0_23 = arith.constant 0 : index
    %53 = vector.load %arg2[%c0_22, %c0_23] : memref<120x432xbf16, #tpu.memory_space<vmem>>, vector<16x144xbf16>
    %c0_24 = arith.constant 0 : index
    %c0_25 = arith.constant 0 : index
    %54 = vector.load %arg9[%c0_24, %c0_25] : memref<432x512xbf16, #tpu.memory_space<vmem>>, vector<144x512xbf16>
    %cst_26 = arith.constant dense<0.000000e+00> : vector<16x512xf32>
    %55 = tpu.matmul %53, %54, %cst_26 {dimension_numbers = #tpu.dot_dimension_numbers<[1], [0], [0], [1], [0, 0, 1, 1], [], []>} : vector<16x144xbf16>, vector<144x512xbf16>, vector<16x512xf32> -> vector<16x512xf32>
    %c0_27 = arith.constant 0 : index
    %c0_28 = arith.constant 0 : index
    %56 = vector.load %arg3[%c0_27, %c0_28] : memref<120x1xf32, #tpu.memory_space<vmem>>, vector<16x1xf32>
    %57 = vector.broadcast %56 : vector<16x1xf32> to vector<16x512xf32>
    %58 = arith.addf %55, %57 : vector<16x512xf32>
    %cst_29 = arith.constant 0.000000e+00 : f32
    %59 = vector.broadcast %cst_29 : f32 to vector<16x512xf32>
    %60 = arith.maximumf %58, %59 : vector<16x512xf32>
    %c17_i32_30 = arith.constant 17 : i32
    %61 = tpu.dynamic_rotate %60 by %c17_i32_30 dim 1 : vector<16x512xf32>, i32 -> vector<16x512xf32>
    %c0_31 = arith.constant 0 : index
    %c0_32 = arith.constant 0 : index
    %62 = vector.load %arg4[%c0_31, %c0_32] : memref<9x512xf32, #tpu.memory_space<vmem>>, vector<1x512xf32>
    %63 = vector.broadcast %62 : vector<1x512xf32> to vector<16x512xf32>
    %64 = arith.mulf %61, %63 : vector<16x512xf32>
    %65 = arith.truncf %64 : vector<16x512xf32> to vector<16x512xbf16>
    %c0_33 = arith.constant 0 : index
    %c0_34 = arith.constant 0 : index
    %66 = vector.load %arg9[%c0_33, %c0_34] : memref<432x512xbf16, #tpu.memory_space<vmem>>, vector<16x512xbf16>
    tpu.vector_store %arg9[%c0_33, %c0_34], %65 {strides = array<i32>} : memref<432x512xbf16, #tpu.memory_space<vmem>>, vector<16x512xbf16>,
    %c16_i32_35 = arith.constant 16 : i32
    %67 = tpu.dynamic_rotate %60 by %c16_i32_35 dim 1 : vector<16x512xf32>, i32 -> vector<16x512xf32>
    %c1_36 = arith.constant 1 : index
    %c0_37 = arith.constant 0 : index
    %68 = vector.load %arg4[%c1_36, %c0_37] : memref<9x512xf32, #tpu.memory_space<vmem>>, vector<1x512xf32>
    %69 = vector.broadcast %68 : vector<1x512xf32> to vector<16x512xf32>
    %70 = arith.mulf %67, %69 : vector<16x512xf32>
    %71 = arith.truncf %70 : vector<16x512xf32> to vector<16x512xbf16>
    %c16_38 = arith.constant 16 : index
    %c0_39 = arith.constant 0 : index
    %72 = vector.load %arg9[%c16_38, %c0_39] : memref<432x512xbf16, #tpu.memory_space<vmem>>, vector<16x512xbf16>
    tpu.vector_store %arg9[%c16_38, %c0_39], %71 {strides = array<i32>} : memref<432x512xbf16, #tpu.memory_space<vmem>>, vector<16x512xbf16>,
    %c15_i32_40 = arith.constant 15 : i32
    %73 = tpu.dynamic_rotate %60 by %c15_i32_40 dim 1 : vector<16x512xf32>, i32 -> vector<16x512xf32>
    %c2_41 = arith.constant 2 : index
    %c0_42 = arith.constant 0 : index
    %74 = vector.load %arg4[%c2_41, %c0_42] : memref<9x512xf32, #tpu.memory_space<vmem>>, vector<1x512xf32>
    %75 = vector.broadcast %74 : vector<1x512xf32> to vector<16x512xf32>
    %76 = arith.mulf %73, %75 : vector<16x512xf32>
    %77 = arith.truncf %76 : vector<16x512xf32> to vector<16x512xbf16>
    %c32_43 = arith.constant 32 : index
    %c0_44 = arith.constant 0 : index
    %78 = vector.load %arg9[%c32_43, %c0_44] : memref<432x512xbf16, #tpu.memory_space<vmem>>, vector<16x512xbf16>
    tpu.vector_store %arg9[%c32_43, %c0_44], %77 {strides = array<i32>} : memref<432x512xbf16, #tpu.memory_space<vmem>>, vector<16x512xbf16>,
    %c1_i32_45 = arith.constant 1 : i32
    %79 = tpu.dynamic_rotate %60 by %c1_i32_45 dim 1 : vector<16x512xf32>, i32 -> vector<16x512xf32>
    %c3_46 = arith.constant 3 : index
    %c0_47 = arith.constant 0 : index
    %80 = vector.load %arg4[%c3_46, %c0_47] : memref<9x512xf32, #tpu.memory_space<vmem>>, vector<1x512xf32>
    %81 = vector.broadcast %80 : vector<1x512xf32> to vector<16x512xf32>
    %82 = arith.mulf %79, %81 : vector<16x512xf32>
    %83 = arith.truncf %82 : vector<16x512xf32> to vector<16x512xbf16>
    %c48_48 = arith.constant 48 : index
    %c0_49 = arith.constant 0 : index
    %84 = vector.load %arg9[%c48_48, %c0_49] : memref<432x512xbf16, #tpu.memory_space<vmem>>, vector<16x512xbf16>
    tpu.vector_store %arg9[%c48_48, %c0_49], %83 {strides = array<i32>} : memref<432x512xbf16, #tpu.memory_space<vmem>>, vector<16x512xbf16>,
    %85 = arith.truncf %60 : vector<16x512xf32> to vector<16x512xbf16>
    %c64_50 = arith.constant 64 : index
    %c0_51 = arith.constant 0 : index
    %86 = vector.load %arg9[%c64_50, %c0_51] : memref<432x512xbf16, #tpu.memory_space<vmem>>, vector<16x512xbf16>
    tpu.vector_store %arg9[%c64_50, %c0_51], %85 {strides = array<i32>} : memref<432x512xbf16, #tpu.memory_space<vmem>>, vector<16x512xbf16>,
    %c511_i32_52 = arith.constant 511 : i32
    %87 = tpu.dynamic_rotate %60 by %c511_i32_52 dim 1 : vector<16x512xf32>, i32 -> vector<16x512xf32>
    %c5_53 = arith.constant 5 : index
    %c0_54 = arith.constant 0 : index
    %88 = vector.load %arg4[%c5_53, %c0_54] : memref<9x512xf32, #tpu.memory_space<vmem>>, vector<1x512xf32>
    %89 = vector.broadcast %88 : vector<1x512xf32> to vector<16x512xf32>
    %90 = arith.mulf %87, %89 : vector<16x512xf32>
    %91 = arith.truncf %90 : vector<16x512xf32> to vector<16x512xbf16>
    %c80_55 = arith.constant 80 : index
    %c0_56 = arith.constant 0 : index
    %92 = vector.load %arg9[%c80_55, %c0_56] : memref<432x512xbf16, #tpu.memory_space<vmem>>, vector<16x512xbf16>
    tpu.vector_store %arg9[%c80_55, %c0_56], %91 {strides = array<i32>} : memref<432x512xbf16, #tpu.memory_space<vmem>>, vector<16x512xbf16>,
    %c497_i32_57 = arith.constant 497 : i32
    %93 = tpu.dynamic_rotate %60 by %c497_i32_57 dim 1 : vector<16x512xf32>, i32 -> vector<16x512xf32>
    %c6_58 = arith.constant 6 : index
    %c0_59 = arith.constant 0 : index
    %94 = vector.load %arg4[%c6_58, %c0_59] : memref<9x512xf32, #tpu.memory_space<vmem>>, vector<1x512xf32>
    %95 = vector.broadcast %94 : vector<1x512xf32> to vector<16x512xf32>
    %96 = arith.mulf %93, %95 : vector<16x512xf32>
    %97 = arith.truncf %96 : vector<16x512xf32> to vector<16x512xbf16>
    %c96_60 = arith.constant 96 : index
    %c0_61 = arith.constant 0 : index
    %98 = vector.load %arg9[%c96_60, %c0_61] : memref<432x512xbf16, #tpu.memory_space<vmem>>, vector<16x512xbf16>
    tpu.vector_store %arg9[%c96_60, %c0_61], %97 {strides = array<i32>} : memref<432x512xbf16, #tpu.memory_space<vmem>>, vector<16x512xbf16>,
    %c496_i32_62 = arith.constant 496 : i32
    %99 = tpu.dynamic_rotate %60 by %c496_i32_62 dim 1 : vector<16x512xf32>, i32 -> vector<16x512xf32>
    %c7_63 = arith.constant 7 : index
    %c0_64 = arith.constant 0 : index
    %100 = vector.load %arg4[%c7_63, %c0_64] : memref<9x512xf32, #tpu.memory_space<vmem>>, vector<1x512xf32>
    %101 = vector.broadcast %100 : vector<1x512xf32> to vector<16x512xf32>
    %102 = arith.mulf %99, %101 : vector<16x512xf32>
    %103 = arith.truncf %102 : vector<16x512xf32> to vector<16x512xbf16>
    %c112_65 = arith.constant 112 : index
    %c0_66 = arith.constant 0 : index
    %104 = vector.load %arg9[%c112_65, %c0_66] : memref<432x512xbf16, #tpu.memory_space<vmem>>, vector<16x512xbf16>
    tpu.vector_store %arg9[%c112_65, %c0_66], %103 {strides = array<i32>} : memref<432x512xbf16, #tpu.memory_space<vmem>>, vector<16x512xbf16>,
    %c495_i32_67 = arith.constant 495 : i32
    %105 = tpu.dynamic_rotate %60 by %c495_i32_67 dim 1 : vector<16x512xf32>, i32 -> vector<16x512xf32>
    %c8_68 = arith.constant 8 : index
    %c0_69 = arith.constant 0 : index
    %106 = vector.load %arg4[%c8_68, %c0_69] : memref<9x512xf32, #tpu.memory_space<vmem>>, vector<1x512xf32>
    %107 = vector.broadcast %106 : vector<1x512xf32> to vector<16x512xf32>
    %108 = arith.mulf %105, %107 : vector<16x512xf32>
    %109 = arith.truncf %108 : vector<16x512xf32> to vector<16x512xbf16>
    %c128_70 = arith.constant 128 : index
    %c0_71 = arith.constant 0 : index
    %110 = vector.load %arg9[%c128_70, %c0_71] : memref<432x512xbf16, #tpu.memory_space<vmem>>, vector<16x512xbf16>
    tpu.vector_store %arg9[%c128_70, %c0_71], %109 {strides = array<i32>} : memref<432x512xbf16, #tpu.memory_space<vmem>>, vector<16x512xbf16>,
    %c16_72 = arith.constant 16 : index
    %c0_73 = arith.constant 0 : index
    %111 = vector.load %arg2[%c16_72, %c0_73] : memref<120x432xbf16, #tpu.memory_space<vmem>>, vector<16x144xbf16>
    %c0_74 = arith.constant 0 : index
    %c0_75 = arith.constant 0 : index
    %112 = vector.load %arg9[%c0_74, %c0_75] : memref<432x512xbf16, #tpu.memory_space<vmem>>, vector<144x512xbf16>
    %cst_76 = arith.constant dense<0.000000e+00> : vector<16x512xf32>
    %113 = tpu.matmul %111, %112, %cst_76 {dimension_numbers = #tpu.dot_dimension_numbers<[1], [0], [0], [1], [0, 0, 1, 1], [], []>} : vector<16x144xbf16>, vector<144x512xbf16>, vector<16x512xf32> -> vector<16x512xf32>
    %c16_77 = arith.constant 16 : index
    %c0_78 = arith.constant 0 : index
    %114 = vector.load %arg3[%c16_77, %c0_78] : memref<120x1xf32, #tpu.memory_space<vmem>>, vector<16x1xf32>
    %115 = vector.broadcast %114 : vector<16x1xf32> to vector<16x512xf32>
    %116 = arith.addf %113, %115 : vector<16x512xf32>
    %cst_79 = arith.constant 0.000000e+00 : f32
    %117 = vector.broadcast %cst_79 : f32 to vector<16x512xf32>
    %118 = arith.maximumf %116, %117 : vector<16x512xf32>
    %c511_i32_80 = arith.constant 511 : i32
    %119 = tpu.dynamic_rotate %118 by %c511_i32_80 dim 1 : vector<16x512xf32>, i32 -> vector<16x512xf32>
    %120 = arith.maximumf %118, %119 : vector<16x512xf32>
    %c496_i32_81 = arith.constant 496 : i32
    %121 = tpu.dynamic_rotate %118 by %c496_i32_81 dim 1 : vector<16x512xf32>, i32 -> vector<16x512xf32>
    %c495_i32_82 = arith.constant 495 : i32
    %122 = tpu.dynamic_rotate %118 by %c495_i32_82 dim 1 : vector<16x512xf32>, i32 -> vector<16x512xf32>
    %123 = arith.maximumf %121, %122 : vector<16x512xf32>
    %124 = arith.maximumf %120, %123 : vector<16x512xf32>
    %125 = arith.truncf %124 : vector<16x512xf32> to vector<16x512xbf16>
    %c0_83 = arith.constant 0 : index
    %c0_84 = arith.constant 0 : index
    %126 = vector.load %arg6[%c0_83, %c0_84] : memref<512x128xbf16, #tpu.memory_space<vmem>>, vector<512x128xbf16>
    %cst_85 = arith.constant dense<0.000000e+00> : vector<16x128xf32>
    %127 = tpu.matmul %125, %126, %cst_85 {dimension_numbers = #tpu.dot_dimension_numbers<[1], [0], [0], [1], [0, 0, 1, 1], [], []>} : vector<16x512xbf16>, vector<512x128xbf16>, vector<16x128xf32> -> vector<16x128xf32>
    %c9_i32 = arith.constant 9 : i32
    %128 = tpu.dynamic_rotate %127 by %c9_i32 dim 1 : vector<16x128xf32>, i32 -> vector<16x128xf32>
    %c0_86 = arith.constant 0 : index
    %c0_87 = arith.constant 0 : index
    %129 = vector.load %arg5[%c0_86, %c0_87] : memref<9x128xf32, #tpu.memory_space<vmem>>, vector<1x128xf32>
    %130 = vector.broadcast %129 : vector<1x128xf32> to vector<16x128xf32>
    %131 = arith.mulf %128, %130 : vector<16x128xf32>
    %132 = arith.truncf %131 : vector<16x128xf32> to vector<16x128xbf16>
    %c0_88 = arith.constant 0 : index
    %c0_89 = arith.constant 0 : index
    %133 = vector.load %arg9[%c0_88, %c0_89] : memref<432x512xbf16, #tpu.memory_space<vmem>>, vector<16x128xbf16>
    tpu.vector_store %arg9[%c0_88, %c0_89], %132 {strides = array<i32>} : memref<432x512xbf16, #tpu.memory_space<vmem>>, vector<16x128xbf16>,
    %c8_i32 = arith.constant 8 : i32
    %134 = tpu.dynamic_rotate %127 by %c8_i32 dim 1 : vector<16x128xf32>, i32 -> vector<16x128xf32>
    %c1_90 = arith.constant 1 : index
    %c0_91 = arith.constant 0 : index
    %135 = vector.load %arg5[%c1_90, %c0_91] : memref<9x128xf32, #tpu.memory_space<vmem>>, vector<1x128xf32>
    %136 = vector.broadcast %135 : vector<1x128xf32> to vector<16x128xf32>
    %137 = arith.mulf %134, %136 : vector<16x128xf32>
    %138 = arith.truncf %137 : vector<16x128xf32> to vector<16x128xbf16>
    %c16_92 = arith.constant 16 : index
    %c0_93 = arith.constant 0 : index
    %139 = vector.load %arg9[%c16_92, %c0_93] : memref<432x512xbf16, #tpu.memory_space<vmem>>, vector<16x128xbf16>
    tpu.vector_store %arg9[%c16_92, %c0_93], %138 {strides = array<i32>} : memref<432x512xbf16, #tpu.memory_space<vmem>>, vector<16x128xbf16>,
    %c7_i32 = arith.constant 7 : i32
    %140 = tpu.dynamic_rotate %127 by %c7_i32 dim 1 : vector<16x128xf32>, i32 -> vector<16x128xf32>
    %c2_94 = arith.constant 2 : index
    %c0_95 = arith.constant 0 : index
    %141 = vector.load %arg5[%c2_94, %c0_95] : memref<9x128xf32, #tpu.memory_space<vmem>>, vector<1x128xf32>
    %142 = vector.broadcast %141 : vector<1x128xf32> to vector<16x128xf32>
    %143 = arith.mulf %140, %142 : vector<16x128xf32>
    %144 = arith.truncf %143 : vector<16x128xf32> to vector<16x128xbf16>
    %c32_96 = arith.constant 32 : index
    %c0_97 = arith.constant 0 : index
    %145 = vector.load %arg9[%c32_96, %c0_97] : memref<432x512xbf16, #tpu.memory_space<vmem>>, vector<16x128xbf16>
    tpu.vector_store %arg9[%c32_96, %c0_97], %144 {strides = array<i32>} : memref<432x512xbf16, #tpu.memory_space<vmem>>, vector<16x128xbf16>,
    %c1_i32_98 = arith.constant 1 : i32
    %146 = tpu.dynamic_rotate %127 by %c1_i32_98 dim 1 : vector<16x128xf32>, i32 -> vector<16x128xf32>
    %c3_99 = arith.constant 3 : index
    %c0_100 = arith.constant 0 : index
    %147 = vector.load %arg5[%c3_99, %c0_100] : memref<9x128xf32, #tpu.memory_space<vmem>>, vector<1x128xf32>
    %148 = vector.broadcast %147 : vector<1x128xf32> to vector<16x128xf32>
    %149 = arith.mulf %146, %148 : vector<16x128xf32>
    %150 = arith.truncf %149 : vector<16x128xf32> to vector<16x128xbf16>
    %c48_101 = arith.constant 48 : index
    %c0_102 = arith.constant 0 : index
    %151 = vector.load %arg9[%c48_101, %c0_102] : memref<432x512xbf16, #tpu.memory_space<vmem>>, vector<16x128xbf16>
    tpu.vector_store %arg9[%c48_101, %c0_102], %150 {strides = array<i32>} : memref<432x512xbf16, #tpu.memory_space<vmem>>, vector<16x128xbf16>,
    %152 = arith.truncf %127 : vector<16x128xf32> to vector<16x128xbf16>
    %c64_103 = arith.constant 64 : index
    %c0_104 = arith.constant 0 : index
    %153 = vector.load %arg9[%c64_103, %c0_104] : memref<432x512xbf16, #tpu.memory_space<vmem>>, vector<16x128xbf16>
    tpu.vector_store %arg9[%c64_103, %c0_104], %152 {strides = array<i32>} : memref<432x512xbf16, #tpu.memory_space<vmem>>, vector<16x128xbf16>,
    %c127_i32 = arith.constant 127 : i32
    %154 = tpu.dynamic_rotate %127 by %c127_i32 dim 1 : vector<16x128xf32>, i32 -> vector<16x128xf32>
    %c5_105 = arith.constant 5 : index
    %c0_106 = arith.constant 0 : index
    %155 = vector.load %arg5[%c5_105, %c0_106] : memref<9x128xf32, #tpu.memory_space<vmem>>, vector<1x128xf32>
    %156 = vector.broadcast %155 : vector<1x128xf32> to vector<16x128xf32>
    %157 = arith.mulf %154, %156 : vector<16x128xf32>
    %158 = arith.truncf %157 : vector<16x128xf32> to vector<16x128xbf16>
    %c80_107 = arith.constant 80 : index
    %c0_108 = arith.constant 0 : index
    %159 = vector.load %arg9[%c80_107, %c0_108] : memref<432x512xbf16, #tpu.memory_space<vmem>>, vector<16x128xbf16>
    tpu.vector_store %arg9[%c80_107, %c0_108], %158 {strides = array<i32>} : memref<432x512xbf16, #tpu.memory_space<vmem>>, vector<16x128xbf16>,
    %c121_i32 = arith.constant 121 : i32
    %160 = tpu.dynamic_rotate %127 by %c121_i32 dim 1 : vector<16x128xf32>, i32 -> vector<16x128xf32>
    %c6_109 = arith.constant 6 : index
    %c0_110 = arith.constant 0 : index
    %161 = vector.load %arg5[%c6_109, %c0_110] : memref<9x128xf32, #tpu.memory_space<vmem>>, vector<1x128xf32>
    %162 = vector.broadcast %161 : vector<1x128xf32> to vector<16x128xf32>
    %163 = arith.mulf %160, %162 : vector<16x128xf32>
    %164 = arith.truncf %163 : vector<16x128xf32> to vector<16x128xbf16>
    %c96_111 = arith.constant 96 : index
    %c0_112 = arith.constant 0 : index
    %165 = vector.load %arg9[%c96_111, %c0_112] : memref<432x512xbf16, #tpu.memory_space<vmem>>, vector<16x128xbf16>
    tpu.vector_store %arg9[%c96_111, %c0_112], %164 {strides = array<i32>} : memref<432x512xbf16, #tpu.memory_space<vmem>>, vector<16x128xbf16>,
    %c120_i32 = arith.constant 120 : i32
    %166 = tpu.dynamic_rotate %127 by %c120_i32 dim 1 : vector<16x128xf32>, i32 -> vector<16x128xf32>
    %c7_113 = arith.constant 7 : index
    %c0_114 = arith.constant 0 : index
    %167 = vector.load %arg5[%c7_113, %c0_114] : memref<9x128xf32, #tpu.memory_space<vmem>>, vector<1x128xf32>
    %168 = vector.broadcast %167 : vector<1x128xf32> to vector<16x128xf32>
    %169 = arith.mulf %166, %168 : vector<16x128xf32>
    %170 = arith.truncf %169 : vector<16x128xf32> to vector<16x128xbf16>
    %c112_115 = arith.constant 112 : index
    %c0_116 = arith.constant 0 : index
    %171 = vector.load %arg9[%c112_115, %c0_116] : memref<432x512xbf16, #tpu.memory_space<vmem>>, vector<16x128xbf16>
    tpu.vector_store %arg9[%c112_115, %c0_116], %170 {strides = array<i32>} : memref<432x512xbf16, #tpu.memory_space<vmem>>, vector<16x128xbf16>,
    %c119_i32 = arith.constant 119 : i32
    %172 = tpu.dynamic_rotate %127 by %c119_i32 dim 1 : vector<16x128xf32>, i32 -> vector<16x128xf32>
    %c8_117 = arith.constant 8 : index
    %c0_118 = arith.constant 0 : index
    %173 = vector.load %arg5[%c8_117, %c0_118] : memref<9x128xf32, #tpu.memory_space<vmem>>, vector<1x128xf32>
    %174 = vector.broadcast %173 : vector<1x128xf32> to vector<16x128xf32>
    %175 = arith.mulf %172, %174 : vector<16x128xf32>
    %176 = arith.truncf %175 : vector<16x128xf32> to vector<16x128xbf16>
    %c128_119 = arith.constant 128 : index
    %c0_120 = arith.constant 0 : index
    %177 = vector.load %arg9[%c128_119, %c0_120] : memref<432x512xbf16, #tpu.memory_space<vmem>>, vector<16x128xbf16>
    tpu.vector_store %arg9[%c128_119, %c0_120], %176 {strides = array<i32>} : memref<432x512xbf16, #tpu.memory_space<vmem>>, vector<16x128xbf16>,
    %c32_121 = arith.constant 32 : index
    %c0_122 = arith.constant 0 : index
    %178 = vector.load %arg2[%c32_121, %c0_122] : memref<120x432xbf16, #tpu.memory_space<vmem>>, vector<32x144xbf16>
    %c0_123 = arith.constant 0 : index
    %c0_124 = arith.constant 0 : index
    %179 = vector.load %arg9[%c0_123, %c0_124] : memref<432x512xbf16, #tpu.memory_space<vmem>>, vector<144x128xbf16>
    %cst_125 = arith.constant dense<0.000000e+00> : vector<32x128xf32>
    %180 = tpu.matmul %178, %179, %cst_125 {dimension_numbers = #tpu.dot_dimension_numbers<[1], [0], [0], [1], [0, 0, 1, 1], [], []>} : vector<32x144xbf16>, vector<144x128xbf16>, vector<32x128xf32> -> vector<32x128xf32>
    %c32_126 = arith.constant 32 : index
    %c0_127 = arith.constant 0 : index
    %181 = vector.load %arg3[%c32_126, %c0_127] : memref<120x1xf32, #tpu.memory_space<vmem>>, vector<32x1xf32>
    %182 = vector.broadcast %181 : vector<32x1xf32> to vector<32x128xf32>
    %183 = arith.addf %180, %182 : vector<32x128xf32>
    %cst_128 = arith.constant 0.000000e+00 : f32
    %184 = vector.broadcast %cst_128 : f32 to vector<32x128xf32>
    %185 = arith.maximumf %183, %184 : vector<32x128xf32>
    %c9_i32_129 = arith.constant 9 : i32
    %186 = tpu.dynamic_rotate %185 by %c9_i32_129 dim 1 : vector<32x128xf32>, i32 -> vector<32x128xf32>
    %c0_130 = arith.constant 0 : index
    %c0_131 = arith.constant 0 : index
    %187 = vector.load %arg5[%c0_130, %c0_131] : memref<9x128xf32, #tpu.memory_space<vmem>>, vector<1x128xf32>
    %188 = vector.broadcast %187 : vector<1x128xf32> to vector<32x128xf32>
    %189 = arith.mulf %186, %188 : vector<32x128xf32>
    %190 = arith.truncf %189 : vector<32x128xf32> to vector<32x128xbf16>
    %c0_132 = arith.constant 0 : index
    %c0_133 = arith.constant 0 : index
    %191 = vector.load %arg9[%c0_132, %c0_133] : memref<432x512xbf16, #tpu.memory_space<vmem>>, vector<32x128xbf16>
    tpu.vector_store %arg9[%c0_132, %c0_133], %190 {strides = array<i32>} : memref<432x512xbf16, #tpu.memory_space<vmem>>, vector<32x128xbf16>,
    %c8_i32_134 = arith.constant 8 : i32
    %192 = tpu.dynamic_rotate %185 by %c8_i32_134 dim 1 : vector<32x128xf32>, i32 -> vector<32x128xf32>
    %c1_135 = arith.constant 1 : index
    %c0_136 = arith.constant 0 : index
    %193 = vector.load %arg5[%c1_135, %c0_136] : memref<9x128xf32, #tpu.memory_space<vmem>>, vector<1x128xf32>
    %194 = vector.broadcast %193 : vector<1x128xf32> to vector<32x128xf32>
    %195 = arith.mulf %192, %194 : vector<32x128xf32>
    %196 = arith.truncf %195 : vector<32x128xf32> to vector<32x128xbf16>
    %c32_137 = arith.constant 32 : index
    %c0_138 = arith.constant 0 : index
    %197 = vector.load %arg9[%c32_137, %c0_138] : memref<432x512xbf16, #tpu.memory_space<vmem>>, vector<32x128xbf16>
    tpu.vector_store %arg9[%c32_137, %c0_138], %196 {strides = array<i32>} : memref<432x512xbf16, #tpu.memory_space<vmem>>, vector<32x128xbf16>,
    %c7_i32_139 = arith.constant 7 : i32
    %198 = tpu.dynamic_rotate %185 by %c7_i32_139 dim 1 : vector<32x128xf32>, i32 -> vector<32x128xf32>
    %c2_140 = arith.constant 2 : index
    %c0_141 = arith.constant 0 : index
    %199 = vector.load %arg5[%c2_140, %c0_141] : memref<9x128xf32, #tpu.memory_space<vmem>>, vector<1x128xf32>
    %200 = vector.broadcast %199 : vector<1x128xf32> to vector<32x128xf32>
    %201 = arith.mulf %198, %200 : vector<32x128xf32>
    %202 = arith.truncf %201 : vector<32x128xf32> to vector<32x128xbf16>
    %c64_142 = arith.constant 64 : index
    %c0_143 = arith.constant 0 : index
    %203 = vector.load %arg9[%c64_142, %c0_143] : memref<432x512xbf16, #tpu.memory_space<vmem>>, vector<32x128xbf16>
    tpu.vector_store %arg9[%c64_142, %c0_143], %202 {strides = array<i32>} : memref<432x512xbf16, #tpu.memory_space<vmem>>, vector<32x128xbf16>,
    %c1_i32_144 = arith.constant 1 : i32
    %204 = tpu.dynamic_rotate %185 by %c1_i32_144 dim 1 : vector<32x128xf32>, i32 -> vector<32x128xf32>
    %c3_145 = arith.constant 3 : index
    %c0_146 = arith.constant 0 : index
    %205 = vector.load %arg5[%c3_145, %c0_146] : memref<9x128xf32, #tpu.memory_space<vmem>>, vector<1x128xf32>
    %206 = vector.broadcast %205 : vector<1x128xf32> to vector<32x128xf32>
    %207 = arith.mulf %204, %206 : vector<32x128xf32>
    %208 = arith.truncf %207 : vector<32x128xf32> to vector<32x128xbf16>
    %c96_147 = arith.constant 96 : index
    %c0_148 = arith.constant 0 : index
    %209 = vector.load %arg9[%c96_147, %c0_148] : memref<432x512xbf16, #tpu.memory_space<vmem>>, vector<32x128xbf16>
    tpu.vector_store %arg9[%c96_147, %c0_148], %208 {strides = array<i32>} : memref<432x512xbf16, #tpu.memory_space<vmem>>, vector<32x128xbf16>,
    %210 = arith.truncf %185 : vector<32x128xf32> to vector<32x128xbf16>
    %c128_149 = arith.constant 128 : index
    %c0_150 = arith.constant 0 : index
    %211 = vector.load %arg9[%c128_149, %c0_150] : memref<432x512xbf16, #tpu.memory_space<vmem>>, vector<32x128xbf16>
    tpu.vector_store %arg9[%c128_149, %c0_150], %210 {strides = array<i32>} : memref<432x512xbf16, #tpu.memory_space<vmem>>, vector<32x128xbf16>,
    %c127_i32_151 = arith.constant 127 : i32
    %212 = tpu.dynamic_rotate %185 by %c127_i32_151 dim 1 : vector<32x128xf32>, i32 -> vector<32x128xf32>
    %c5_152 = arith.constant 5 : index
    %c0_153 = arith.constant 0 : index
    %213 = vector.load %arg5[%c5_152, %c0_153] : memref<9x128xf32, #tpu.memory_space<vmem>>, vector<1x128xf32>
    %214 = vector.broadcast %213 : vector<1x128xf32> to vector<32x128xf32>
    %215 = arith.mulf %212, %214 : vector<32x128xf32>
    %216 = arith.truncf %215 : vector<32x128xf32> to vector<32x128xbf16>
    %c160 = arith.constant 160 : index
    %c0_154 = arith.constant 0 : index
    %217 = vector.load %arg9[%c160, %c0_154] : memref<432x512xbf16, #tpu.memory_space<vmem>>, vector<32x128xbf16>
    tpu.vector_store %arg9[%c160, %c0_154], %216 {strides = array<i32>} : memref<432x512xbf16, #tpu.memory_space<vmem>>, vector<32x128xbf16>,
    %c121_i32_155 = arith.constant 121 : i32
    %218 = tpu.dynamic_rotate %185 by %c121_i32_155 dim 1 : vector<32x128xf32>, i32 -> vector<32x128xf32>
    %c6_156 = arith.constant 6 : index
    %c0_157 = arith.constant 0 : index
    %219 = vector.load %arg5[%c6_156, %c0_157] : memref<9x128xf32, #tpu.memory_space<vmem>>, vector<1x128xf32>
    %220 = vector.broadcast %219 : vector<1x128xf32> to vector<32x128xf32>
    %221 = arith.mulf %218, %220 : vector<32x128xf32>
    %222 = arith.truncf %221 : vector<32x128xf32> to vector<32x128xbf16>
    %c192 = arith.constant 192 : index
    %c0_158 = arith.constant 0 : index
    %223 = vector.load %arg9[%c192, %c0_158] : memref<432x512xbf16, #tpu.memory_space<vmem>>, vector<32x128xbf16>
    tpu.vector_store %arg9[%c192, %c0_158], %222 {strides = array<i32>} : memref<432x512xbf16, #tpu.memory_space<vmem>>, vector<32x128xbf16>,
    %c120_i32_159 = arith.constant 120 : i32
    %224 = tpu.dynamic_rotate %185 by %c120_i32_159 dim 1 : vector<32x128xf32>, i32 -> vector<32x128xf32>
    %c7_160 = arith.constant 7 : index
    %c0_161 = arith.constant 0 : index
    %225 = vector.load %arg5[%c7_160, %c0_161] : memref<9x128xf32, #tpu.memory_space<vmem>>, vector<1x128xf32>
    %226 = vector.broadcast %225 : vector<1x128xf32> to vector<32x128xf32>
    %227 = arith.mulf %224, %226 : vector<32x128xf32>
    %228 = arith.truncf %227 : vector<32x128xf32> to vector<32x128xbf16>
    %c224 = arith.constant 224 : index
    %c0_162 = arith.constant 0 : index
    %229 = vector.load %arg9[%c224, %c0_162] : memref<432x512xbf16, #tpu.memory_space<vmem>>, vector<32x128xbf16>
    tpu.vector_store %arg9[%c224, %c0_162], %228 {strides = array<i32>} : memref<432x512xbf16, #tpu.memory_space<vmem>>, vector<32x128xbf16>,
    %c119_i32_163 = arith.constant 119 : i32
    %230 = tpu.dynamic_rotate %185 by %c119_i32_163 dim 1 : vector<32x128xf32>, i32 -> vector<32x128xf32>
    %c8_164 = arith.constant 8 : index
    %c0_165 = arith.constant 0 : index
    %231 = vector.load %arg5[%c8_164, %c0_165] : memref<9x128xf32, #tpu.memory_space<vmem>>, vector<1x128xf32>
    %232 = vector.broadcast %231 : vector<1x128xf32> to vector<32x128xf32>
    %233 = arith.mulf %230, %232 : vector<32x128xf32>
    %234 = arith.truncf %233 : vector<32x128xf32> to vector<32x128xbf16>
    %c256 = arith.constant 256 : index
    %c0_166 = arith.constant 0 : index
    %235 = vector.load %arg9[%c256, %c0_166] : memref<432x512xbf16, #tpu.memory_space<vmem>>, vector<32x128xbf16>
    tpu.vector_store %arg9[%c256, %c0_166], %234 {strides = array<i32>} : memref<432x512xbf16, #tpu.memory_space<vmem>>, vector<32x128xbf16>,
    %c64_167 = arith.constant 64 : index
    %c0_168 = arith.constant 0 : index
    %236 = vector.load %arg2[%c64_167, %c0_168] : memref<120x432xbf16, #tpu.memory_space<vmem>>, vector<32x288xbf16>
    %c0_169 = arith.constant 0 : index
    %c0_170 = arith.constant 0 : index
    %237 = vector.load %arg9[%c0_169, %c0_170] : memref<432x512xbf16, #tpu.memory_space<vmem>>, vector<288x128xbf16>
    %cst_171 = arith.constant dense<0.000000e+00> : vector<32x128xf32>
    %238 = tpu.matmul %236, %237, %cst_171 {dimension_numbers = #tpu.dot_dimension_numbers<[1], [0], [0], [1], [0, 0, 1, 1], [], []>} : vector<32x288xbf16>, vector<288x128xbf16>, vector<32x128xf32> -> vector<32x128xf32>
    %c64_172 = arith.constant 64 : index
    %c0_173 = arith.constant 0 : index
    %239 = vector.load %arg3[%c64_172, %c0_173] : memref<120x1xf32, #tpu.memory_space<vmem>>, vector<32x1xf32>
    %240 = vector.broadcast %239 : vector<32x1xf32> to vector<32x128xf32>
    %241 = arith.addf %238, %240 : vector<32x128xf32>
    %cst_174 = arith.constant 0.000000e+00 : f32
    %242 = vector.broadcast %cst_174 : f32 to vector<32x128xf32>
    %243 = arith.maximumf %241, %242 : vector<32x128xf32>
    %244 = arith.truncf %243 : vector<32x128xf32> to vector<32x128xbf16>
    %c0_175 = arith.constant 0 : index
    %c0_176 = arith.constant 0 : index
    %245 = vector.load %arg7[%c0_175, %c0_176] : memref<128x512xbf16, #tpu.memory_space<vmem>>, vector<128x512xbf16>
    %cst_177 = arith.constant dense<0.000000e+00> : vector<32x512xf32>
    %246 = tpu.matmul %244, %245, %cst_177 {dimension_numbers = #tpu.dot_dimension_numbers<[1], [0], [0], [1], [0, 0, 1, 1], [], []>} : vector<32x128xbf16>, vector<128x512xbf16>, vector<32x512xf32> -> vector<32x512xf32>
    %c17_i32_178 = arith.constant 17 : i32
    %247 = tpu.dynamic_rotate %246 by %c17_i32_178 dim 1 : vector<32x512xf32>, i32 -> vector<32x512xf32>
    %c0_179 = arith.constant 0 : index
    %c0_180 = arith.constant 0 : index
    %248 = vector.load %arg4[%c0_179, %c0_180] : memref<9x512xf32, #tpu.memory_space<vmem>>, vector<1x512xf32>
    %249 = vector.broadcast %248 : vector<1x512xf32> to vector<32x512xf32>
    %250 = arith.mulf %247, %249 : vector<32x512xf32>
    %251 = arith.truncf %250 : vector<32x512xf32> to vector<32x512xbf16>
    %c0_181 = arith.constant 0 : index
    %c0_182 = arith.constant 0 : index
    %252 = vector.load %arg9[%c0_181, %c0_182] : memref<432x512xbf16, #tpu.memory_space<vmem>>, vector<32x512xbf16>
    tpu.vector_store %arg9[%c0_181, %c0_182], %251 {strides = array<i32>} : memref<432x512xbf16, #tpu.memory_space<vmem>>, vector<32x512xbf16>,
    %c17_i32_183 = arith.constant 17 : i32
    %253 = tpu.dynamic_rotate %118 by %c17_i32_183 dim 1 : vector<16x512xf32>, i32 -> vector<16x512xf32>
    %c0_184 = arith.constant 0 : index
    %c0_185 = arith.constant 0 : index
    %254 = vector.load %arg4[%c0_184, %c0_185] : memref<9x512xf32, #tpu.memory_space<vmem>>, vector<1x512xf32>
    %255 = vector.broadcast %254 : vector<1x512xf32> to vector<16x512xf32>
    %256 = arith.mulf %253, %255 : vector<16x512xf32>
    %257 = arith.truncf %256 : vector<16x512xf32> to vector<16x512xbf16>
    %c32_186 = arith.constant 32 : index
    %c0_187 = arith.constant 0 : index
    %258 = vector.load %arg9[%c32_186, %c0_187] : memref<432x512xbf16, #tpu.memory_space<vmem>>, vector<16x512xbf16>
    tpu.vector_store %arg9[%c32_186, %c0_187], %257 {strides = array<i32>} : memref<432x512xbf16, #tpu.memory_space<vmem>>, vector<16x512xbf16>,
    %c16_i32_188 = arith.constant 16 : i32
    %259 = tpu.dynamic_rotate %246 by %c16_i32_188 dim 1 : vector<32x512xf32>, i32 -> vector<32x512xf32>
    %c1_189 = arith.constant 1 : index
    %c0_190 = arith.constant 0 : index
    %260 = vector.load %arg4[%c1_189, %c0_190] : memref<9x512xf32, #tpu.memory_space<vmem>>, vector<1x512xf32>
    %261 = vector.broadcast %260 : vector<1x512xf32> to vector<32x512xf32>
    %262 = arith.mulf %259, %261 : vector<32x512xf32>
    %263 = arith.truncf %262 : vector<32x512xf32> to vector<32x512xbf16>
    %c48_191 = arith.constant 48 : index
    %c0_192 = arith.constant 0 : index
    %264 = vector.load %arg9[%c48_191, %c0_192] : memref<432x512xbf16, #tpu.memory_space<vmem>>, vector<32x512xbf16>
    tpu.vector_store %arg9[%c48_191, %c0_192], %263 {strides = array<i32>} : memref<432x512xbf16, #tpu.memory_space<vmem>>, vector<32x512xbf16>,
    %c16_i32_193 = arith.constant 16 : i32
    %265 = tpu.dynamic_rotate %118 by %c16_i32_193 dim 1 : vector<16x512xf32>, i32 -> vector<16x512xf32>
    %c1_194 = arith.constant 1 : index
    %c0_195 = arith.constant 0 : index
    %266 = vector.load %arg4[%c1_194, %c0_195] : memref<9x512xf32, #tpu.memory_space<vmem>>, vector<1x512xf32>
    %267 = vector.broadcast %266 : vector<1x512xf32> to vector<16x512xf32>
    %268 = arith.mulf %265, %267 : vector<16x512xf32>
    %269 = arith.truncf %268 : vector<16x512xf32> to vector<16x512xbf16>
    %c80_196 = arith.constant 80 : index
    %c0_197 = arith.constant 0 : index
    %270 = vector.load %arg9[%c80_196, %c0_197] : memref<432x512xbf16, #tpu.memory_space<vmem>>, vector<16x512xbf16>
    tpu.vector_store %arg9[%c80_196, %c0_197], %269 {strides = array<i32>} : memref<432x512xbf16, #tpu.memory_space<vmem>>, vector<16x512xbf16>,
    %c15_i32_198 = arith.constant 15 : i32
    %271 = tpu.dynamic_rotate %246 by %c15_i32_198 dim 1 : vector<32x512xf32>, i32 -> vector<32x512xf32>
    %c2_199 = arith.constant 2 : index
    %c0_200 = arith.constant 0 : index
    %272 = vector.load %arg4[%c2_199, %c0_200] : memref<9x512xf32, #tpu.memory_space<vmem>>, vector<1x512xf32>
    %273 = vector.broadcast %272 : vector<1x512xf32> to vector<32x512xf32>
    %274 = arith.mulf %271, %273 : vector<32x512xf32>
    %275 = arith.truncf %274 : vector<32x512xf32> to vector<32x512xbf16>
    %c96_201 = arith.constant 96 : index
    %c0_202 = arith.constant 0 : index
    %276 = vector.load %arg9[%c96_201, %c0_202] : memref<432x512xbf16, #tpu.memory_space<vmem>>, vector<32x512xbf16>
    tpu.vector_store %arg9[%c96_201, %c0_202], %275 {strides = array<i32>} : memref<432x512xbf16, #tpu.memory_space<vmem>>, vector<32x512xbf16>,
    %c15_i32_203 = arith.constant 15 : i32
    %277 = tpu.dynamic_rotate %118 by %c15_i32_203 dim 1 : vector<16x512xf32>, i32 -> vector<16x512xf32>
    %c2_204 = arith.constant 2 : index
    %c0_205 = arith.constant 0 : index
    %278 = vector.load %arg4[%c2_204, %c0_205] : memref<9x512xf32, #tpu.memory_space<vmem>>, vector<1x512xf32>
    %279 = vector.broadcast %278 : vector<1x512xf32> to vector<16x512xf32>
    %280 = arith.mulf %277, %279 : vector<16x512xf32>
    %281 = arith.truncf %280 : vector<16x512xf32> to vector<16x512xbf16>
    %c128_206 = arith.constant 128 : index
    %c0_207 = arith.constant 0 : index
    %282 = vector.load %arg9[%c128_206, %c0_207] : memref<432x512xbf16, #tpu.memory_space<vmem>>, vector<16x512xbf16>
    tpu.vector_store %arg9[%c128_206, %c0_207], %281 {strides = array<i32>} : memref<432x512xbf16, #tpu.memory_space<vmem>>, vector<16x512xbf16>,
    %c1_i32_208 = arith.constant 1 : i32
    %283 = tpu.dynamic_rotate %246 by %c1_i32_208 dim 1 : vector<32x512xf32>, i32 -> vector<32x512xf32>
    %c3_209 = arith.constant 3 : index
    %c0_210 = arith.constant 0 : index
    %284 = vector.load %arg4[%c3_209, %c0_210] : memref<9x512xf32, #tpu.memory_space<vmem>>, vector<1x512xf32>
    %285 = vector.broadcast %284 : vector<1x512xf32> to vector<32x512xf32>
    %286 = arith.mulf %283, %285 : vector<32x512xf32>
    %287 = arith.truncf %286 : vector<32x512xf32> to vector<32x512xbf16>
    %c144 = arith.constant 144 : index
    %c0_211 = arith.constant 0 : index
    %288 = vector.load %arg9[%c144, %c0_211] : memref<432x512xbf16, #tpu.memory_space<vmem>>, vector<32x512xbf16>
    tpu.vector_store %arg9[%c144, %c0_211], %287 {strides = array<i32>} : memref<432x512xbf16, #tpu.memory_space<vmem>>, vector<32x512xbf16>,
    %c1_i32_212 = arith.constant 1 : i32
    %289 = tpu.dynamic_rotate %118 by %c1_i32_212 dim 1 : vector<16x512xf32>, i32 -> vector<16x512xf32>
    %c3_213 = arith.constant 3 : index
    %c0_214 = arith.constant 0 : index
    %290 = vector.load %arg4[%c3_213, %c0_214] : memref<9x512xf32, #tpu.memory_space<vmem>>, vector<1x512xf32>
    %291 = vector.broadcast %290 : vector<1x512xf32> to vector<16x512xf32>
    %292 = arith.mulf %289, %291 : vector<16x512xf32>
    %293 = arith.truncf %292 : vector<16x512xf32> to vector<16x512xbf16>
    %c176 = arith.constant 176 : index
    %c0_215 = arith.constant 0 : index
    %294 = vector.load %arg9[%c176, %c0_215] : memref<432x512xbf16, #tpu.memory_space<vmem>>, vector<16x512xbf16>
    tpu.vector_store %arg9[%c176, %c0_215], %293 {strides = array<i32>} : memref<432x512xbf16, #tpu.memory_space<vmem>>, vector<16x512xbf16>,
    %295 = arith.truncf %246 : vector<32x512xf32> to vector<32x512xbf16>
    %c192_216 = arith.constant 192 : index
    %c0_217 = arith.constant 0 : index
    %296 = vector.load %arg9[%c192_216, %c0_217] : memref<432x512xbf16, #tpu.memory_space<vmem>>, vector<32x512xbf16>
    tpu.vector_store %arg9[%c192_216, %c0_217], %295 {strides = array<i32>} : memref<432x512xbf16, #tpu.memory_space<vmem>>, vector<32x512xbf16>,
    %297 = arith.truncf %118 : vector<16x512xf32> to vector<16x512xbf16>
    %c224_218 = arith.constant 224 : index
    %c0_219 = arith.constant 0 : index
    %298 = vector.load %arg9[%c224_218, %c0_219] : memref<432x512xbf16, #tpu.memory_space<vmem>>, vector<16x512xbf16>
    tpu.vector_store %arg9[%c224_218, %c0_219], %297 {strides = array<i32>} : memref<432x512xbf16, #tpu.memory_space<vmem>>, vector<16x512xbf16>,
    %c511_i32_220 = arith.constant 511 : i32
    %299 = tpu.dynamic_rotate %246 by %c511_i32_220 dim 1 : vector<32x512xf32>, i32 -> vector<32x512xf32>
    %c5_221 = arith.constant 5 : index
    %c0_222 = arith.constant 0 : index
    %300 = vector.load %arg4[%c5_221, %c0_222] : memref<9x512xf32, #tpu.memory_space<vmem>>, vector<1x512xf32>
    %301 = vector.broadcast %300 : vector<1x512xf32> to vector<32x512xf32>
    %302 = arith.mulf %299, %301 : vector<32x512xf32>
    %303 = arith.truncf %302 : vector<32x512xf32> to vector<32x512xbf16>
    %c240 = arith.constant 240 : index
    %c0_223 = arith.constant 0 : index
    %304 = vector.load %arg9[%c240, %c0_223] : memref<432x512xbf16, #tpu.memory_space<vmem>>, vector<32x512xbf16>
    tpu.vector_store %arg9[%c240, %c0_223], %303 {strides = array<i32>} : memref<432x512xbf16, #tpu.memory_space<vmem>>, vector<32x512xbf16>,
    %c511_i32_224 = arith.constant 511 : i32
    %305 = tpu.dynamic_rotate %118 by %c511_i32_224 dim 1 : vector<16x512xf32>, i32 -> vector<16x512xf32>
    %c5_225 = arith.constant 5 : index
    %c0_226 = arith.constant 0 : index
    %306 = vector.load %arg4[%c5_225, %c0_226] : memref<9x512xf32, #tpu.memory_space<vmem>>, vector<1x512xf32>
    %307 = vector.broadcast %306 : vector<1x512xf32> to vector<16x512xf32>
    %308 = arith.mulf %305, %307 : vector<16x512xf32>
    %309 = arith.truncf %308 : vector<16x512xf32> to vector<16x512xbf16>
    %c272 = arith.constant 272 : index
    %c0_227 = arith.constant 0 : index
    %310 = vector.load %arg9[%c272, %c0_227] : memref<432x512xbf16, #tpu.memory_space<vmem>>, vector<16x512xbf16>
    tpu.vector_store %arg9[%c272, %c0_227], %309 {strides = array<i32>} : memref<432x512xbf16, #tpu.memory_space<vmem>>, vector<16x512xbf16>,
    %c497_i32_228 = arith.constant 497 : i32
    %311 = tpu.dynamic_rotate %246 by %c497_i32_228 dim 1 : vector<32x512xf32>, i32 -> vector<32x512xf32>
    %c6_229 = arith.constant 6 : index
    %c0_230 = arith.constant 0 : index
    %312 = vector.load %arg4[%c6_229, %c0_230] : memref<9x512xf32, #tpu.memory_space<vmem>>, vector<1x512xf32>
    %313 = vector.broadcast %312 : vector<1x512xf32> to vector<32x512xf32>
    %314 = arith.mulf %311, %313 : vector<32x512xf32>
    %315 = arith.truncf %314 : vector<32x512xf32> to vector<32x512xbf16>
    %c288 = arith.constant 288 : index
    %c0_231 = arith.constant 0 : index
    %316 = vector.load %arg9[%c288, %c0_231] : memref<432x512xbf16, #tpu.memory_space<vmem>>, vector<32x512xbf16>
    tpu.vector_store %arg9[%c288, %c0_231], %315 {strides = array<i32>} : memref<432x512xbf16, #tpu.memory_space<vmem>>, vector<32x512xbf16>,
    %c497_i32_232 = arith.constant 497 : i32
    %317 = tpu.dynamic_rotate %118 by %c497_i32_232 dim 1 : vector<16x512xf32>, i32 -> vector<16x512xf32>
    %c6_233 = arith.constant 6 : index
    %c0_234 = arith.constant 0 : index
    %318 = vector.load %arg4[%c6_233, %c0_234] : memref<9x512xf32, #tpu.memory_space<vmem>>, vector<1x512xf32>
    %319 = vector.broadcast %318 : vector<1x512xf32> to vector<16x512xf32>
    %320 = arith.mulf %317, %319 : vector<16x512xf32>
    %321 = arith.truncf %320 : vector<16x512xf32> to vector<16x512xbf16>
    %c320 = arith.constant 320 : index
    %c0_235 = arith.constant 0 : index
    %322 = vector.load %arg9[%c320, %c0_235] : memref<432x512xbf16, #tpu.memory_space<vmem>>, vector<16x512xbf16>
    tpu.vector_store %arg9[%c320, %c0_235], %321 {strides = array<i32>} : memref<432x512xbf16, #tpu.memory_space<vmem>>, vector<16x512xbf16>,
    %c496_i32_236 = arith.constant 496 : i32
    %323 = tpu.dynamic_rotate %246 by %c496_i32_236 dim 1 : vector<32x512xf32>, i32 -> vector<32x512xf32>
    %c7_237 = arith.constant 7 : index
    %c0_238 = arith.constant 0 : index
    %324 = vector.load %arg4[%c7_237, %c0_238] : memref<9x512xf32, #tpu.memory_space<vmem>>, vector<1x512xf32>
    %325 = vector.broadcast %324 : vector<1x512xf32> to vector<32x512xf32>
    %326 = arith.mulf %323, %325 : vector<32x512xf32>
    %327 = arith.truncf %326 : vector<32x512xf32> to vector<32x512xbf16>
    %c336 = arith.constant 336 : index
    %c0_239 = arith.constant 0 : index
    %328 = vector.load %arg9[%c336, %c0_239] : memref<432x512xbf16, #tpu.memory_space<vmem>>, vector<32x512xbf16>
    tpu.vector_store %arg9[%c336, %c0_239], %327 {strides = array<i32>} : memref<432x512xbf16, #tpu.memory_space<vmem>>, vector<32x512xbf16>,
    %c496_i32_240 = arith.constant 496 : i32
    %329 = tpu.dynamic_rotate %118 by %c496_i32_240 dim 1 : vector<16x512xf32>, i32 -> vector<16x512xf32>
    %c7_241 = arith.constant 7 : index
    %c0_242 = arith.constant 0 : index
    %330 = vector.load %arg4[%c7_241, %c0_242] : memref<9x512xf32, #tpu.memory_space<vmem>>, vector<1x512xf32>
    %331 = vector.broadcast %330 : vector<1x512xf32> to vector<16x512xf32>
    %332 = arith.mulf %329, %331 : vector<16x512xf32>
    %333 = arith.truncf %332 : vector<16x512xf32> to vector<16x512xbf16>
    %c368 = arith.constant 368 : index
    %c0_243 = arith.constant 0 : index
    %334 = vector.load %arg9[%c368, %c0_243] : memref<432x512xbf16, #tpu.memory_space<vmem>>, vector<16x512xbf16>
    tpu.vector_store %arg9[%c368, %c0_243], %333 {strides = array<i32>} : memref<432x512xbf16, #tpu.memory_space<vmem>>, vector<16x512xbf16>,
    %c495_i32_244 = arith.constant 495 : i32
    %335 = tpu.dynamic_rotate %246 by %c495_i32_244 dim 1 : vector<32x512xf32>, i32 -> vector<32x512xf32>
    %c8_245 = arith.constant 8 : index
    %c0_246 = arith.constant 0 : index
    %336 = vector.load %arg4[%c8_245, %c0_246] : memref<9x512xf32, #tpu.memory_space<vmem>>, vector<1x512xf32>
    %337 = vector.broadcast %336 : vector<1x512xf32> to vector<32x512xf32>
    %338 = arith.mulf %335, %337 : vector<32x512xf32>
    %339 = arith.truncf %338 : vector<32x512xf32> to vector<32x512xbf16>
    %c384 = arith.constant 384 : index
    %c0_247 = arith.constant 0 : index
    %340 = vector.load %arg9[%c384, %c0_247] : memref<432x512xbf16, #tpu.memory_space<vmem>>, vector<32x512xbf16>
    tpu.vector_store %arg9[%c384, %c0_247], %339 {strides = array<i32>} : memref<432x512xbf16, #tpu.memory_space<vmem>>, vector<32x512xbf16>,
    %c495_i32_248 = arith.constant 495 : i32
    %341 = tpu.dynamic_rotate %118 by %c495_i32_248 dim 1 : vector<16x512xf32>, i32 -> vector<16x512xf32>
    %c8_249 = arith.constant 8 : index
    %c0_250 = arith.constant 0 : index
    %342 = vector.load %arg4[%c8_249, %c0_250] : memref<9x512xf32, #tpu.memory_space<vmem>>, vector<1x512xf32>
    %343 = vector.broadcast %342 : vector<1x512xf32> to vector<16x512xf32>
    %344 = arith.mulf %341, %343 : vector<16x512xf32>
    %345 = arith.truncf %344 : vector<16x512xf32> to vector<16x512xbf16>
    %c416 = arith.constant 416 : index
    %c0_251 = arith.constant 0 : index
    %346 = vector.load %arg9[%c416, %c0_251] : memref<432x512xbf16, #tpu.memory_space<vmem>>, vector<16x512xbf16>
    tpu.vector_store %arg9[%c416, %c0_251], %345 {strides = array<i32>} : memref<432x512xbf16, #tpu.memory_space<vmem>>, vector<16x512xbf16>,
    %c96_252 = arith.constant 96 : index
    %c0_253 = arith.constant 0 : index
    %347 = vector.load %arg2[%c96_252, %c0_253] : memref<120x432xbf16, #tpu.memory_space<vmem>>, vector<16x432xbf16>
    %c0_254 = arith.constant 0 : index
    %c0_255 = arith.constant 0 : index
    %348 = vector.load %arg9[%c0_254, %c0_255] : memref<432x512xbf16, #tpu.memory_space<vmem>>, vector<432x512xbf16>
    %cst_256 = arith.constant dense<0.000000e+00> : vector<16x512xf32>
    %349 = tpu.matmul %347, %348, %cst_256 {dimension_numbers = #tpu.dot_dimension_numbers<[1], [0], [0], [1], [0, 0, 1, 1], [], []>} : vector<16x432xbf16>, vector<432x512xbf16>, vector<16x512xf32> -> vector<16x512xf32>
    %c96_257 = arith.constant 96 : index
    %c0_258 = arith.constant 0 : index
    %350 = vector.load %arg3[%c96_257, %c0_258] : memref<120x1xf32, #tpu.memory_space<vmem>>, vector<16x1xf32>
    %351 = vector.broadcast %350 : vector<16x1xf32> to vector<16x512xf32>
    %352 = arith.addf %349, %351 : vector<16x512xf32>
    %cst_259 = arith.constant 0.000000e+00 : f32
    %353 = vector.broadcast %cst_259 : f32 to vector<16x512xf32>
    %354 = arith.maximumf %352, %353 : vector<16x512xf32>
    %c112_260 = arith.constant 112 : index
    %c0_261 = arith.constant 0 : index
    %355 = vector.load %arg2[%c112_260, %c0_261] : memref<120x432xbf16, #tpu.memory_space<vmem>>, vector<3x16xbf16>
    %356 = arith.truncf %354 : vector<16x512xf32> to vector<16x512xbf16>
    %cst_262 = arith.constant dense<0.000000e+00> : vector<3x512xf32>
    %357 = tpu.matmul %355, %356, %cst_262 {dimension_numbers = #tpu.dot_dimension_numbers<[1], [0], [0], [1], [0, 0, 1, 1], [], []>} : vector<3x16xbf16>, vector<16x512xbf16>, vector<3x512xf32> -> vector<3x512xf32>
    %c112_263 = arith.constant 112 : index
    %c0_264 = arith.constant 0 : index
    %358 = vector.load %arg3[%c112_263, %c0_264] : memref<120x1xf32, #tpu.memory_space<vmem>>, vector<3x1xf32>
    %359 = vector.broadcast %358 : vector<3x1xf32> to vector<3x512xf32>
    %360 = arith.addf %357, %359 : vector<3x512xf32>
    %361 = vector.extract_strided_slice %360 {offsets = [0, 0], sizes = [1, 512], strides = [1, 1]} : vector<3x512xf32> to vector<1x512xf32>
    %362 = vector.extract_strided_slice %360 {offsets = [1, 0], sizes = [1, 512], strides = [1, 1]} : vector<3x512xf32> to vector<1x512xf32>
    %cst_265 = arith.constant 0.000000e+00 : f32
    %363 = vector.broadcast %cst_265 : f32 to vector<1x512xf32>
    %364 = arith.maximumf %362, %363 : vector<1x512xf32>
    %365 = vector.extract_strided_slice %360 {offsets = [2, 0], sizes = [1, 512], strides = [1, 1]} : vector<3x512xf32> to vector<1x512xf32>
    %cst_266 = arith.constant 0.000000e+00 : f32
    %366 = vector.broadcast %cst_266 : f32 to vector<1x512xf32>
    %367 = arith.maximumf %365, %366 : vector<1x512xf32>
    %368 = arith.mulf %361, %361 : vector<1x512xf32>
    %cst_267 = arith.constant 1.000000e+00 : f32
    %369 = vector.broadcast %cst_267 : f32 to vector<1x512xf32>
    %370 = arith.addf %369, %368 : vector<1x512xf32>
    %371 = tpu.reciprocal %370 {approx = true} : vector<1x512xf32> -> vector<1x512xf32>
    %cst_268 = arith.constant 1.000000e+00 : f32
    %372 = vector.broadcast %cst_268 : f32 to vector<1x512xf32>
    %373 = arith.subf %372, %368 : vector<1x512xf32>
    %374 = arith.mulf %373, %371 : vector<1x512xf32>
    %cst_269 = arith.constant -2.000000e+00 : f32
    %375 = vector.broadcast %cst_269 : f32 to vector<1x512xf32>
    %376 = arith.mulf %375, %361 : vector<1x512xf32>
    %377 = arith.mulf %376, %371 : vector<1x512xf32>
    %cst_270 = arith.constant 2.000000e+00 : f32
    %378 = vector.broadcast %cst_270 : f32 to vector<1x512xf32>
    %379 = arith.mulf %378, %361 : vector<1x512xf32>
    %380 = arith.mulf %379, %371 : vector<1x512xf32>
    %381 = arith.mulf %374, %374 : vector<1x512xf32>
    %382 = arith.mulf %381, %364 : vector<1x512xf32>
    %383 = arith.mulf %377, %377 : vector<1x512xf32>
    %384 = arith.mulf %383, %367 : vector<1x512xf32>
    %385 = arith.addf %382, %384 : vector<1x512xf32>
    %c0_271 = arith.constant 0 : index
    %c0_272 = arith.constant 0 : index
    %386 = vector.load %arg8[%c0_271, %c0_272] : memref<3x512xf32, #tpu.memory_space<vmem>>, vector<1x512xf32>
    tpu.vector_store %arg8[%c0_271, %c0_272], %385 {strides = array<i32>} : memref<3x512xf32, #tpu.memory_space<vmem>>, vector<1x512xf32>,
    %387 = arith.mulf %374, %380 : vector<1x512xf32>
    %388 = arith.mulf %387, %364 : vector<1x512xf32>
    %389 = arith.mulf %377, %374 : vector<1x512xf32>
    %390 = arith.mulf %389, %367 : vector<1x512xf32>
    %391 = arith.addf %388, %390 : vector<1x512xf32>
    %c1_273 = arith.constant 1 : index
    %c0_274 = arith.constant 0 : index
    %392 = vector.load %arg8[%c1_273, %c0_274] : memref<3x512xf32, #tpu.memory_space<vmem>>, vector<1x512xf32>
    tpu.vector_store %arg8[%c1_273, %c0_274], %391 {strides = array<i32>} : memref<3x512xf32, #tpu.memory_space<vmem>>, vector<1x512xf32>,
    %393 = arith.mulf %380, %380 : vector<1x512xf32>
    %394 = arith.mulf %393, %364 : vector<1x512xf32>
    %395 = arith.mulf %374, %374 : vector<1x512xf32>
    %396 = arith.mulf %395, %367 : vector<1x512xf32>
    %397 = arith.addf %394, %396 : vector<1x512xf32>
    %c2_275 = arith.constant 2 : index
    %c0_276 = arith.constant 0 : index
    %398 = vector.load %arg8[%c2_275, %c0_276] : memref<3x512xf32, #tpu.memory_space<vmem>>, vector<1x512xf32>
    tpu.vector_store %arg8[%c2_275, %c0_276], %397 {strides = array<i32>} : memref<3x512xf32, #tpu.memory_space<vmem>>, vector<1x512xf32>,
    return
  }
  func.func @transform_0(%arg0: i32) -> (i32, i32) {
    %c0_i32 = arith.constant 0 : i32
    %c0_i32_0 = arith.constant 0 : i32
    %c0_i32_1 = arith.constant 0 : i32
    return %c0_i32, %c0_i32_0 : i32, i32
  }
  func.func @transform_1(%arg0: i32) -> (i32, i32) {
    %c0_i32 = arith.constant 0 : i32
    %c0_i32_0 = arith.constant 0 : i32
    %c0_i32_1 = arith.constant 0 : i32
    return %c0_i32, %c0_i32_0 : i32, i32
  }
  func.func @transform_2(%arg0: i32) -> (i32, i32) {
    %c0_i32 = arith.constant 0 : i32
    %c0_i32_0 = arith.constant 0 : i32
    %c0_i32_1 = arith.constant 0 : i32
    return %c0_i32, %c0_i32_0 : i32, i32
  }
  func.func @transform_3(%arg0: i32) -> (i32, i32) {
    %c0_i32 = arith.constant 0 : i32
    %c0_i32_0 = arith.constant 0 : i32
    %c0_i32_1 = arith.constant 0 : i32
    return %c0_i32, %c0_i32_0 : i32, i32
  }
  func.func @transform_4(%arg0: i32) -> (i32, i32) {
    %c0_i32 = arith.constant 0 : i32
    %c0_i32_0 = arith.constant 0 : i32
    %c0_i32_1 = arith.constant 0 : i32
    return %c0_i32, %c0_i32_0 : i32, i32
  }
  func.func @transform_5(%arg0: i32) -> (i32, i32) {
    %c0_i32 = arith.constant 0 : i32
    %c0_i32_0 = arith.constant 0 : i32
    %c0_i32_1 = arith.constant 0 : i32
    return %c0_i32, %c0_i32_0 : i32, i32
  }
  func.func @transform_6(%arg0: i32) -> (i32, i32) {
    %c0_i32 = arith.constant 0 : i32
    %c0_i32_0 = arith.constant 0 : i32
    %c0_i32_1 = arith.constant 0 : i32
    return %c0_i32, %c0_i32_0 : i32, i32
  }
  func.func @transform_7(%arg0: i32) -> (i32, i32) {
    %c0_i32 = arith.constant 0 : i32
    %c0_i32_0 = arith.constant 0 : i32
    %c0_i32_1 = arith.constant 0 : i32
    return %c0_i32, %c0_i32_0 : i32, i32
  }
}

</mosaic_0001>

<bundles_post_ra>
// kernel: unet2d_spectral_d_forward.1
= control target key start
LH: loop header
LB: loop body
LE: loop exit
PB: predicated region body
PF: predicated region fallthrough
CT: control target
= control target key end

     0   :  { %v11201_v0 = vlaneseq  ;;  %v7875_v2 = vmov 1983009808   ;;  %v7876_v4 = vmov 0   ;;  %s7878_s26 = smov 113   ;;  %s7879_s27 = smov 127   ;;  %vm880_vm0 = vcmask 130048   ;;  %s11193_s0 = inlined_call_operand.vmem [shape: f32[2,512], index: 0, kind: input, shape index: {}]   ;;  %s11194_s1 = inlined_call_operand.vmem [shape: bf16[120,432], index: 1, kind: input, shape index: {}]   ;;  %s11195_s2 = inlined_call_operand.vmem [shape: f32[120,1], index: 2, kind: input, shape index: {}]   ;;  %s11196_s3 = inlined_call_operand.vmem [shape: f32[9,512], index: 3, kind: input, shape index: {}]   ;;  %s11197_s5 = inlined_call_operand.vmem [shape: bf16[512,128], index: 5, kind: input, shape index: {}]   ;;  %s11198_s4 = inlined_call_operand.vmem [shape: f32[9,128], index: 4, kind: input, shape index: {}]   ;;  %s11199_s6 = inlined_call_operand.vmem [shape: bf16[128,512], index: 6, kind: input, shape index: {}]   ;;  %s11200_s7 = inlined_call_operand.vmem [shape: f32[3,512], index: 7, kind: output, shape index: {}]  }
   0x1   :  { %v135_v1 = vld [vmem:[%s11193_s0] sm:$0xff]  ;;  %v139_v3 = vunpack.c.l.s4 %v7875_v2  ;;  %56 = vst [vmem:[#allocation2 + $0x248] sm:$0xff] %v7876_v4  ;;  %27 = vst [vmem:[#allocation2 + $0x2b0] sm:$0xff] %v7876_v4  ;;  %7585 = vset.pattern.permute.xlu0 %v7876_v4  ;;  %7586 = vset.pattern.permute.xlu1 %v7876_v4  ;;  %s7877_s0 = smov 112   ;;  %s7880_s28 = smov 1   ;;  %v680_v17 = vld [vmem:[%s11195_s2 + $0x8] sm:$0xff] }
   0x2   :  { %28 = vst [vmem:[#allocation2 + $0xd0] sm:$0xff] %v7876_v4  ;;  %31 = vst [vmem:[#allocation2 + $0x320] sm:$0xff] %v7876_v4  ;;  %v7974_v5 = vshrl.u32 %v11201_v0, 7  ;;  %v137_v7 = vcombine.high %v135_v1, %v135_v1  ;;  %s7881_s29 = smov 15   ;;  %s7882_s30 = smov 16   ;;  %v679_v16 = vld [vmem:[%s11195_s2] sm:$0xff] }
   0x3   :  { %32 = vst [vmem:[#allocation2 + $0x38] sm:$0xff] %v7876_v4  ;;  %35 = vst [vmem:[#allocation2 + $0x80] sm:$0xff] %v7876_v4  ;;  %v140_v6 = vunpack.c.0.s8 %v139_v3  ;;  %s7883_s8 = smov 17   ;;  %s7884_s9 = smov 111   ;;  %v7590_v15 = vld [vmem:[%s11194_s1 + $0x4] ss:$16 sps:$4 sm:$0xff]  }
   0x4   :  { %36 = vst [vmem:[#allocation2 + $0x308] sm:$0xff] %v7876_v4  ;;  %39 = vst [vmem:[#allocation2 + $0x18] sm:$0xff] %v7876_v4  ;;  %6768 = vmatprep.mubr.msk.bf16.mxu0 %vm880_vm0, %v7590_v15  ;;  %6769 = vmatprep.mubr.msk.bf16.mxu1 %vm880_vm0, %v7590_v15  ;;  %v8021_v18 = vand.u32 127, %v11201_v0  ;;  %v8024_v19 = vsub.s32 2, %v7974_v5  ;;  %v8027_v20 = vsub.s32 3, %v7974_v5  ;;  %v8033_v24 = vsub.s32 0, %v7974_v5 }
   0x5   :  { %40 = vst [vmem:[#allocation2 + $0x2c8] sm:$0xff] %v7876_v4  ;;  %43 = vst [vmem:[#allocation2 + $0x2c0] sm:$0xff] %v7876_v4  ;;  %v143_v8 = vsub.s32 %v140_v6, %v7974_v5  ;;  %v6724_v21 = vld [vmem:[%s11196_s3 + $0x7] ss:$8 sm:$0xf]  ;;  %v8036_v25 = vsub.s32 1, %v7974_v5 }
   0x6   :  { %44 = vst [vmem:[#allocation2 + $0x188] sm:$0xff] %v7876_v4  ;;  %47 = vst [vmem:[#allocation2 + $0x2d0] sm:$0xff] %v7876_v4  ;;  %vm533_vm1 = vcmp.lt.s32.totalorder %v8021_v18, 112  ;;  %v552_v26 = vrot.slane %v6724_v21, %v8024_v19  ;;  %v556_v27 = vrot.slane %v6724_v21, %v8027_v20  ;;  %v544_v34 = vrot.slane %v6724_v21, %v8033_v24  ;;  %v6721_v36 = vld [vmem:[%s11196_s3 + $0x6] ss:$8 sm:$0xf] }
   0x7   :  { %48 = vst [vmem:[#allocation2 + $0x268] sm:$0xff] %v7876_v4  ;;  %51 = vst [vmem:[#allocation2 + $0x190] sm:$0xff] %v7876_v4  ;;  %v144_v9 = vrot.slane %v135_v1, %v143_v8  ;;  %v151_v10 = vrot.slane %v137_v7, %v143_v8  ;;  %v548_v35 = vrot.slane %v6724_v21, %v8036_v25  ;;  %vm475_vm2 = vcmp.lt.s32.totalorder %v8021_v18, 113  ;;  %v6718_v59 = vld [vmem:[%s11196_s3 + $0x5] ss:$8 sm:$0xf] }
   0x8   :  { %52 = vst [vmem:[#allocation2 + $0x250] sm:$0xff] %v7876_v4  ;;  %55 = vst [vmem:[#allocation2 + $0x1d8] sm:$0xff] %v7876_v4  ;;  %v486_v42 = vrot.slane %v6721_v36, %v8033_v24  ;;  %v490_v43 = vrot.slane %v6721_v36, %v8036_v25  ;;  %v494_v46 = vrot.slane %v6721_v36, %v8024_v19  ;;  %vm417_vm3 = vcmp.lt.s32.totalorder %v8021_v18, 127  ;;  %s7885_s15 = smov 120   ;;  %s7886_s16 = smov 121  }
   0x9   :  { %59 = vst [vmem:[#allocation2 + $0x158] sm:$0xff] %v7876_v4  ;;  %60 = vst [vmem:[#allocation2 + $0x180] sm:$0xff] %v7876_v4  ;;  %525 = vrot.lane.b32.xlu0 %v144_v9, %s7877_s0  ;;  %529 = vrot.lane.b32.xlu1 %v151_v10, %s7877_s0  ;;  %v153_v11 = vcombine.high %v151_v10, %v151_v10  ;;  %v152_v12 = vcombine.high %v144_v9, %v144_v9  ;;  %vm341_vm4 = vcmp.lt.s32.totalorder %v8021_v18, 1  ;;  %s7887_s17 = smov 7   ;;  %s7888_s18 = smov 8   ;;  %vm3313_vm9 = vcmask 261120  }
   0xa   :  { %63 = vst [vmem:[#allocation2 + $0x1d0] sm:$0xff] %v7876_v4  ;;  %65 = vst [vmem:[#allocation2 + $0x2d8] sm:$0xff] %v7876_v4  ;;  %v498_v47 = vrot.slane %v6721_v36, %v8027_v20  ;;  %v428_v1 = vrot.slane %v6718_v59, %v8033_v24  ;;  %v432_v2 = vrot.slane %v6718_v59, %v8036_v25  ;;  %vm283_vm5 = vcmp.lt.s32.totalorder %v8021_v18, 15  ;;  %s7889_s19 = smov 9   ;;  %s7890_s20 = smov 119  }
   0xb   :  { %67 = vst [vmem:[#allocation2 + $0x1a8] sm:$0xff] %v7876_v4  ;;  %69 = vst [vmem:[#allocation2 + $0x328] sm:$0xff] %v7876_v4  ;;  %v7276_v13 = vpack.c.bf16 %v152_v12, %v144_v9  ;;  %v7277_v14 = vpack.c.bf16 %v153_v11, %v151_v10  ;;  %v436_v6 = vrot.slane %v6718_v59, %v8024_v19  ;;  %vm225_vm6 = vcmp.lt.s32.totalorder %v8021_v18, 16 }
   0xc   :  { %71 = vst [vmem:[#allocation2 + $0x1c8] sm:$0xff] %v7876_v4  ;;  %73 = vst [vmem:[#allocation2 + $0x298] sm:$0xff] %v7876_v4  ;;  %vm168_vm7 = vcmp.lt.s32.totalorder %v8021_v18, 17  ;;  %vm591_vm8 = vcmp.lt.s32.totalorder %v8021_v18, 111  ;;  %vm6209_vm10 = vcmask 392192  }
   0xd   :  { %75 = vst [vmem:[#allocation2 + $0x2b8] sm:$0xff] %v7876_v4  ;;  %77 = vst [vmem:[#allocation2 + $0x178] sm:$0xff] %v7876_v4  ;;  %467 = vrot.lane.b32.xlu0 %v144_v9, %s7878_s26  ;;  %531 = vrot.lane.b32.xlu1 %v153_v11, %s7877_s0 }
   0xe   :  { %79 = vst [vmem:[#allocation2 + $0x2e8] sm:$0xff] %v7876_v4  ;;  %81 = vst [vmem:[#allocation2 + $0x2f8] sm:$0xff] %v7876_v4 }
   0xf   :  { %83 = vst [vmem:[#allocation2 + $0x270] sm:$0xff] %v7876_v4  ;;  %85 = vst [vmem:[#allocation2 + $0xe0] sm:$0xff] %v7876_v4 }
  0x10   :  { %87 = vst [vmem:[#allocation2 + $0xb8] sm:$0xff] %v7876_v4  ;;  %89 = vst [vmem:[#allocation2 + $0x140] sm:$0xff] %v7876_v4 }
  0x11   :  { %91 = vst [vmem:[#allocation2 + $0x90] sm:$0xff] %v7876_v4  ;;  %93 = vst [vmem:[#allocation2 + $0x218] sm:$0xff] %v7876_v4  ;;  %527 = vrot.lane.b32.xlu0 %v152_v12, %s7877_s0  ;;  %469 = vrot.lane.b32.xlu1 %v152_v12, %s7878_s26 }
  0x12   :  { %95 = vst [vmem:[#allocation2 + $0x358] sm:$0xff] %v7876_v4  ;;  %97 = vst [vmem:[#allocation2 + $0x1f8] sm:$0xff] %v7876_v4 }
  0x13   :  { %11309 = vst [vmem:[#allocation3_spill] sm:$0xff] %v7974_v5  ;;  %407 = vst [vmem:[#allocation2 + $0x2c0] sm:$0x11] %v7276_v13 }
  0x14   :  { %408 = vst [vmem:[#allocation2 + $0x188] sm:$0x11] %v7277_v14  ;;  %11310 = vst [vmem:[#allocation4_spill] sm:$0xff] %v8024_v19 }
  0x15   :  { %471 = vrot.lane.b32.xlu0 %v151_v10, %s7878_s26  ;;  %473 = vrot.lane.b32.xlu1 %v153_v11, %s7878_s26  ;;  %11311 = vst [vmem:[#allocation5_spill] sm:$0xff] %v8027_v20 }
  0x19   :  { %409 = vrot.lane.b32.xlu0 %v144_v9, %s7879_s27  ;;  %411 = vrot.lane.b32.xlu1 %v152_v12, %s7879_s27 }
  0x1d   :  { %413 = vrot.lane.b32.xlu0 %v151_v10, %s7879_s27  ;;  %415 = vrot.lane.b32.xlu1 %v153_v11, %s7879_s27 }
  0x21   :  { %333 = vrot.lane.b32.xlu0 %v144_v9, %s7880_s28  ;;  %335 = vrot.lane.b32.xlu1 %v152_v12, %s7880_s28 }
  0x25   :  { %337 = vrot.lane.b32.xlu0 %v151_v10, %s7880_s28  ;;  %339 = vrot.lane.b32.xlu1 %v153_v11, %s7880_s28 }
  0x29   :  { %275 = vrot.lane.b32.xlu0 %v144_v9, %s7881_s29  ;;  %277 = vrot.lane.b32.xlu1 %v152_v12, %s7881_s29 }
  0x2d   :  { %279 = vrot.lane.b32.xlu0 %v151_v10, %s7881_s29  ;;  %281 = vrot.lane.b32.xlu1 %v153_v11, %s7881_s29 }
  0x31   :  { %217 = vrot.lane.b32.xlu0 %v144_v9, %s7882_s30  ;;  %219 = vrot.lane.b32.xlu1 %v152_v12, %s7882_s30 }
  0x35   :  { %221 = vrot.lane.b32.xlu0 %v151_v10, %s7882_s30  ;;  %223 = vrot.lane.b32.xlu1 %v153_v11, %s7882_s30 }
  0x39   :  { %158 = vrot.lane.b32.xlu0 %v144_v9, %s7883_s8  ;;  %160 = vrot.lane.b32.xlu1 %v152_v12, %s7883_s8 }
  0x3d   :  { %162 = vrot.lane.b32.xlu0 %v151_v10, %s7883_s8  ;;  %164 = vrot.lane.b32.xlu1 %v153_v11, %s7883_s8 }
  0x41   :  { %583 = vrot.lane.b32.xlu0 %v144_v9, %s7884_s9  ;;  %585 = vrot.lane.b32.xlu1 %v152_v12, %s7884_s9  ;;  %v440_v9 = vrot.slane %v6718_v59, %v8027_v20 }
  0x45   :  { %587 = vrot.lane.b32.xlu0 %v151_v10, %s7884_s9  ;;  %589 = vrot.lane.b32.xlu1 %v153_v11, %s7884_s9 }
  0x49   :  { %683 = vperm.xlu0 %7585, %v679_v16   ;;  %688 = vperm.xlu1 %7586, %v680_v17  }
  0x7b   :  { %v526_v22 = vpop.permute.xlu0 %525  ;;  %v530_v23 = vpop.permute.xlu1 %529 }
  0x7f   :  { %v468_v28 = vpop.permute.xlu0 %467  ;;  %v532_v29 = vpop.permute.xlu1 %531 }
  0x80   :  { %v534_v30 = vsel %vm533_vm1, %v530_v23, %v532_v29  ;;  %v537_v31 = vsel %vm533_vm1, %v532_v29, %v526_v22 }
  0x81   :  { %v563_v32 = vmul.f32 %v552_v26, %v534_v30  ;;  %v564_v33 = vmul.f32 %v556_v27, %v537_v31  ;;  %v6713_v27 = vld [vmem:[%s11196_s3 + $0x3] ss:$8 sm:$0xf] }
  0x83   :  { %v7283_v37 = vpack.c.bf16 %v564_v33, %v563_v32  ;;  %v528_v38 = vpop.permute.xlu0 %527  ;;  %v470_v39 = vpop.permute.xlu1 %469  ;;  %v356_v33 = vrot.slane %v6713_v27, %v8036_v25 }
  0x84   :  { %v535_v40 = vsel %vm533_vm1, %v528_v38, %v530_v23  ;;  %v536_v41 = vsel %vm533_vm1, %v526_v22, %v528_v38  ;;  %v478_v48 = vsel %vm475_vm2, %v468_v28, %v470_v39 }
  0x85   :  { %582 = vst [vmem:[#allocation2 + $0x248] sm:$0x11] %v7283_v37  ;;  %v561_v44 = vmul.f32 %v544_v34, %v536_v41  ;;  %v562_v45 = vmul.f32 %v548_v35, %v535_v40  ;;  %v503_v55 = vmul.f32 %v486_v42, %v478_v48  ;;  %v360_v34 = vrot.slane %v6713_v27, %v8024_v19 }
  0x86   :  { %v352_v37 = vrot.slane %v6713_v27, %v8033_v24  ;;  %v364_v40 = vrot.slane %v6713_v27, %v8027_v20 }
  0x87   :  { %v7282_v49 = vpack.c.bf16 %v562_v45, %v561_v44  ;;  %v472_v50 = vpop.permute.xlu0 %471  ;;  %v474_v51 = vpop.permute.xlu1 %473 }
  0x88   :  { %v477_v52 = vsel %vm475_vm2, %v470_v39, %v472_v50  ;;  %v476_v53 = vsel %vm475_vm2, %v472_v50, %v474_v51  ;;  %v479_v54 = vsel %vm475_vm2, %v474_v51, %v468_v28 }
  0x89   :  { %581 = vst [vmem:[#allocation2 + $0x1d8] sm:$0x11] %v7282_v49  ;;  %v504_v56 = vmul.f32 %v490_v43, %v477_v52  ;;  %v505_v57 = vmul.f32 %v494_v46, %v476_v53  ;;  %v506_v58 = vmul.f32 %v498_v47, %v479_v54  ;;  %v6710_v49 = vld [vmem:[%s11196_s3 + $0x2] ss:$8 sm:$0xf] }
  0x8a   :  { %v659_v54 = vld [vmem:[#allocation2 + $0x2c0] sm:$0xff]  ;;  %v298_v59 = vrot.slane %v6710_v49, %v8036_v25 }
  0x8b   :  { %v7280_v60 = vpack.c.bf16 %v504_v56, %v503_v55  ;;  %v7281_v61 = vpack.c.bf16 %v506_v58, %v505_v57  ;;  %v410_v62 = vpop.permute.xlu0 %409  ;;  %v412_v63 = vpop.permute.xlu1 %411  ;;  %v660_v55 = vld [vmem:[#allocation2 + $0x188] sm:$0xff] }
  0x8c   :  { %v672_v3 = vld [vmem:[#allocation2 + $0x248] sm:$0xff]  ;;  %v420_v7 = vsel %vm417_vm3, %v410_v62, %v412_v63 }
  0x8d   :  { %523 = vst [vmem:[#allocation2 + $0x190] sm:$0x11] %v7280_v60  ;;  %524 = vst [vmem:[#allocation2 + $0x250] sm:$0x11] %v7281_v61  ;;  %v6763_v8 = vcombine.high %v672_v3, %v7876_v4  ;;  %v6762_v10 = vcombine.low %v672_v3, %v7876_v4  ;;  %v445_v13 = vmul.f32 %v428_v1, %v420_v7 }
  0x8e   :  { %v302_v61 = vrot.slane %v6710_v49, %v8024_v19  ;;  %v306_v3 = vrot.slane %v6710_v49, %v8027_v20 }
  0x8f   :  { %v414_v11 = vpop.permute.xlu0 %413  ;;  %927 = vmatprep.subr.bf16.mxu1 %v6763_v8  ;;  %v416_v12 = vpop.permute.xlu1 %415 }
  0x90   :  { %v419_v14 = vsel %vm417_vm3, %v412_v63, %v414_v11  ;;  %v418_v15 = vsel %vm417_vm3, %v414_v11, %v416_v12  ;;  %v421_v16 = vsel %vm417_vm3, %v416_v12, %v410_v62  ;;  %928 = vmatpush1.bf16.msra.mxu1 %v6762_v10  ;;  %v671_v17 = vld [vmem:[#allocation2 + $0x1d8] sm:$0xff]  ;;  %v6751_v10 = vcombine.high %v660_v55, %v7876_v4 }
  0x91   :  { %v446_v21 = vmul.f32 %v432_v2, %v419_v14  ;;  %v447_v22 = vmul.f32 %v436_v6, %v418_v15  ;;  %v448_v23 = vmul.f32 %v440_v9, %v421_v16  ;;  %v6761_v26 = vcombine.high %v671_v17, %v7876_v4 }
  0x92   :  { %v6760_v28 = vcombine.low %v671_v17, %v7876_v4  ;;  %v294_v2 = vrot.slane %v6710_v49, %v8033_v24  ;;  %v6749_v6 = vcombine.high %v659_v54, %v7876_v4  ;;  %v6748_v15 = vcombine.low %v659_v54, %v7876_v4 }
  0x93   :  { %v7278_v29 = vpack.c.bf16 %v446_v21, %v445_v13  ;;  %v7279_v30 = vpack.c.bf16 %v448_v23, %v447_v22  ;;  %v334_v31 = vpop.permute.xlu0 %333  ;;  %884 = vmatprep.subr.bf16.mxu0 %v6761_v26  ;;  %v336_v32 = vpop.permute.xlu1 %335  ;;  %v6750_v16 = vcombine.low %v660_v55, %v7876_v4 }
  0x94   :  { %885 = vmatpush1.bf16.msra.mxu0 %v6760_v28  ;;  %v667_v35 = vld [vmem:[#allocation2 + $0x190] sm:$0xff]  ;;  %v344_v42 = vsel %vm341_vm4, %v334_v31, %v336_v32 }
  0x95   :  { %v668_v36 = vld [vmem:[#allocation2 + $0x250] sm:$0xff]  ;;  %465 = vst [vmem:[#allocation2 + $0x2d0] sm:$0x11] %v7278_v29  ;;  %466 = vst [vmem:[#allocation2 + $0x268] sm:$0x11] %v7279_v30  ;;  %v6757_v38 = vcombine.high %v667_v35, %v7876_v4  ;;  %v6756_v41 = vcombine.low %v667_v35, %v7876_v4  ;;  %v370_v50 = vmul.f32 %v356_v33, %v344_v42 }
  0x96   :  { %v6759_v39 = vcombine.high %v668_v36, %v7876_v4  ;;  %v6758_v43 = vcombine.low %v668_v36, %v7876_v4  ;;  %v6707_v28 = vld [vmem:[%s11196_s3 + $0x1] ss:$8 sm:$0xf] }
  0x97   :  { %v338_v44 = vpop.permute.xlu0 %337  ;;  %886 = vmatprep.subr.bf16.mxu0 %v6757_v38  ;;  %v340_v45 = vpop.permute.xlu1 %339  ;;  %v240_v33 = vrot.slane %v6707_v28, %v8036_v25  ;;  %v236_v36 = vrot.slane %v6707_v28, %v8033_v24 }
  0x98   :  { %929 = vmatprep.subr.bf16.mxu1 %v6759_v39  ;;  %v343_v46 = vsel %vm341_vm4, %v336_v32, %v338_v44  ;;  %v342_v47 = vsel %vm341_vm4, %v338_v44, %v340_v45  ;;  %v345_v48 = vsel %vm341_vm4, %v340_v45, %v334_v31  ;;  %887 = vmatpush1.bf16.msra.mxu0 %v6756_v41 }
  0x99   :  { %930 = vmatpush1.bf16.msra.mxu1 %v6758_v43  ;;  %v371_v51 = vmul.f32 %v360_v34, %v343_v46  ;;  %v369_v52 = vmul.f32 %v352_v37, %v345_v48  ;;  %v372_v53 = vmul.f32 %v364_v40, %v342_v47  ;;  %v244_v34 = vrot.slane %v6707_v28, %v8024_v19 }
  0x9a   :  { %v248_v39 = vrot.slane %v6707_v28, %v8027_v20 }
  0x9b   :  { %v7274_v56 = vpack.c.bf16 %v370_v50, %v369_v52  ;;  %v7275_v57 = vpack.c.bf16 %v372_v53, %v371_v51  ;;  %v276_v58 = vpop.permute.xlu0 %275  ;;  %v278_v60 = vpop.permute.xlu1 %277  ;;  %v173_v53 = vld [vmem:[%s11196_s3] ss:$8 sm:$0xf] }
  0x9c   :  { %v286_v62 = vsel %vm283_vm5, %v276_v58, %v278_v60  ;;  %v663_v63 = vld [vmem:[#allocation2 + $0x2d0] sm:$0xff]  ;;  %v664_v1 = vld [vmem:[#allocation2 + $0x268] sm:$0xff] }
  0x9d   :  { %389 = vst [vmem:[#allocation2 + $0x18] sm:$0x11] %v7274_v56  ;;  %390 = vst [vmem:[#allocation2 + $0x2c8] sm:$0x11] %v7275_v57  ;;  %v6753_v7 = vcombine.high %v663_v63, %v7876_v4  ;;  %v6755_v8 = vcombine.high %v664_v1, %v7876_v4  ;;  %v6752_v9 = vcombine.low %v663_v63, %v7876_v4 }
  0x9e   :  { %v6754_v11 = vcombine.low %v664_v1, %v7876_v4  ;;  %v312_v12 = vmul.f32 %v298_v59, %v286_v62  ;;  %v186_v59 = vrot.slane %v173_v53, %v8024_v19  ;;  %v190_v1 = vrot.slane %v173_v53, %v8027_v20 }
  0x9f   :  { %v280_v13 = vpop.permute.xlu0 %279  ;;  %888 = vmatprep.subr.bf16.mxu0 %v6753_v7  ;;  %931 = vmatprep.subr.bf16.mxu1 %v6755_v8  ;;  %v282_v14 = vpop.permute.xlu1 %281 }
  0xa0   :  { %v285_v17 = vsel %vm283_vm5, %v278_v60, %v280_v13  ;;  %v284_v21 = vsel %vm283_vm5, %v280_v13, %v282_v14  ;;  %v287_v22 = vsel %vm283_vm5, %v282_v14, %v276_v58  ;;  %889 = vmatpush1.bf16.msra.mxu0 %v6752_v9  ;;  %932 = vmatpush1.bf16.msra.mxu1 %v6754_v11 }
  0xa1   :  { %v313_v23 = vmul.f32 %v302_v61, %v285_v17  ;;  %v311_v26 = vmul.f32 %v294_v2, %v287_v22  ;;  %v314_v27 = vmul.f32 %v306_v3, %v284_v21  ;;  %890 = vmatprep.subr.bf16.mxu0 %v6749_v6  ;;  %933 = vmatprep.subr.bf16.mxu1 %v6751_v10  ;;  %v6727_v17 = vld [vmem:[%s11196_s3 + $0x20] ss:$8 sm:$0xf] }
  0xa2   :  { %v182_v58 = vrot.slane %v173_v53, %v8036_v25  ;;  %v178_v61 = vrot.slane %v173_v53, %v8033_v24  ;;  %v606_v28 = vrot.slane %v6727_v17, %v8036_v25 }
  0xa3   :  { %v7272_v29 = vpack.c.bf16 %v312_v12, %v311_v26  ;;  %v7273_v30 = vpack.c.bf16 %v314_v27, %v313_v23  ;;  %v218_v31 = vpop.permute.xlu0 %217  ;;  %v220_v32 = vpop.permute.xlu1 %219  ;;  %v602_v27 = vrot.slane %v6727_v17, %v8033_v24 }
  0xa4   :  { %891 = vmatpush1.bf16.msra.mxu0 %v6748_v15  ;;  %934 = vmatpush1.bf16.msra.mxu1 %v6750_v16  ;;  %v655_v35 = vld [vmem:[#allocation2 + $0x18] sm:$0xff]  ;;  %v656_v37 = vld [vmem:[#allocation2 + $0x2c8] sm:$0xff]  ;;  %v228_v42 = vsel %vm225_vm6, %v218_v31, %v220_v32 }
  0xa5   :  { %331 = vst [vmem:[#allocation2 + $0x80] sm:$0x11] %v7272_v29  ;;  %332 = vst [vmem:[#allocation2 + $0x308] sm:$0x11] %v7273_v30  ;;  %v6745_v38 = vcombine.high %v655_v35, %v7876_v4  ;;  %v6747_v40 = vcombine.high %v656_v37, %v7876_v4  ;;  %v6744_v41 = vcombine.low %v655_v35, %v7876_v4 }
  0xa6   :  { %v6746_v43 = vcombine.low %v656_v37, %v7876_v4  ;;  %v254_v49 = vmul.f32 %v240_v33, %v228_v42  ;;  %v610_v30 = vrot.slane %v6727_v17, %v8024_v19  ;;  %v614_v33 = vrot.slane %v6727_v17, %v8027_v20 }
  0xa7   :  { %v222_v44 = vpop.permute.xlu0 %221  ;;  %892 = vmatprep.subr.bf16.mxu0 %v6745_v38  ;;  %v224_v45 = vpop.permute.xlu1 %223  ;;  %935 = vmatprep.subr.bf16.mxu1 %v6747_v40 }
  0xa8   :  { %v227_v46 = vsel %vm225_vm6, %v220_v32, %v222_v44  ;;  %v226_v47 = vsel %vm225_vm6, %v222_v44, %v224_v45  ;;  %v229_v48 = vsel %vm225_vm6, %v224_v45, %v218_v31  ;;  %893 = vmatpush1.bf16.msra.mxu0 %v6744_v41  ;;  %936 = vmatpush1.bf16.msra.mxu1 %v6746_v43 }
  0xa9   :  { %v255_v50 = vmul.f32 %v244_v34, %v227_v46  ;;  %v253_v51 = vmul.f32 %v236_v36, %v229_v48  ;;  %v256_v52 = vmul.f32 %v248_v39, %v226_v47 }
  0xab   :  { %v7270_v54 = vpack.c.bf16 %v254_v49, %v253_v51  ;;  %v7271_v55 = vpack.c.bf16 %v256_v52, %v255_v50  ;;  %v159_v56 = vpop.permute.xlu0 %158  ;;  %v161_v57 = vpop.permute.xlu1 %160 }
  0xac   :  { %v651_v60 = vld [vmem:[#allocation2 + $0x80] sm:$0xff]  ;;  %v652_v62 = vld [vmem:[#allocation2 + $0x308] sm:$0xff]  ;;  %v171_v6 = vsel %vm168_vm7, %v159_v56, %v161_v57 }
  0xad   :  { %273 = vst [vmem:[#allocation2 + $0x320] sm:$0x11] %v7270_v54  ;;  %274 = vst [vmem:[#allocation2 + $0x38] sm:$0x11] %v7271_v55  ;;  %v6741_v63 = vcombine.high %v651_v60, %v7876_v4  ;;  %v6743_v2 = vcombine.high %v652_v62, %v7876_v4  ;;  %v6740_v3 = vcombine.low %v651_v60, %v7876_v4 }
  0xae   :  { %v6742_v7 = vcombine.low %v652_v62, %v7876_v4  ;;  %v196_v13 = vmul.f32 %v182_v58, %v171_v6 }
  0xaf   :  { %v163_v8 = vpop.permute.xlu0 %162  ;;  %894 = vmatprep.subr.bf16.mxu0 %v6741_v63  ;;  %v165_v9 = vpop.permute.xlu1 %164  ;;  %937 = vmatprep.subr.bf16.mxu1 %v6743_v2 }
  0xb0   :  { %v170_v10 = vsel %vm168_vm7, %v161_v57, %v163_v8  ;;  %v169_v11 = vsel %vm168_vm7, %v163_v8, %v165_v9  ;;  %v172_v12 = vsel %vm168_vm7, %v165_v9, %v159_v56  ;;  %895 = vmatpush1.bf16.msra.mxu0 %v6740_v3  ;;  %938 = vmatpush1.bf16.msra.mxu1 %v6742_v7 }
  0xb1   :  { %v197_v14 = vmul.f32 %v186_v59, %v170_v10  ;;  %v195_v15 = vmul.f32 %v178_v61, %v172_v12  ;;  %v198_v16 = vmul.f32 %v190_v1, %v169_v11  ;;  %v7588_v61 = vld [vmem:[%s11194_s1] ss:$16 sps:$4 sm:$0xff]  }
  0xb3   :  { %v7268_v21 = vpack.c.bf16 %v196_v13, %v195_v15  ;;  %v7269_v22 = vpack.c.bf16 %v198_v16, %v197_v14  ;;  %v584_v23 = vpop.permute.xlu0 %583  ;;  %v586_v26 = vpop.permute.xlu1 %585 }
  0xb4   :  { %v647_v29 = vld [vmem:[#allocation2 + $0x320] sm:$0xff]  ;;  %v648_v31 = vld [vmem:[#allocation2 + $0x38] sm:$0xff]  ;;  %v594_v36 = vsel %vm591_vm8, %v584_v23, %v586_v26 }
  0xb5   :  { %215 = vst [vmem:[#allocation2 + $0x2b0] sm:$0x11] %v7268_v21  ;;  %216 = vst [vmem:[#allocation2 + $0xd0] sm:$0x11] %v7269_v22  ;;  %v6737_v32 = vcombine.high %v647_v29, %v7876_v4  ;;  %v6739_v34 = vcombine.high %v648_v31, %v7876_v4  ;;  %v6736_v35 = vcombine.low %v647_v29, %v7876_v4 }
  0xb6   :  { %v6738_v37 = vcombine.low %v648_v31, %v7876_v4  ;;  %v619_v43 = vmul.f32 %v602_v27, %v594_v36 }
  0xb7   :  { %v588_v38 = vpop.permute.xlu0 %587  ;;  %896 = vmatprep.subr.bf16.mxu0 %v6737_v32  ;;  %v590_v39 = vpop.permute.xlu1 %589  ;;  %939 = vmatprep.subr.bf16.mxu1 %v6739_v34 }
  0xb8   :  { %v593_v40 = vsel %vm591_vm8, %v586_v26, %v588_v38  ;;  %v592_v41 = vsel %vm591_vm8, %v588_v38, %v590_v39  ;;  %v595_v42 = vsel %vm591_vm8, %v590_v39, %v584_v23  ;;  %897 = vmatpush1.bf16.msra.mxu0 %v6736_v35  ;;  %940 = vmatpush1.bf16.msra.mxu1 %v6738_v37 }
  0xb9   :  { %v620_v44 = vmul.f32 %v606_v28, %v593_v40  ;;  %v621_v45 = vmul.f32 %v610_v30, %v592_v41  ;;  %v622_v46 = vmul.f32 %v614_v33, %v595_v42  ;;  %v7591_v40 = vld [vmem:[%s11194_s1 + $0x24] ss:$16 sps:$4 sm:$0xff]  }
  0xbb   :  { %v7284_v47 = vpack.c.bf16 %v620_v44, %v619_v43  ;;  %v7285_v48 = vpack.c.bf16 %v622_v46, %v621_v45  ;;  %v1700_v43 = vld [vmem:[%s11195_s2 + $0x10] sm:$0xff]  ;;  %v1701_v46 = vld [vmem:[%s11195_s2 + $0x18] sm:$0xff] }
  0xbc   :  { %v643_v49 = vld [vmem:[#allocation2 + $0x2b0] sm:$0xff] }
  0xbd   :  { %v644_v50 = vld [vmem:[#allocation2 + $0xd0] sm:$0xff]  ;;  %639 = vst [vmem:[#allocation2 + $0x158] sm:$0x11] %v7284_v47  ;;  %640 = vst [vmem:[#allocation2 + $0x180] sm:$0x11] %v7285_v48  ;;  %v6733_v51 = vcombine.high %v643_v49, %v7876_v4  ;;  %v6732_v53 = vcombine.low %v643_v49, %v7876_v4 }
  0xbe   :  { %v6735_v52 = vcombine.high %v644_v50, %v7876_v4  ;;  %v6734_v54 = vcombine.low %v644_v50, %v7876_v4 }
  0xbf   :  { %898 = vmatprep.subr.bf16.mxu0 %v6733_v51 }
  0xc0   :  { %941 = vmatprep.subr.bf16.mxu1 %v6735_v52  ;;  %899 = vmatpush1.bf16.msra.mxu0 %v6732_v53 }
  0xc1   :  { %942 = vmatpush1.bf16.msra.mxu1 %v6734_v54 }
  0xc4   :  { %v675_v55 = vld [vmem:[#allocation2 + $0x158] sm:$0xff]  ;;  %v676_v56 = vld [vmem:[#allocation2 + $0x180] sm:$0xff]  ;;  %v684_v62 = vpop.permute.xlu0 %683  ;;  %v689_v6 = vpop.permute.xlu1 %688 }
  0xc5   :  { %v6765_v57 = vcombine.high %v675_v55, %v7876_v4  ;;  %v6767_v58 = vcombine.high %v676_v56, %v7876_v4  ;;  %v6764_v59 = vcombine.low %v675_v55, %v7876_v4  ;;  %v6766_v60 = vcombine.low %v676_v56, %v7876_v4 }
  0xc7   :  { %914 = vmatprep.subr.bf16.mxu0 %v6765_v57  ;;  %957 = vmatprep.subr.bf16.mxu1 %v6767_v58 }
  0xc8   :  { %915 = vmatpush2.bf16.msra.mxu0 %v6764_v59  ;;  %958 = vmatpush2.bf16.msra.mxu1 %v6766_v60 }
  0xcb   :  { %917 = vmatmul.mubr.bf16.vlgmr.msra.gmra.mxu0 %v7588_v61  ;;  %960 = vmatmul.mubr.bf16.vlgmr.msra.gmra.mxu1 %v7588_v61 }
  0xcc   :  { %6851 = vmatprep.mubr.msk.bf16.mxu0 %vm880_vm0, %v7591_v40  ;;  %6852 = vmatprep.mubr.msk.bf16.mxu1 %vm880_vm0, %v7591_v40 }
 0x18b   :  { %v918_v63 = vpop.f32.mrf.mxu0  ;;  %v961_v1 = vpop.f32.mrf.mxu1 }
 0x18c   :  { %v919_v2 = vadd.f32 %v918_v63, %v684_v62  ;;  %v962_v3 = vadd.f32 %v961_v1, %v684_v62 }
 0x18d   :  { %v920_v7 = vpop.f32.mrf.mxu0  ;;  %v963_v8 = vpop.f32.mrf.mxu1 }
 0x18e   :  { %v8202_v9 = vmax.f32 %v919_v2, 0.0  ;;  %v921_v4 = vadd.f32 %v920_v7, %v684_v62  ;;  %v964_v10 = vadd.f32 %v963_v8, %v684_v62  ;;  %v8204_v13 = vmax.f32 %v962_v3, 0.0  ;;  %v6803_v8 = vld [vmem:[%s11196_s3 + $0x7] ss:$8 sm:$0xf] }
 0x18f   :  { %v922_v11 = vpop.f32.mrf.mxu0  ;;  %v965_v12 = vpop.f32.mrf.mxu1 }
 0x190   :  { %v8206_v14 = vmax.f32 %v921_v4, 0.0  ;;  %v923_v15 = vadd.f32 %v922_v11, %v689_v6  ;;  %1498 = vrot.lane.b32.xlu1 %v8202_v9, %s7877_s0  ;;  %v966_v16 = vadd.f32 %v965_v12, %v689_v6  ;;  %v8214_v26 = vmax.f32 %v964_v10, 0.0 }
 0x191   :  { %v924_v17 = vpop.f32.mrf.mxu0  ;;  %v967_v21 = vpop.f32.mrf.mxu1  ;;  %v1527_v11 = vrot.slane %v6803_v8, %v8033_v24  ;;  %v1531_v12 = vrot.slane %v6803_v8, %v8036_v25 }
 0x192   :  { %v7302_v22 = vpack.c.bf16 %v8206_v14, %v8202_v9  ;;  %v8212_v23 = vmax.f32 %v923_v15, 0.0  ;;  %v925_v27 = vadd.f32 %v924_v17, %v689_v6  ;;  %v968_v28 = vadd.f32 %v967_v21, %v689_v6 }
 0x193   :  { %v8220_v29 = vmax.f32 %v966_v16, 0.0 }
 0x194   :  { %1330 = vst [vmem:[#allocation2 + $0x2c0] sm:$0xff] %v7302_v22  ;;  %1500 = vrot.lane.b32.xlu0 %v8212_v23, %s7877_s0  ;;  %1506 = vrot.lane.b32.xlu1 %v8204_v13, %s7877_s0  ;;  %v8222_v30 = vmax.f32 %v925_v27, 0.0  ;;  %v8224_v31 = vmax.f32 %v968_v28, 0.0  ;;  %v6798_v28 = vld [vmem:[%s11196_s3 + $0x6] ss:$8 sm:$0xf] }
 0x195   :  { %v1449_v33 = vrot.slane %v6798_v28, %v8036_v25 }
 0x196   :  { %v7304_v32 = vpack.c.bf16 %v8222_v30, %v8212_v23 }
 0x198   :  { %1508 = vrot.lane.b32.xlu0 %v8220_v29, %s7877_s0  ;;  %1416 = vrot.lane.b32.xlu1 %v8202_v9, %s7878_s26  ;;  %1332 = vst [vmem:[#allocation2 + $0x198] sm:$0xff] %v7304_v32 }
 0x19c   :  { %1418 = vrot.lane.b32.xlu0 %v8212_v23, %s7878_s26  ;;  %1424 = vrot.lane.b32.xlu1 %v8204_v13, %s7878_s26 }
 0x1a0   :  { %1426 = vrot.lane.b32.xlu0 %v8220_v29, %s7878_s26  ;;  %1334 = vrot.lane.b32.xlu1 %v8202_v9, %s7879_s27 }
 0x1a4   :  { %1336 = vrot.lane.b32.xlu0 %v8212_v23, %s7879_s27  ;;  %1342 = vrot.lane.b32.xlu1 %v8204_v13, %s7879_s27 }
 0x1a8   :  { %1344 = vrot.lane.b32.xlu0 %v8220_v29, %s7879_s27  ;;  %1224 = vrot.lane.b32.xlu1 %v8202_v9, %s7880_s28 }
 0x1ac   :  { %1226 = vrot.lane.b32.xlu0 %v8212_v23, %s7880_s28  ;;  %1232 = vrot.lane.b32.xlu1 %v8204_v13, %s7880_s28 }
 0x1b0   :  { %1234 = vrot.lane.b32.xlu0 %v8220_v29, %s7880_s28  ;;  %1142 = vrot.lane.b32.xlu1 %v8202_v9, %s7881_s29 }
 0x1b4   :  { %1144 = vrot.lane.b32.xlu0 %v8212_v23, %s7881_s29  ;;  %1150 = vrot.lane.b32.xlu1 %v8204_v13, %s7881_s29 }
 0x1b8   :  { %1152 = vrot.lane.b32.xlu0 %v8220_v29, %s7881_s29  ;;  %1060 = vrot.lane.b32.xlu1 %v8202_v9, %s7882_s30 }
 0x1bc   :  { %1062 = vrot.lane.b32.xlu0 %v8212_v23, %s7882_s30  ;;  %1068 = vrot.lane.b32.xlu1 %v8204_v13, %s7882_s30 }
 0x1c0   :  { %1070 = vrot.lane.b32.xlu0 %v8220_v29, %s7882_s30  ;;  %978 = vrot.lane.b32.xlu1 %v8202_v9, %s7883_s8 }
 0x1c4   :  { %980 = vrot.lane.b32.xlu0 %v8212_v23, %s7883_s8  ;;  %986 = vrot.lane.b32.xlu1 %v8204_v13, %s7883_s8 }
 0x1c8   :  { %988 = vrot.lane.b32.xlu0 %v8220_v29, %s7883_s8  ;;  %1580 = vrot.lane.b32.xlu1 %v8202_v9, %s7884_s9 }
 0x1cc   :  { %1582 = vrot.lane.b32.xlu0 %v8212_v23, %s7884_s9  ;;  %1588 = vrot.lane.b32.xlu1 %v8204_v13, %s7884_s9 }
 0x1d0   :  { %1590 = vrot.lane.b32.xlu0 %v8220_v29, %s7884_s9  ;;  %1502 = vrot.lane.b32.xlu1 %v8206_v14, %s7877_s0 }
 0x1d4   :  { %1504 = vrot.lane.b32.xlu0 %v8222_v30, %s7877_s0  ;;  %1510 = vrot.lane.b32.xlu1 %v8214_v26, %s7877_s0 }
 0x1d8   :  { %1512 = vrot.lane.b32.xlu0 %v8224_v31, %s7877_s0  ;;  %1420 = vrot.lane.b32.xlu1 %v8206_v14, %s7878_s26 }
 0x1dc   :  { %1422 = vrot.lane.b32.xlu0 %v8222_v30, %s7878_s26  ;;  %1428 = vrot.lane.b32.xlu1 %v8214_v26, %s7878_s26 }
 0x1e0   :  { %1430 = vrot.lane.b32.xlu0 %v8224_v31, %s7878_s26  ;;  %1338 = vrot.lane.b32.xlu1 %v8206_v14, %s7879_s27 }
 0x1e4   :  { %1340 = vrot.lane.b32.xlu0 %v8222_v30, %s7879_s27  ;;  %1346 = vrot.lane.b32.xlu1 %v8214_v26, %s7879_s27 }
 0x1e8   :  { %1348 = vrot.lane.b32.xlu0 %v8224_v31, %s7879_s27  ;;  %1228 = vrot.lane.b32.xlu1 %v8206_v14, %s7880_s28 }
 0x1ec   :  { %1230 = vrot.lane.b32.xlu0 %v8222_v30, %s7880_s28  ;;  %1236 = vrot.lane.b32.xlu1 %v8214_v26, %s7880_s28 }
 0x1f0   :  { %1238 = vrot.lane.b32.xlu0 %v8224_v31, %s7880_s28  ;;  %1146 = vrot.lane.b32.xlu1 %v8206_v14, %s7881_s29 }
 0x1f4   :  { %1148 = vrot.lane.b32.xlu0 %v8222_v30, %s7881_s29  ;;  %1154 = vrot.lane.b32.xlu1 %v8214_v26, %s7881_s29 }
 0x1f8   :  { %1156 = vrot.lane.b32.xlu0 %v8224_v31, %s7881_s29  ;;  %1064 = vrot.lane.b32.xlu1 %v8206_v14, %s7882_s30 }
 0x1fc   :  { %1066 = vrot.lane.b32.xlu0 %v8222_v30, %s7882_s30  ;;  %1072 = vrot.lane.b32.xlu1 %v8214_v26, %s7882_s30 }
 0x200   :  { %1074 = vrot.lane.b32.xlu0 %v8224_v31, %s7882_s30  ;;  %982 = vrot.lane.b32.xlu1 %v8206_v14, %s7883_s8 }
 0x202   :  { %v8344_v37 = vpop.permute.xlu1 %1498 }
 0x204   :  { %984 = vrot.lane.b32.xlu0 %v8222_v30, %s7883_s8  ;;  %990 = vrot.lane.b32.xlu1 %v8214_v26, %s7883_s8 }
 0x206   :  { %v8350_v38 = vpop.permute.xlu0 %1500  ;;  %v1507_v39 = vpop.permute.xlu1 %1506 }
 0x208   :  { %992 = vrot.lane.b32.xlu0 %v8224_v31, %s7883_s8  ;;  %1584 = vrot.lane.b32.xlu1 %v8206_v14, %s7884_s9 }
 0x20a   :  { %v8359_v41 = vpop.permute.xlu0 %1508  ;;  %v8361_v42 = vpop.permute.xlu1 %1416 }
 0x20c   :  { %1586 = vrot.lane.b32.xlu0 %v8222_v30, %s7884_s9  ;;  %1592 = vrot.lane.b32.xlu1 %v8214_v26, %s7884_s9 }
 0x20e   :  { %v8372_v44 = vpop.permute.xlu0 %1418  ;;  %v8374_v45 = vpop.permute.xlu1 %1424 }
 0x210   :  { %1594 = vrot.lane.b32.xlu0 %v8224_v31, %s7884_s9  ;;  %1704 = vperm.xlu1 %7586, %v1700_v43   ;;  %v1535_v43 = vrot.slane %v6803_v8, %v8024_v19 }
 0x212   :  { %v8381_v47 = vpop.permute.xlu0 %1426  ;;  %v8383_v48 = vpop.permute.xlu1 %1334 }
 0x214   :  { %1709 = vperm.xlu0 %7585, %v1701_v46   ;;  %v1539_v46 = vrot.slane %v6803_v8, %v8027_v20  ;;  %v1445_v8 = vrot.slane %v6798_v28, %v8033_v24 }
 0x216   :  { %v8385_v49 = vpop.permute.xlu0 %1336  ;;  %v8387_v50 = vpop.permute.xlu1 %1342 }
 0x21a   :  { %v8389_v51 = vpop.permute.xlu0 %1344  ;;  %v8391_v52 = vpop.permute.xlu1 %1224 }
 0x21e   :  { %v8393_v53 = vpop.permute.xlu0 %1226  ;;  %v8395_v54 = vpop.permute.xlu1 %1232 }
 0x222   :  { %v8397_v55 = vpop.permute.xlu0 %1234  ;;  %v8399_v56 = vpop.permute.xlu1 %1142 }
 0x226   :  { %v8401_v57 = vpop.permute.xlu0 %1144  ;;  %v8403_v58 = vpop.permute.xlu1 %1150 }
 0x22a   :  { %v8405_v59 = vpop.permute.xlu0 %1152  ;;  %v8407_v60 = vpop.permute.xlu1 %1060 }
 0x22e   :  { %v8409_v61 = vpop.permute.xlu0 %1062  ;;  %v8411_v62 = vpop.permute.xlu1 %1068 }
 0x232   :  { %v8413_v63 = vpop.permute.xlu0 %1070  ;;  %v8415_v1 = vpop.permute.xlu1 %978 }
 0x236   :  { %v8417_v2 = vpop.permute.xlu0 %980  ;;  %v8419_v3 = vpop.permute.xlu1 %986 }
 0x237   :  { %11312 = vst [vmem:[#allocation6_spill] sm:$0xff] %v8417_v2  ;;  %v1457_v2 = vrot.slane %v6798_v28, %v8027_v20 }
 0x23a   :  { %v8421_v6 = vpop.permute.xlu0 %988  ;;  %v8423_v7 = vpop.permute.xlu1 %1580 }
 0x23b   :  { %11313 = vst [vmem:[#allocation7_spill] sm:$0xff] %v8421_v6  ;;  %11314 = vst [vmem:[#allocation8_spill] sm:$0xff] %v8423_v7 }
 0x23e   :  { %v8428_v4 = vpop.permute.xlu0 %1582  ;;  %v8430_v10 = vpop.permute.xlu1 %1588 }
 0x23f   :  { %11315 = vst [vmem:[#allocation9_spill] sm:$0xff] %v8428_v4  ;;  %11316 = vst [vmem:[#allocation10_spill] sm:$0xff] %v8430_v10 }
 0x242   :  { %v8434_v15 = vpop.permute.xlu0 %1590  ;;  %v1503_v16 = vpop.permute.xlu1 %1502 }
 0x243   :  { %11317 = vst [vmem:[#allocation11_spill] sm:$0xff] %v8434_v15  ;;  %v1516_v17 = vsel %vm533_vm1, %v1503_v16, %v1507_v39  ;;  %v1518_v21 = vsel %vm533_vm1, %v8344_v37, %v1503_v16 }
 0x244   :  { %v1544_v22 = vmul.f32 %v1527_v11, %v1518_v21  ;;  %v1545_v27 = vmul.f32 %v1531_v12, %v1516_v17 }
 0x246   :  { %v7314_v32 = vpack.c.bf16 %v1545_v27, %v1544_v22  ;;  %v1505_v40 = vpop.permute.xlu0 %1504  ;;  %v1511_v0 = vpop.permute.xlu1 %1510 }
 0x247   :  { %v1517_v36 = vsel %vm533_vm1, %v1505_v40, %v8359_v41  ;;  %v1519_v16 = vsel %vm533_vm1, %v8350_v38, %v1505_v40  ;;  %v1514_v17 = vsel %vm533_vm1, %v1507_v39, %v1511_v0  ;;  %v1520_v21 = vsel %vm533_vm1, %v1511_v0, %v8344_v37 }
 0x248   :  { %1576 = vst [vmem:[#allocation2 + $0x1d8] sm:$0xff] %v7314_v32  ;;  %v1548_v35 = vmul.f32 %v1527_v11, %v1519_v16  ;;  %v1549_v34 = vmul.f32 %v1531_v12, %v1517_v36  ;;  %v1546_v4 = vmul.f32 %v1535_v43, %v1514_v17  ;;  %v1547_v15 = vmul.f32 %v1539_v46, %v1520_v21 }
 0x249   :  { %v1453_v16 = vrot.slane %v6798_v28, %v8024_v19 }
 0x24a   :  { %v7316_v5 = vpack.c.bf16 %v1549_v34, %v1548_v35  ;;  %v1513_v7 = vpop.permute.xlu0 %1512  ;;  %v1421_v10 = vpop.permute.xlu1 %1420 }
 0x24b   :  { %v1515_v39 = vsel %vm533_vm1, %v8359_v41, %v1513_v7  ;;  %v1521_v0 = vsel %vm533_vm1, %v1513_v7, %v8350_v38  ;;  %v1434_v36 = vsel %vm475_vm2, %v1421_v10, %v8374_v45  ;;  %v1436_v37 = vsel %vm475_vm2, %v8361_v42, %v1421_v10  ;;  %v6793_v41 = vld [vmem:[%s11196_s3 + $0x5] ss:$8 sm:$0xf] }
 0x24c   :  { %1578 = vst [vmem:[#allocation2 + $0x280] sm:$0xff] %v7316_v5  ;;  %v1550_v11 = vmul.f32 %v1535_v43, %v1515_v39  ;;  %v1551_v12 = vmul.f32 %v1539_v46, %v1521_v0  ;;  %v1462_v32 = vmul.f32 %v1445_v8, %v1436_v37  ;;  %v1463_v40 = vmul.f32 %v1449_v33, %v1434_v36 }
 0x24d   :  { %v7773_v38 = vpack.c.bf16 %v1549_v34, %v1545_v27  ;;  %v7774_v7 = vpack.c.bf16 %v1548_v35, %v1544_v22  ;;  %v1363_v27 = vrot.slane %v6793_v41, %v8033_v24  ;;  %v1367_v28 = vrot.slane %v6793_v41, %v8036_v25 }
 0x24e   :  { %v7310_v17 = vpack.c.bf16 %v1463_v40, %v1462_v32  ;;  %v1423_v21 = vpop.permute.xlu0 %1422  ;;  %v1429_v6 = vpop.permute.xlu1 %1428  ;;  %v7775_v46 = vpack.c.bf16 %v1551_v12, %v1547_v15  ;;  %v7776_v39 = vpack.c.bf16 %v1550_v11, %v1546_v4 }
 0x24f   :  { %v1435_v5 = vsel %vm475_vm2, %v1423_v21, %v8381_v47  ;;  %v1437_v10 = vsel %vm475_vm2, %v8372_v44, %v1423_v21  ;;  %v1432_v43 = vsel %vm475_vm2, %v8374_v45, %v1429_v6  ;;  %v1438_v34 = vsel %vm475_vm2, %v1429_v6, %v8361_v42  ;;  %1904 = vmatprep.subr.bf16.mxu0 %v7773_v38 }
 0x250   :  { %1494 = vst [vmem:[#allocation2 + $0x190] sm:$0xff] %v7310_v17  ;;  %v1466_v35 = vmul.f32 %v1445_v8, %v1437_v10  ;;  %v1467_v22 = vmul.f32 %v1449_v33, %v1435_v5  ;;  %1905 = vmatpush1.bf16.msra.mxu0 %v7774_v7  ;;  %v1464_v36 = vmul.f32 %v1453_v16, %v1432_v43 }
 0x251   :  { %v1465_v37 = vmul.f32 %v1457_v2, %v1438_v34  ;;  %1947 = vmatprep.subr.bf16.mxu1 %v7775_v46 }
 0x252   :  { %v7312_v0 = vpack.c.bf16 %v1467_v22, %v1466_v35  ;;  %v1431_v21 = vpop.permute.xlu0 %1430  ;;  %v1339_v45 = vpop.permute.xlu1 %1338  ;;  %1948 = vmatpush1.bf16.msra.mxu1 %v7776_v39  ;;  %v7778_v38 = vpack.c.bf16 %v1466_v35, %v1462_v32  ;;  %v6784_v35 = vld [vmem:[%s11196_s3 + $0x3] ss:$8 sm:$0xf] }
 0x253   :  { %v1433_v42 = vsel %vm475_vm2, %v8381_v47, %v1431_v21  ;;  %v1439_v33 = vsel %vm475_vm2, %v1431_v21, %v8372_v44  ;;  %v1352_v6 = vsel %vm417_vm3, %v1339_v45, %v8387_v50  ;;  %v1354_v4 = vsel %vm417_vm3, %v8383_v48, %v1339_v45 }
 0x254   :  { %1496 = vst [vmem:[#allocation2 + $0x8] sm:$0xff] %v7312_v0  ;;  %v1468_v15 = vmul.f32 %v1453_v16, %v1433_v42  ;;  %v1469_v8 = vmul.f32 %v1457_v2, %v1439_v33  ;;  %v1380_v11 = vmul.f32 %v1363_v27, %v1354_v4  ;;  %v1381_v12 = vmul.f32 %v1367_v28, %v1352_v6 }
 0x255   :  { %v7777_v47 = vpack.c.bf16 %v1467_v22, %v1463_v40  ;;  %v1371_v44 = vrot.slane %v6793_v41, %v8024_v19  ;;  %v1375_v2 = vrot.slane %v6793_v41, %v8027_v20 }
 0x256   :  { %v7306_v7 = vpack.c.bf16 %v1381_v12, %v1380_v11  ;;  %v1341_v17 = vpop.permute.xlu0 %1340  ;;  %v1347_v5 = vpop.permute.xlu1 %1346  ;;  %v7779_v22 = vpack.c.bf16 %v1469_v8, %v1465_v37  ;;  %v7780_v46 = vpack.c.bf16 %v1468_v15, %v1464_v36  ;;  %v1257_v37 = vrot.slane %v6784_v35, %v8036_v25  ;;  %v6779_v8 = vld [vmem:[%s11196_s3 + $0x2] ss:$8 sm:$0xf] }
 0x257   :  { %v1353_v10 = vsel %vm417_vm3, %v1341_v17, %v8389_v51  ;;  %v1355_v43 = vsel %vm417_vm3, %v8385_v49, %v1341_v17  ;;  %1906 = vmatprep.subr.bf16.mxu0 %v7777_v47  ;;  %v1350_v32 = vsel %vm417_vm3, %v8387_v50, %v1347_v5  ;;  %v1356_v34 = vsel %vm417_vm3, %v1347_v5, %v8383_v48 }
 0x258   :  { %1412 = vst [vmem:[#allocation2 + $0x2d0] sm:$0xff] %v7306_v7  ;;  %v1384_v16 = vmul.f32 %v1363_v27, %v1355_v43  ;;  %v1385_v40 = vmul.f32 %v1367_v28, %v1353_v10  ;;  %1907 = vmatpush1.bf16.msra.mxu0 %v7778_v38  ;;  %v1382_v27 = vmul.f32 %v1371_v44, %v1350_v32 }
 0x259   :  { %v1383_v28 = vmul.f32 %v1375_v2, %v1356_v34  ;;  %1949 = vmatprep.subr.bf16.mxu1 %v7779_v22  ;;  %v1253_v36 = vrot.slane %v6784_v35, %v8033_v24  ;;  %v1265_v15 = vrot.slane %v6784_v35, %v8027_v20  ;;  %v1261_v7 = vrot.slane %v6784_v35, %v8024_v19 }
 0x25a   :  { %v7308_v41 = vpack.c.bf16 %v1385_v40, %v1384_v16  ;;  %v1349_v39 = vpop.permute.xlu0 %1348  ;;  %v1229_v0 = vpop.permute.xlu1 %1228  ;;  %1950 = vmatpush1.bf16.msra.mxu1 %v7780_v46  ;;  %v7781_v33 = vpack.c.bf16 %v1385_v40, %v1381_v12  ;;  %v7782_v6 = vpack.c.bf16 %v1384_v16, %v1380_v11  ;;  %v11318_v17 = vpack.c.bf16 %v8222_v30, %v8206_v14 }
 0x25b   :  { %v1351_v50 = vsel %vm417_vm3, %v8389_v51, %v1349_v39  ;;  %v1357_v48 = vsel %vm417_vm3, %v1349_v39, %v8385_v49  ;;  %v1244_v42 = vsel %vm341_vm4, %v8391_v52, %v1229_v0  ;;  %v1242_v10 = vsel %vm341_vm4, %v1229_v0, %v8395_v54 }
 0x25c   :  { %1414 = vst [vmem:[#allocation2 + $0x340] sm:$0xff] %v7308_v41  ;;  %v1386_v21 = vmul.f32 %v1371_v44, %v1351_v50  ;;  %v1387_v45 = vmul.f32 %v1375_v2, %v1357_v48  ;;  %1908 = vmatprep.subr.bf16.mxu0 %v7781_v33  ;;  %v1271_v47 = vmul.f32 %v1257_v37, %v1244_v42 }
 0x25d   :  { %1909 = vmatpush1.bf16.msra.mxu0 %v7782_v6  ;;  %v1175_v16 = vrot.slane %v6779_v8, %v8036_v25  ;;  %v1171_v32 = vrot.slane %v6779_v8, %v8033_v24  ;;  %v11319_v39 = vpack.c.bf16 %v8212_v23, %v8202_v9  ;;  %v1272_v0 = vmul.f32 %v1261_v7, %v1242_v10  ;;  %v6774_v9 = vld [vmem:[%s11196_s3 + $0x1] ss:$8 sm:$0xf] }
 0x25e   :  { %v1231_v51 = vpop.permute.xlu0 %1230  ;;  %v1237_v4 = vpop.permute.xlu1 %1236  ;;  %1910 = vmatprep.subr.bf16.mxu0 %v11318_v17  ;;  %v7783_v44 = vpack.c.bf16 %v1387_v45, %v1383_v28  ;;  %v7784_v5 = vpack.c.bf16 %v1386_v21, %v1382_v27  ;;  %v1179_v27 = vrot.slane %v6779_v8, %v8024_v19  ;;  %v11320_v50 = vpack.c.bf16 %v8224_v31, %v8214_v26 }
 0x25f   :  { %v1246_v49 = vsel %vm341_vm4, %v1237_v4, %v8391_v52  ;;  %v1245_v38 = vsel %vm341_vm4, %v8393_v53, %v1231_v51  ;;  %v1240_v11 = vsel %vm341_vm4, %v8395_v54, %v1237_v4  ;;  %v1243_v52 = vsel %vm341_vm4, %v1231_v51, %v8397_v55 }
 0x260   :  { %v8543_v12 = vmul.f32 %v1253_v36, %v1246_v49  ;;  %v1275_v34 = vmul.f32 %v1257_v37, %v1245_v38  ;;  %v1273_v35 = vmul.f32 %v1265_v15, %v1240_v11  ;;  %1951 = vmatprep.subr.bf16.mxu1 %v7783_v44  ;;  %v1276_v54 = vmul.f32 %v1261_v7, %v1243_v52 }
 0x261   :  { %1911 = vmatpush1.bf16.msra.mxu0 %v11319_v39  ;;  %1952 = vmatpush1.bf16.msra.mxu1 %v7784_v5  ;;  %v1183_v21 = vrot.slane %v6779_v8, %v8027_v20  ;;  %v1093_v49 = vrot.slane %v6774_v9, %v8036_v25  ;;  %v1097_v44 = vrot.slane %v6774_v9, %v8024_v19 }
 0x262   :  { %v7298_v43 = vpack.c.bf16 %v1271_v47, %v8543_v12  ;;  %v1239_v2 = vpop.permute.xlu0 %1238  ;;  %v1147_v40 = vpop.permute.xlu1 %1146  ;;  %1953 = vmatprep.subr.bf16.mxu1 %v11320_v50  ;;  %v7788_v6 = vpack.c.bf16 %v1276_v54, %v1272_v0  ;;  %v1101_v5 = vrot.slane %v6774_v9, %v8027_v20 }
 0x263   :  { %v1241_v14 = vsel %vm341_vm4, %v8397_v55, %v1239_v2  ;;  %v1247_v30 = vsel %vm341_vm4, %v1239_v2, %v8393_v53  ;;  %v1162_v41 = vsel %vm283_vm5, %v8399_v56, %v1147_v40  ;;  %v1160_v51 = vsel %vm283_vm5, %v1147_v40, %v8403_v58  ;;  %v1002_v40 = vld [vmem:[%s11196_s3] ss:$8 sm:$0xf] }
 0x264   :  { %1302 = vst [vmem:[#allocation2 + $0x18] sm:$0xff] %v7298_v43  ;;  %v1274_v22 = vmul.f32 %v1253_v36, %v1247_v30  ;;  %v1277_v46 = vmul.f32 %v1265_v15, %v1241_v14  ;;  %v1189_v48 = vmul.f32 %v1175_v16, %v1162_v41  ;;  %v7785_v36 = vpack.c.bf16 %v1275_v34, %v1271_v47 }
 0x265   :  { %v1089_v47 = vrot.slane %v6774_v9, %v8033_v24  ;;  %v1190_v52 = vmul.f32 %v1179_v27, %v1160_v51  ;;  %v1011_v39 = vrot.slane %v1002_v40, %v8036_v25  ;;  %v1015_v0 = vrot.slane %v1002_v40, %v8024_v19 }
 0x266   :  { %v7300_v55 = vpack.c.bf16 %v1275_v34, %v1274_v22  ;;  %v1149_v28 = vpop.permute.xlu0 %1148  ;;  %v1155_v53 = vpop.permute.xlu1 %1154  ;;  %v7786_v42 = vpack.c.bf16 %v1277_v46, %v1273_v35  ;;  %v7787_v33 = vpack.c.bf16 %v1274_v22, %v8543_v12  ;;  %1912 = vmatprep.subr.bf16.mxu0 %v7785_v36  ;;  %v1007_v50 = vrot.slane %v1002_v40, %v8033_v24 }
 0x267   :  { %v1164_v45 = vsel %vm283_vm5, %v1155_v53, %v8399_v56  ;;  %v1161_v23 = vsel %vm283_vm5, %v1149_v28, %v8405_v59  ;;  %v1163_v26 = vsel %vm283_vm5, %v8401_v57, %v1149_v28  ;;  %v1158_v31 = vsel %vm283_vm5, %v8403_v58, %v1155_v53 }
 0x268   :  { %1304 = vst [vmem:[#allocation2 + $0x318] sm:$0xff] %v7300_v55  ;;  %v8590_v37 = vmul.f32 %v1171_v32, %v1164_v45  ;;  %v11321_v56 = vpack.c.bf16 %v8220_v29, %v8204_v13  ;;  %v1191_v38 = vmul.f32 %v1183_v21, %v1158_v31  ;;  %v1193_v11 = vmul.f32 %v1175_v16, %v1163_v26 }
 0x269   :  { %v1194_v58 = vmul.f32 %v1179_v27, %v1161_v23  ;;  %1913 = vmatpush1.bf16.msra.mxu0 %v7787_v33  ;;  %v1019_v26 = vrot.slane %v1002_v40, %v8027_v20 }
 0x26a   :  { %1954 = vmatpush1.bf16.msra.mxu1 %v11321_v56  ;;  %v7294_v4 = vpack.c.bf16 %v1189_v48, %v8590_v37  ;;  %v1157_v15 = vpop.permute.xlu0 %1156  ;;  %v1065_v8 = vpop.permute.xlu1 %1064 }
 0x26b   :  { %v1159_v13 = vsel %vm283_vm5, %v8405_v59, %v1157_v15  ;;  %v1165_v29 = vsel %vm283_vm5, %v1157_v15, %v8401_v57  ;;  %1955 = vmatprep.subr.bf16.mxu1 %v7786_v42  ;;  %v1080_v17 = vsel %vm225_vm6, %v8407_v60, %v1065_v8  ;;  %v1078_v43 = vsel %vm225_vm6, %v1065_v8, %v8411_v62  ;;  %v11322_v42 = vld [vmem:[#allocation7_spill] sm:$0xff] }
 0x26c   :  { %1220 = vst [vmem:[#allocation2 + $0x80] sm:$0xff] %v7294_v4  ;;  %v1192_v12 = vmul.f32 %v1171_v32, %v1165_v29  ;;  %v1195_v7 = vmul.f32 %v1183_v21, %v1159_v13  ;;  %v1107_v32 = vmul.f32 %v1093_v49, %v1080_v17  ;;  %v7792_v54 = vpack.c.bf16 %v1194_v58, %v1190_v52 }
 0x26d   :  { %v1108_v27 = vmul.f32 %v1097_v44, %v1078_v43 }
 0x26e   :  { %1956 = vmatpush1.bf16.msra.mxu1 %v7788_v6  ;;  %v7296_v59 = vpack.c.bf16 %v1193_v11, %v1192_v12  ;;  %v1067_v57 = vpop.permute.xlu0 %1066  ;;  %v1073_v10 = vpop.permute.xlu1 %1072  ;;  %v7790_v30 = vpack.c.bf16 %v1195_v7, %v1191_v38  ;;  %v11323_v6 = vld [vmem:[#allocation6_spill] sm:$0xff] }
 0x26f   :  { %v1076_v2 = vsel %vm225_vm6, %v8411_v62, %v1073_v10  ;;  %v1082_v16 = vsel %vm225_vm6, %v1073_v10, %v8407_v60  ;;  %v1079_v34 = vsel %vm225_vm6, %v1067_v57, %v8413_v63  ;;  %v1081_v35 = vsel %vm225_vm6, %v8409_v61, %v1067_v57  ;;  %v11324_v57 = vld [vmem:[#allocation10_spill] sm:$0xff]  ;;  %v11325_v10 = vld [vmem:[#allocation8_spill] sm:$0xff] }
 0x270   :  { %1222 = vst [vmem:[#allocation2 + $0x138] sm:$0xff] %v7296_v59  ;;  %v8631_v14 = vmul.f32 %v1089_v47, %v1082_v16  ;;  %v7789_v62 = vpack.c.bf16 %v1193_v11, %v1189_v48  ;;  %v7791_v60 = vpack.c.bf16 %v1192_v12, %v8590_v37  ;;  %v1109_v22 = vmul.f32 %v1101_v5, %v1076_v2  ;;  %v6808_v48 = vld [vmem:[%s11196_s3 + $0x20] ss:$8 sm:$0xf] }
 0x271   :  { %v1111_v21 = vmul.f32 %v1093_v49, %v1081_v35  ;;  %v1112_v45 = vmul.f32 %v1097_v44, %v1079_v34  ;;  %1957 = vmatprep.subr.bf16.mxu1 %v7790_v30  ;;  %v1609_v36 = vrot.slane %v6808_v48, %v8033_v24  ;;  %v1613_v13 = vrot.slane %v6808_v48, %v8036_v25 }
 0x272   :  { %v7290_v46 = vpack.c.bf16 %v1107_v32, %v8631_v14  ;;  %v1075_v41 = vpop.permute.xlu0 %1074  ;;  %v983_v55 = vpop.permute.xlu1 %982  ;;  %1914 = vmatprep.subr.bf16.mxu0 %v7789_v62  ;;  %1958 = vmatpush1.bf16.msra.mxu1 %v7792_v54  ;;  %v1617_v34 = vrot.slane %v6808_v48, %v8024_v19  ;;  %v1621_v35 = vrot.slane %v6808_v48, %v8027_v20  ;;  %v11326_v54 = vld [vmem:[#allocation11_spill] sm:$0xff] }
 0x273   :  { %v1077_v28 = vsel %vm225_vm6, %v8413_v63, %v1075_v41  ;;  %v1083_v53 = vsel %vm225_vm6, %v1075_v41, %v8409_v61  ;;  %v996_v63 = vsel %vm168_vm7, %v983_v55, %v8419_v3  ;;  %v998_v61 = vsel %vm168_vm7, %v8415_v1, %v983_v55  ;;  %1915 = vmatpush1.bf16.msra.mxu0 %v7791_v60 }
 0x274   :  { %1138 = vst [vmem:[#allocation2 + $0x320] sm:$0xff] %v7290_v46  ;;  %v1110_v9 = vmul.f32 %v1089_v47, %v1083_v53  ;;  %v1113_v23 = vmul.f32 %v1101_v5, %v1077_v28  ;;  %v1025_v49 = vmul.f32 %v1011_v39, %v998_v61  ;;  %v1026_v8 = vmul.f32 %v1015_v0, %v996_v63  ;;  %v11327_v46 = vld [vmem:[#allocation9_spill] sm:$0xff] }
 0x275   :  { %v7793_v29 = vpack.c.bf16 %v1111_v21, %v1107_v32  ;;  %v7796_v58 = vpack.c.bf16 %v1112_v45, %v1108_v27 }
 0x276   :  { %v7292_v31 = vpack.c.bf16 %v1111_v21, %v1110_v9  ;;  %v985_v37 = vpop.permute.xlu0 %984  ;;  %v991_v56 = vpop.permute.xlu1 %990  ;;  %v7794_v47 = vpack.c.bf16 %v1113_v23, %v1109_v22  ;;  %v7795_v11 = vpack.c.bf16 %v1110_v9, %v8631_v14 }
 0x277   :  { %v997_v33 = vsel %vm168_vm7, %v985_v37, %v11322_v42  ;;  %v999_v51 = vsel %vm168_vm7, %v11323_v6, %v985_v37  ;;  %v994_v4 = vsel %vm168_vm7, %v8419_v3, %v991_v56  ;;  %v1000_v15 = vsel %vm168_vm7, %v991_v56, %v8415_v1  ;;  %1916 = vmatprep.subr.bf16.mxu0 %v7793_v29 }
 0x278   :  { %1140 = vst [vmem:[#allocation2 + $0xf8] sm:$0xff] %v7292_v31  ;;  %v1024_v38 = vmul.f32 %v1007_v50, %v1000_v15  ;;  %v1029_v12 = vmul.f32 %v1011_v39, %v999_v51  ;;  %v1030_v7 = vmul.f32 %v1015_v0, %v997_v33  ;;  %v1027_v52 = vmul.f32 %v1019_v26, %v994_v4 }
 0x279   :  { %1959 = vmatprep.subr.bf16.mxu1 %v7794_v47  ;;  %1917 = vmatpush1.bf16.msra.mxu0 %v7795_v11 }
 0x27a   :  { %v7286_v17 = vpack.c.bf16 %v1025_v49, %v1024_v38  ;;  %v993_v3 = vpop.permute.xlu0 %992  ;;  %v1585_v59 = vpop.permute.xlu1 %1584  ;;  %1960 = vmatpush1.bf16.msra.mxu1 %v7796_v58  ;;  %v7797_v28 = vpack.c.bf16 %v1029_v12, %v1025_v49  ;;  %v7800_v48 = vpack.c.bf16 %v1030_v7, %v1026_v8 }
 0x27b   :  { %v995_v1 = vsel %vm168_vm7, %v11322_v42, %v993_v3  ;;  %v1001_v44 = vsel %vm168_vm7, %v993_v3, %v11323_v6  ;;  %v1598_v5 = vsel %vm591_vm8, %v1585_v59, %v11324_v57  ;;  %v1600_v43 = vsel %vm591_vm8, %v11325_v10, %v1585_v59 }
 0x27c   :  { %1056 = vst [vmem:[#allocation2 + $0x2b0] sm:$0xff] %v7286_v17  ;;  %v1028_v2 = vmul.f32 %v1007_v50, %v1001_v44  ;;  %v1031_v16 = vmul.f32 %v1019_v26, %v995_v1  ;;  %v1626_v40 = vmul.f32 %v1609_v36, %v1600_v43  ;;  %v1627_v32 = vmul.f32 %v1613_v13, %v1598_v5  ;;  %v7596_v43 = vld [vmem:[%s11197_s5 + $0x70] sm:$0xff]  }
 0x27d   :  { %1918 = vmatprep.subr.bf16.mxu0 %v7797_v28  ;;  %v7609_v28 = vld [vmem:[%s11197_s5 + $0xe0] sm:$0xff]  }
 0x27e   :  { %v7288_v14 = vpack.c.bf16 %v1029_v12, %v1028_v2  ;;  %v7318_v62 = vpack.c.bf16 %v1627_v32, %v1626_v40  ;;  %v1587_v30 = vpop.permute.xlu0 %1586  ;;  %v1593_v60 = vpop.permute.xlu1 %1592  ;;  %v7798_v53 = vpack.c.bf16 %v1031_v16, %v1027_v52  ;;  %v7799_v50 = vpack.c.bf16 %v1028_v2, %v1024_v38  ;;  %v7597_v2 = vld [vmem:[%s11197_s5 + $0xf8] sm:$0xff]   ;;  %v7598_v16 = vld [vmem:[%s11197_s5 + $0x30] sm:$0xff]  }
 0x27f   :  { %v1599_v22 = vsel %vm591_vm8, %v1587_v30, %v11326_v54  ;;  %v1601_v41 = vsel %vm591_vm8, %v11327_v46, %v1587_v30  ;;  %v1596_v39 = vsel %vm591_vm8, %v11324_v57, %v1593_v60  ;;  %v1602_v0 = vsel %vm591_vm8, %v1593_v60, %v11325_v10  ;;  %v7594_v57 = vld [vmem:[%s11197_s5 + $0x78] sm:$0xff]   ;;  %v7603_v30 = vld [vmem:[%s11197_s5 + $0xb0] sm:$0xff]  }
 0x280   :  { %1058 = vst [vmem:[#allocation2 + $0x10] sm:$0xff] %v7288_v14  ;;  %1658 = vst [vmem:[#allocation2 + $0x158] sm:$0xff] %v7318_v62  ;;  %v1630_v55 = vmul.f32 %v1609_v36, %v1601_v41  ;;  %v1631_v27 = vmul.f32 %v1613_v13, %v1599_v22  ;;  %v1628_v45 = vmul.f32 %v1617_v34, %v1596_v39  ;;  %1961 = vmatprep.subr.bf16.mxu1 %v7798_v53  ;;  %v7593_v36 = vld [vmem:[%s11194_s1 + $0x20] ss:$16 sps:$4 sm:$0xff]   ;;  %v7595_v10 = vld [vmem:[%s11197_s5 + $0x38] sm:$0xff]  }
 0x281   :  { %v1629_v9 = vmul.f32 %v1621_v35, %v1602_v0  ;;  %1919 = vmatpush1.bf16.msra.mxu0 %v7799_v50  ;;  %1962 = vmatpush1.bf16.msra.mxu1 %v7800_v48  ;;  %v7601_v14 = vld [vmem:[%s11197_s5 + $0xf0] sm:$0xff]   ;;  %v7602_v62 = vld [vmem:[%s11197_s5 + $0x28] sm:$0xff]   ;;  %v7604_v22 = vld [vmem:[%s11197_s5 + $0x60] sm:$0xff]  }
 0x282   :  { %v7320_v21 = vpack.c.bf16 %v1631_v27, %v1630_v55  ;;  %v1595_v23 = vpop.permute.xlu0 %1594  ;;  %v7801_v37 = vpack.c.bf16 %v1631_v27, %v1627_v32  ;;  %v7802_v56 = vpack.c.bf16 %v1630_v55, %v1626_v40  ;;  %v7606_v41 = vld [vmem:[%s11197_s5 + $0x20] sm:$0xff]   ;;  %v7607_v55 = vld [vmem:[%s11197_s5 + $0xa8] sm:$0xff]   ;;  %v7608_v27 = vld [vmem:[%s11197_s5 + $0x58] sm:$0xff]  }
 0x283   :  { %v1597_v63 = vsel %vm591_vm8, %v11326_v54, %v1595_v23  ;;  %v1603_v61 = vsel %vm591_vm8, %v1595_v23, %v11327_v46  ;;  %v7605_v46 = vld [vmem:[%s11197_s5 + $0xe8] sm:$0xff]   ;;  %v7610_v53 = vld [vmem:[%s11197_s5 + $0x18] sm:$0xff]   ;;  %v7611_v48 = vld [vmem:[%s11197_s5 + $0xa0] sm:$0xff]  }
 0x284   :  { %1660 = vst [vmem:[#allocation2 + $0xc0] sm:$0xff] %v7320_v21  ;;  %v1632_v26 = vmul.f32 %v1617_v34, %v1597_v63  ;;  %v1633_v31 = vmul.f32 %v1621_v35, %v1603_v61  ;;  %1934 = vmatprep.subr.bf16.mxu0 %v7801_v37  ;;  %v7599_v34 = vld [vmem:[%s11197_s5 + $0xb8] sm:$0xff]   ;;  %v7600_v35 = vld [vmem:[%s11197_s5 + $0x68] sm:$0xff]   ;;  %v7612_v21 = vld [vmem:[%s11197_s5 + $0x50] sm:$0xff]  }
 0x285   :  { %1935 = vmatpush2.bf16.msra.mxu0 %v7802_v56  ;;  %v7615_v23 = vld [vmem:[%s11197_s5 + $0x98] sm:$0xff]   ;;  %v7616_v63 = vld [vmem:[%s11197_s5 + $0x48] sm:$0xff]   ;;  %v7617_v61 = vld [vmem:[%s11197_s5 + $0xd0] sm:$0xff]  }
 0x286   :  { %v7803_v42 = vpack.c.bf16 %v1633_v31, %v1629_v9  ;;  %v7804_v33 = vpack.c.bf16 %v1632_v26, %v1628_v45  ;;  %7484 = vmatprep.subr.bf16.mxu0 %v7594_v57  ;;  %v7613_v45 = vld [vmem:[%s11197_s5 + $0xd8] sm:$0xff]   ;;  %v7614_v9 = vld [vmem:[%s11197_s5 + $0x10] sm:$0xff]   ;;  %v7618_v26 = vld [vmem:[%s11197_s5 + $0x8] sm:$0xff]  }
 0x287   :  { %v7619_v31 = vld [vmem:[%s11197_s5 + $0x90] sm:$0xff]   ;;  %v7620_v37 = vld [vmem:[%s11197_s5 + $0x40] sm:$0xff]   ;;  %v7621_v56 = vld [vmem:[%s11197_s5 + $0xc8] sm:$0xff]  }
 0x288   :  { %1977 = vmatprep.subr.bf16.mxu1 %v7803_v42  ;;  %1937 = vmatmul.mubr.bf16.vlgmr.msra.gmra.mxu0 %v7593_v36  ;;  %v7623_v42 = vld [vmem:[%s11197_s5 + $0x88] sm:$0xff]  }
 0x289   :  { %1978 = vmatpush2.bf16.msra.mxu1 %v7804_v33  ;;  %7485 = vmatpush3.bf16.msra.mxu0 %v7595_v10  ;;  %v7624_v33 = vld [vmem:[%s11197_s5 + $0xc0] sm:$0xff]  }
 0x28a   :  { %7486 = vmatprep.subr.bf16.mxu0 %v7596_v43  ;;  %7506 = vmatprep.subr.bf16.mxu1 %v7597_v2  ;;  %v7054_v32 = vld [vmem:[%s11196_s3 + $0x2] ss:$8 sm:$0xf] }
 0x28b   :  { %v1705_v6 = vpop.permute.xlu1 %1704 }
 0x28c   :  { %1980 = vmatmul.mubr.bf16.vlgmr.msra.gmra.mxu1 %v7593_v36  ;;  %v7622_v36 = vld [vmem:[%s11197_s5] sm:$0xff]  }
 0x28d   :  { %7487 = vmatpush3.bf16.msra.mxu0 %v7598_v16  ;;  %7507 = vmatpush3.bf16.msra.mxu1 %v7599_v34 }
 0x28e   :  { %7488 = vmatprep.subr.bf16.mxu0 %v7600_v35  ;;  %7508 = vmatprep.subr.bf16.mxu1 %v7601_v14 }
 0x28f   :  { %v1710_v38 = vpop.permute.xlu0 %1709 }
 0x291   :  { %7489 = vmatpush3.bf16.msra.mxu0 %v7602_v62  ;;  %7509 = vmatpush3.bf16.msra.mxu1 %v7603_v30 }
 0x292   :  { %7490 = vmatprep.subr.bf16.mxu0 %v7604_v22  ;;  %7510 = vmatprep.subr.bf16.mxu1 %v7605_v46  ;;  %v7131_v22 = vld [vmem:[%s11196_s3 + $0x7] ss:$8 sm:$0xf] }
 0x295   :  { %7491 = vmatpush3.bf16.msra.mxu0 %v7606_v41  ;;  %7511 = vmatpush3.bf16.msra.mxu1 %v7607_v55 }
 0x296   :  { %7492 = vmatprep.subr.bf16.mxu0 %v7608_v27  ;;  %7512 = vmatprep.subr.bf16.mxu1 %v7609_v28 }
 0x299   :  { %7493 = vmatpush3.bf16.msra.mxu0 %v7610_v53  ;;  %7513 = vmatpush3.bf16.msra.mxu1 %v7611_v48 }
 0x29a   :  { %7494 = vmatprep.subr.bf16.mxu0 %v7612_v21  ;;  %7514 = vmatprep.subr.bf16.mxu1 %v7613_v45  ;;  %v5277_v21 = vrot.slane %v7131_v22, %v8036_v25 }
 0x29d   :  { %7495 = vmatpush3.bf16.msra.mxu0 %v7614_v9  ;;  %7515 = vmatpush3.bf16.msra.mxu1 %v7615_v23  ;;  %v5273_v23 = vrot.slane %v7131_v22, %v8033_v24 }
 0x29e   :  { %7496 = vmatprep.subr.bf16.mxu0 %v7616_v63  ;;  %7516 = vmatprep.subr.bf16.mxu1 %v7617_v61 }
 0x2a1   :  { %7497 = vmatpush3.bf16.msra.mxu0 %v7618_v26  ;;  %7517 = vmatpush3.bf16.msra.mxu1 %v7619_v31 }
 0x2a2   :  { %7498 = vmatprep.subr.bf16.mxu0 %v7620_v37  ;;  %7518 = vmatprep.subr.bf16.mxu1 %v7621_v56  ;;  %v7145_v56 = vld [vmem:[%s11196_s3 + $0x20] ss:$8 sm:$0xf] }
 0x2a5   :  { %7499 = vmatpush3.bf16.msra.mxu0 %v7622_v36  ;;  %7519 = vmatpush3.bf16.msra.mxu1 %v7623_v42 }
 0x2a6   :  { %7520 = vmatprep.subr.bf16.mxu1 %v7624_v33  ;;  %v5281_v33 = vrot.slane %v7131_v22, %v8024_v19 }
 0x348   :  { %v1938_v51 = vpop.f32.mrf.mxu0 }
 0x349   :  { %v1939_v4 = vadd.f32 %v1938_v51, %v1705_v6  ;;  %v8862_v51 = vld [vmem:[#allocation2 + $0x1d0] sm:$0xff] }
 0x34a   :  { %v1940_v15 = vpop.f32.mrf.mxu0  ;;  %11332 = vst [vmem:[#allocation11_spill] sm:$0xff] %v8862_v51  ;;  %2738 = vmatprep.subr.bf16.mxu0 %v8862_v51 }
 0x34b   :  { %v8704_v49 = vmax.f32 %v1939_v4, 0.0  ;;  %v1941_v60 = vadd.f32 %v1940_v15, %v1705_v6 }
 0x34c   :  { %v1981_v8 = vpop.f32.mrf.mxu1  ;;  %v1942_v13 = vpop.f32.mrf.mxu0 }
 0x34d   :  { %v1982_v29 = vadd.f32 %v1981_v8, %v1705_v6  ;;  %v1943_v47 = vadd.f32 %v1942_v13, %v1710_v38  ;;  %1998 = vrot.lane.b32.xlu1 %v8704_v49, %s7879_s27  ;;  %v8781_v39 = vmax.f32 %v1941_v60, 0.0 }
 0x34e   :  { %v1983_v11 = vpop.f32.mrf.mxu1  ;;  %v1944_v54 = vpop.f32.mrf.mxu0 }
 0x34f   :  { %v8708_v58 = vmax.f32 %v1982_v29, 0.0  ;;  %v1984_v12 = vadd.f32 %v1983_v11, %v1705_v6  ;;  %v8710_v7 = vmax.f32 %v1943_v47, 0.0  ;;  %v1945_v0 = vadd.f32 %v1944_v54, %v1710_v38  ;;  %v7625_v6 = vld [vmem:[%s11197_s5 + $0x80] sm:$0xff]  }
 0x350   :  { %v1985_v52 = vpop.f32.mrf.mxu1  ;;  %7521 = vmatpush3.bf16.msra.mxu1 %v7625_v6 }
 0x351   :  { %11328 = vst [vmem:[#allocation7_spill] sm:$0xff] %v8708_v58  ;;  %v8712_v17 = vmax.f32 %v1984_v12, 0.0  ;;  %v1986_v3 = vadd.f32 %v1985_v52, %v1710_v38  ;;  %2000 = vrot.lane.b32.xlu0 %v8710_v7, %s7879_s27  ;;  %2006 = vrot.lane.b32.xlu1 %v8708_v58, %s7879_s27  ;;  %v8799_v50 = vmax.f32 %v1945_v0, 0.0  ;;  %v7103_v52 = vld [vmem:[%s11196_s3 + $0x5] ss:$8 sm:$0xf] }
 0x352   :  { %v1987_v59 = vpop.f32.mrf.mxu1  ;;  %v4853_v57 = vrot.slane %v7103_v52, %v8036_v25  ;;  %v4857_v14 = vrot.slane %v7103_v52, %v8024_v19  ;;  %v4861_v62 = vrot.slane %v7103_v52, %v8027_v20 }
 0x353   :  { %11329 = vst [vmem:[#allocation6_spill] sm:$0xff] %v8712_v17  ;;  %v8718_v1 = vmax.f32 %v1986_v3, 0.0  ;;  %v1988_v44 = vadd.f32 %v1987_v59, %v1710_v38 }
 0x355   :  { %11330 = vst [vmem:[#allocation10_spill] sm:$0xff] %v8718_v1  ;;  %v8723_v5 = vmax.f32 %v1988_v44, 0.0  ;;  %2008 = vrot.lane.b32.xlu0 %v8718_v1, %s7879_s27  ;;  %2030 = vrot.lane.b32.xlu1 %v8704_v49, %s7877_s0  ;;  %v4849_v44 = vrot.slane %v7103_v52, %v8033_v24 }
 0x357   :  { %11331 = vst [vmem:[#allocation8_spill] sm:$0xff] %v8723_v5 }
 0x359   :  { %2032 = vrot.lane.b32.xlu0 %v8710_v7, %s7877_s0  ;;  %2038 = vrot.lane.b32.xlu1 %v8708_v58, %s7877_s0 }
 0x35d   :  { %2040 = vrot.lane.b32.xlu0 %v8718_v1, %s7877_s0  ;;  %2054 = vrot.lane.b32.xlu1 %v8704_v49, %s7884_s9 }
 0x361   :  { %2056 = vrot.lane.b32.xlu0 %v8710_v7, %s7884_s9  ;;  %2062 = vrot.lane.b32.xlu1 %v8708_v58, %s7884_s9 }
 0x365   :  { %2064 = vrot.lane.b32.xlu0 %v8718_v1, %s7884_s9  ;;  %2002 = vrot.lane.b32.xlu1 %v8781_v39, %s7879_s27 }
 0x369   :  { %2004 = vrot.lane.b32.xlu0 %v8799_v50, %s7879_s27  ;;  %2010 = vrot.lane.b32.xlu1 %v8712_v17, %s7879_s27 }
 0x36d   :  { %2012 = vrot.lane.b32.xlu0 %v8723_v5, %s7879_s27  ;;  %2034 = vrot.lane.b32.xlu1 %v8781_v39, %s7877_s0 }
 0x371   :  { %2036 = vrot.lane.b32.xlu0 %v8799_v50, %s7877_s0  ;;  %2042 = vrot.lane.b32.xlu1 %v8712_v17, %s7877_s0 }
 0x375   :  { %2044 = vrot.lane.b32.xlu0 %v8723_v5, %s7877_s0  ;;  %2058 = vrot.lane.b32.xlu1 %v8781_v39, %s7884_s9 }
 0x379   :  { %2060 = vrot.lane.b32.xlu0 %v8799_v50, %s7884_s9  ;;  %2066 = vrot.lane.b32.xlu1 %v8712_v17, %s7884_s9 }
 0x37d   :  { %2068 = vrot.lane.b32.xlu0 %v8723_v5, %s7884_s9 }
 0x3bf   :  { %v1999_v4 = vpop.permute.xlu1 %1998 }
 0x3c3   :  { %v2001_v15 = vpop.permute.xlu0 %2000  ;;  %v2007_v8 = vpop.permute.xlu1 %2006 }
 0x3c7   :  { %v2009_v38 = vpop.permute.xlu0 %2008  ;;  %v2031_v13 = vpop.permute.xlu1 %2030 }
 0x3cb   :  { %v8871_v29 = vpop.permute.xlu0 %2032  ;;  %v2039_v47 = vpop.permute.xlu1 %2038 }
 0x3cf   :  { %v8873_v11 = vpop.permute.xlu0 %2040  ;;  %v8875_v12 = vpop.permute.xlu1 %2054 }
 0x3d3   :  { %v8880_v3 = vpop.permute.xlu0 %2056  ;;  %v8882_v59 = vpop.permute.xlu1 %2062 }
 0x3d7   :  { %v8886_v10 = vpop.permute.xlu0 %2064  ;;  %v2003_v43 = vpop.permute.xlu1 %2002 }
 0x3d8   :  { %v8890_v2 = vsel %vm417_vm3, %v2003_v43, %v2007_v8  ;;  %v8894_v16 = vsel %vm417_vm3, %v1999_v4, %v2003_v43 }
 0x3d9   :  { %v8897_v34 = vmul.f32 %v4849_v44, %v8894_v16  ;;  %v8900_v35 = vmul.f32 %v4853_v57, %v8890_v2 }
 0x3db   :  { %v7444_v30 = vpack.c.bf16 %v8900_v35, %v8897_v34  ;;  %v2005_v60 = vpop.permute.xlu0 %2004  ;;  %v2011_v54 = vpop.permute.xlu1 %2010 }
 0x3dc   :  { %v8911_v46 = vsel %vm417_vm3, %v2005_v60, %v2009_v38  ;;  %v8915_v41 = vsel %vm417_vm3, %v2001_v15, %v2005_v60  ;;  %v8919_v0 = vsel %vm417_vm3, %v2007_v8, %v2011_v54  ;;  %v8923_v55 = vsel %vm417_vm3, %v2011_v54, %v1999_v4 }
 0x3dd   :  { %v8926_v27 = vmul.f32 %v4849_v44, %v8915_v41  ;;  %v8929_v28 = vmul.f32 %v4853_v57, %v8911_v46  ;;  %v4868_v53 = vmul.f32 %v4857_v14, %v8919_v0  ;;  %v4869_v48 = vmul.f32 %v4861_v62, %v8923_v55 }
 0x3de   :  { %v5473_v57 = vrot.slane %v7145_v56, %v8033_v24 }
 0x3df   :  { %v7446_v45 = vpack.c.bf16 %v8929_v28, %v8926_v27  ;;  %v2013_v9 = vpop.permute.xlu0 %2012  ;;  %v2035_v63 = vpop.permute.xlu1 %2034  ;;  %v7445_v61 = vpack.c.bf16 %v4869_v48, %v4868_v53  ;;  %v7658_v27 = vld [vmem:[%s11194_s1 + $0x88] ss:$16 sps:$4 sm:$0xff]  }
 0x3e0   :  { %v8939_v26 = vsel %vm417_vm3, %v2009_v38, %v2013_v9  ;;  %v8943_v31 = vsel %vm417_vm3, %v2013_v9, %v2001_v15  ;;  %v8947_v37 = vsel %vm533_vm1, %v2035_v63, %v2039_v47  ;;  %v2050_v6 = vsel %vm533_vm1, %v2031_v13, %v2035_v63 }
 0x3e1   :  { %v4872_v36 = vmul.f32 %v4857_v14, %v8939_v26  ;;  %v4873_v42 = vmul.f32 %v4861_v62, %v8943_v31  ;;  %4899 = vst [vmem:[#allocation2 + $0x58] sm:$0xff] %v7445_v61  ;;  %v5291_v4 = vmul.f32 %v5277_v21, %v8947_v37  ;;  %v5285_v15 = vrot.slane %v7131_v22, %v8027_v20 }
 0x3e2   :  { %v5290_v38 = vmul.f32 %v5273_v23, %v2050_v6  ;;  %v5477_v63 = vrot.slane %v7145_v56, %v8036_v25  ;;  %v5481_v61 = vrot.slane %v7145_v56, %v8024_v19 }
 0x3e3   :  { %v7447_v8 = vpack.c.bf16 %v4873_v42, %v4872_v36  ;;  %v2037_v52 = vpop.permute.xlu0 %2036  ;;  %v2043_v44 = vpop.permute.xlu1 %2042  ;;  %v2022_v36 = vmax.f32 %v8704_v49, %v8894_v16 }
 0x3e4   :  { %v8963_v43 = vsel %vm533_vm1, %v2037_v52, %v8873_v11  ;;  %v2051_v14 = vsel %vm533_vm1, %v8871_v29, %v2037_v52  ;;  %v8970_v62 = vsel %vm533_vm1, %v2039_v47, %v2043_v44  ;;  %v8974_v60 = vsel %vm533_vm1, %v2043_v44, %v2031_v13 }
 0x3e5   :  { %4901 = vst [vmem:[#allocation2 + $0x2a8] sm:$0xff] %v7447_v8  ;;  %v7468_v54 = vpack.c.bf16 %v5291_v4, %v5290_v38  ;;  %v5294_v22 = vmul.f32 %v5273_v23, %v2051_v14  ;;  %v5295_v53 = vmul.f32 %v5277_v21, %v8963_v43  ;;  %v5292_v48 = vmul.f32 %v5281_v33, %v8970_v62 }
 0x3e6   :  { %v5293_v9 = vmul.f32 %v5285_v15, %v8974_v60  ;;  %v5485_v47 = vrot.slane %v7145_v56, %v8027_v20  ;;  %v2023_v13 = vmax.f32 %v8781_v39, %v8890_v2  ;;  %v2026_v23 = vmax.f32 %v8710_v7, %v8915_v41 }
 0x3e7   :  { %5322 = vst [vmem:[#allocation2 + $0x220] sm:$0xff] %v7468_v54  ;;  %v7470_v21 = vpack.c.bf16 %v5295_v53, %v5294_v22  ;;  %v2045_v42 = vpop.permute.xlu0 %2044  ;;  %v2059_v4 = vpop.permute.xlu1 %2058  ;;  %v2024_v53 = vmax.f32 %v8708_v58, %v8919_v0 }
 0x3e8   :  { %v7469_v8 = vpack.c.bf16 %v5293_v9, %v5292_v48  ;;  %v2047_v38 = vsel %vm533_vm1, %v8873_v11, %v2045_v42  ;;  %v2053_v56 = vsel %vm533_vm1, %v2045_v42, %v8871_v29  ;;  %v2072_v2 = vsel %vm591_vm8, %v2059_v4, %v8882_v59 }
 0x3e9   :  { %5324 = vst [vmem:[#allocation2 + $0x2a0] sm:$0xff] %v7470_v21  ;;  %v5296_v16 = vmul.f32 %v5281_v33, %v2047_v38  ;;  %v5297_v41 = vmul.f32 %v5285_v15, %v2053_v56  ;;  %v2074_v52 = vsel %vm591_vm8, %v8875_v12, %v2059_v4  ;;  %v2079_v44 = vmax.f32 %v8947_v37, %v2072_v2 }
 0x3ea   :  { %v2027_v11 = vmax.f32 %v8799_v50, %v8911_v46  ;;  %5323 = vst [vmem:[#allocation2 + $0x28] sm:$0xff] %v7469_v8  ;;  %v2078_v54 = vmax.f32 %v2050_v6, %v2074_v52  ;;  %v5490_v22 = vmul.f32 %v5473_v57, %v2074_v52  ;;  %v5491_v29 = vmul.f32 %v5477_v63, %v2072_v2 }
 0x3eb   :  { %v2025_v33 = vmax.f32 %v8712_v17, %v8923_v55  ;;  %v2028_v15 = vmax.f32 %v8718_v1, %v8939_v26  ;;  %v7471_v48 = vpack.c.bf16 %v5297_v41, %v5296_v16  ;;  %v2061_v9 = vpop.permute.xlu0 %2060  ;;  %v2067_v21 = vpop.permute.xlu1 %2066  ;;  %v2029_v37 = vmax.f32 %v8723_v5, %v8943_v31 }
 0x3ec   :  { %v7480_v46 = vpack.c.bf16 %v5491_v29, %v5490_v22  ;;  %v2073_v6 = vsel %vm591_vm8, %v2061_v9, %v8886_v10  ;;  %v2075_v0 = vsel %vm591_vm8, %v8880_v3, %v2061_v9  ;;  %v2087_v26 = vmax.f32 %v2023_v13, %v2079_v44 }
 0x3ed   :  { %5325 = vst [vmem:[#allocation2 + $0x278] sm:$0xff] %v7471_v48  ;;  %v2082_v55 = vmax.f32 %v2051_v14, %v2075_v0  ;;  %v5494_v42 = vmul.f32 %v5473_v57, %v2075_v0  ;;  %v5495_v4 = vmul.f32 %v5477_v63, %v2073_v6  ;;  %v2086_v8 = vmax.f32 %v2022_v36, %v2078_v54 }
 0x3ee   :  { %5522 = vst [vmem:[#allocation2 + $0x1f0] sm:$0xff] %v7480_v46  ;;  %v2083_v2 = vmax.f32 %v8963_v43, %v2073_v6  ;;  %v2070_v31 = vsel %vm591_vm8, %v8882_v59, %v2067_v21  ;;  %v2076_v16 = vsel %vm591_vm8, %v2067_v21, %v8875_v12  ;;  %v9034_v9 = vld [vmem:[#allocation2 + $0x220] sm:$0xff] }
 0x3ef   :  { %v2090_v41 = vmax.f32 %v2026_v23, %v2082_v55  ;;  %v7482_v52 = vpack.c.bf16 %v5495_v4, %v5494_v42  ;;  %v2080_v22 = vmax.f32 %v8970_v62, %v2070_v31  ;;  %v2081_v57 = vmax.f32 %v8974_v60, %v2076_v16  ;;  %v2069_v14 = vpop.permute.xlu0 %2068 }
 0x3f0   :  { %v5492_v63 = vmul.f32 %v5481_v61, %v2070_v31  ;;  %v5493_v36 = vmul.f32 %v5485_v47, %v2076_v16  ;;  %v2071_v43 = vsel %vm591_vm8, %v8886_v10, %v2069_v14  ;;  %v2077_v59 = vsel %vm591_vm8, %v2069_v14, %v8880_v3  ;;  %v9032_v13 = vld [vmem:[#allocation2 + $0x2a0] sm:$0xff] }
 0x3f1   :  { %5524 = vst [vmem:[#allocation2 + $0x130] sm:$0xff] %v7482_v52  ;;  %v2088_v12 = vmax.f32 %v2024_v53, %v2080_v22  ;;  %v2084_v23 = vmax.f32 %v2047_v38, %v2071_v43  ;;  %v2085_v44 = vmax.f32 %v2053_v56, %v2077_v59  ;;  %v5496_v62 = vmul.f32 %v5481_v61, %v2071_v43  ;;  %v2638_v52 = vld [vmem:[%s11195_s2 + $0x30] sm:$0xff]  ;;  %v2639_v22 = vld [vmem:[%s11195_s2 + $0x38] sm:$0xff] }
 0x3f2   :  { %v7481_v54 = vpack.c.bf16 %v5493_v36, %v5492_v63  ;;  %v5497_v60 = vmul.f32 %v5485_v47, %v2077_v59  ;;  %v2091_v29 = vmax.f32 %v2027_v11, %v2083_v2  ;;  %v2094_v48 = vpack.c.bf16 %v2090_v41, %v2086_v8  ;;  %v7633_v14 = vld [vmem:[%s11194_s1 + $0x44] ss:$16 sps:$4 sm:$0xff]   ;;  %v2637_v63 = vld [vmem:[%s11195_s2 + $0x28] sm:$0xff] }
 0x3f3   :  { %v2092_v21 = vmax.f32 %v2028_v15, %v2084_v23  ;;  %v2089_v46 = vmax.f32 %v2025_v33, %v2081_v57  ;;  %v2093_v10 = vmax.f32 %v2029_v37, %v2085_v44  ;;  %v7246_v6 = vcombine.low %v9034_v9, %v9032_v13  ;;  %v2636_v57 = vld [vmem:[%s11195_s2 + $0x20] sm:$0xff] }
 0x3f4   :  { %5523 = vst [vmem:[#allocation2 + $0x238] sm:$0xff] %v7481_v54  ;;  %v7483_v3 = vpack.c.bf16 %v5497_v60, %v5496_v62  ;;  %v2095_v0 = vpack.c.bf16 %v2091_v29, %v2087_v26  ;;  %v9073_v36 = vld [vmem:[%s11198_s4 + $0x7] ss:$0 sm:$0xff]  ;;  %v9086_v29 = vld [vmem:[%s11198_s4 + $0x5] ss:$0 sm:$0xff] }
 0x3f5   :  { %v2097_v55 = vpack.c.bf16 %v2093_v10, %v2089_v46  ;;  %v2096_v53 = vpack.c.bf16 %v2092_v21, %v2088_v12  ;;  %v9079_v12 = vld [vmem:[%s11198_s4 + $0x6] ss:$0 sm:$0xff] }
 0x3f6   :  { %5525 = vst [vmem:[#allocation2 + $0x210] sm:$0xff] %v7483_v3  ;;  %2386 = vmatprep.mubr.bf16.mxu0 %v2095_v0 }
 0x3f7   :  { %2387 = vmatmul.mubr.bf16.vlgmr.msra.gmra.mxu0 %v2094_v48  ;;  %2427 = vmatprep.mubr.bf16.mxu1 %v2097_v55  ;;  %v9093_v55 = vld [vmem:[%s11198_s4 + $0x3] ss:$0 sm:$0xff] }
 0x3f8   :  { %2428 = vmatmul.mubr.bf16.vlgmr.msra.gmra.mxu1 %v2096_v53  ;;  %6924 = vmatprep.mubr.msk.bf16.mxu0 %vm880_vm0, %v7633_v14 }
 0x4b7   :  { %v7500_v61 = vpop.f32.mrf.mxu0 }
 0x4b8   :  { %v7522_v47 = vpop.f32.mrf.mxu1 }
 0x4b9   :  { %v7501_v38 = vpop.f32.mrf.mxu0 }
 0x4ba   :  { %v7523_v56 = vpop.f32.mrf.mxu1  ;;  %v7502_v11 = vadd.f32 %v7501_v38, %v7500_v61 }
 0x4bb   :  { %v7503_v33 = vpop.f32.mrf.mxu0  ;;  %v7524_v15 = vadd.f32 %v7523_v56, %v7522_v47 }
 0x4bc   :  { %v7525_v37 = vpop.f32.mrf.mxu1 }
 0x4bd   :  { %v7504_v42 = vpop.f32.mrf.mxu0  ;;  %v2430_v4 = vadd.f32 %v7524_v15, %v7502_v11 }
 0x4be   :  { %v7526_v8 = vpop.f32.mrf.mxu1  ;;  %v7505_v2 = vadd.f32 %v7504_v42, %v7503_v33  ;;  %v9100_v33 = vld [vmem:[%s11198_s4 + $0x2] ss:$0 sm:$0xff] }
 0x4bf   :  { %v7330_v26 = vpack.c.bf16 %v2430_v4, %v2430_v4  ;;  %v7527_v31 = vadd.f32 %v7526_v8, %v7525_v37  ;;  %2572 = vrot.lane.b32.xlu1 %v2430_v4, %s7885_s15 }
 0x4c1   :  { %2528 = vst [vmem:[#allocation2 + $0x2c0] sm:$0xf] %v7330_v26  ;;  %v2433_v16 = vadd.f32 %v7527_v31, %v7505_v2  ;;  %v9107_v31 = vld [vmem:[%s11198_s4 + $0x1] ss:$0 sm:$0xff] }
 0x4c3   :  { %v7331_v41 = vpack.c.bf16 %v2433_v16, %v2433_v16  ;;  %2574 = vrot.lane.b32.xlu0 %v2433_v16, %s7885_s15  ;;  %2551 = vrot.lane.b32.xlu1 %v2430_v4, %s7886_s16 }
 0x4c5   :  { %2529 = vst [vmem:[#allocation2 + $0x198] sm:$0xf] %v7331_v41 }
 0x4c7   :  { %2553 = vrot.lane.b32.xlu0 %v2433_v16, %s7886_s16  ;;  %2530 = vrot.lane.b32.xlu1 %v2430_v4, %s7879_s27 }
 0x4cb   :  { %2532 = vrot.lane.b32.xlu0 %v2433_v16, %s7879_s27  ;;  %2499 = vrot.lane.b32.xlu1 %v2430_v4, %s7880_s28 }
 0x4cf   :  { %2501 = vrot.lane.b32.xlu0 %v2433_v16, %s7880_s28  ;;  %2478 = vrot.lane.b32.xlu1 %v2430_v4, %s7887_s17 }
 0x4d3   :  { %2480 = vrot.lane.b32.xlu0 %v2433_v16, %s7887_s17  ;;  %2457 = vrot.lane.b32.xlu1 %v2430_v4, %s7888_s18 }
 0x4d7   :  { %2459 = vrot.lane.b32.xlu0 %v2433_v16, %s7888_s18  ;;  %2436 = vrot.lane.b32.xlu1 %v2430_v4, %s7889_s19 }
 0x4db   :  { %2438 = vrot.lane.b32.xlu0 %v2433_v16, %s7889_s19  ;;  %2593 = vrot.lane.b32.xlu1 %v2430_v4, %s7890_s20 }
 0x4df   :  { %2595 = vrot.lane.b32.xlu0 %v2433_v16, %s7890_s20  ;;  %2652 = vperm.xlu1 %7586, %v2638_v52  }
 0x4e3   :  { %2657 = vperm.xlu0 %7585, %v2639_v22   ;;  %2642 = vperm.xlu1 %7586, %v2636_v57  }
 0x4e7   :  { %2647 = vperm.xlu0 %7585, %v2637_v63  }
 0x531   :  { %v2573_v43 = vpop.permute.xlu1 %2572 }
 0x532   :  { %v2581_v59 = vmul.f32 %v9073_v36, %v2573_v43  ;;  %v9115_v43 = vld [vmem:[%s11198_s4] ss:$0 sm:$0xff] }
 0x534   :  { %v7336_v23 = vpack.c.bf16 %v2581_v59, %v2581_v59 }
 0x535   :  { %v2575_v44 = vpop.permute.xlu0 %2574  ;;  %v2552_v62 = vpop.permute.xlu1 %2551 }
 0x536   :  { %2591 = vst [vmem:[#allocation2 + $0x1d8] sm:$0xf] %v7336_v23  ;;  %v2582_v54 = vmul.f32 %v9073_v36, %v2575_v44  ;;  %v2560_v60 = vmul.f32 %v9079_v12, %v2552_v62 }
 0x538   :  { %v7337_v48 = vpack.c.bf16 %v2582_v54, %v2582_v54  ;;  %v7334_v21 = vpack.c.bf16 %v2560_v60, %v2560_v60 }
 0x539   :  { %v2554_v46 = vpop.permute.xlu0 %2553  ;;  %v2531_v10 = vpop.permute.xlu1 %2530 }
 0x53a   :  { %2592 = vst [vmem:[#allocation2 + $0x280] sm:$0xf] %v7337_v48  ;;  %2570 = vst [vmem:[#allocation2 + $0x190] sm:$0xf] %v7334_v21  ;;  %v2561_v3 = vmul.f32 %v9079_v12, %v2554_v46  ;;  %v2539_v0 = vmul.f32 %v9086_v29, %v2531_v10  ;;  %v9123_v21 = vld [vmem:[%s11198_s4 + $0x8] ss:$0 sm:$0xff] }
 0x53c   :  { %v7335_v53 = vpack.c.bf16 %v2561_v3, %v2561_v3  ;;  %v7332_v61 = vpack.c.bf16 %v2539_v0, %v2539_v0 }
 0x53d   :  { %v2533_v47 = vpop.permute.xlu0 %2532  ;;  %v2500_v38 = vpop.permute.xlu1 %2499 }
 0x53e   :  { %2571 = vst [vmem:[#allocation2 + $0x8] sm:$0xf] %v7335_v53  ;;  %2549 = vst [vmem:[#allocation2 + $0x2d0] sm:$0xf] %v7332_v61  ;;  %v2540_v56 = vmul.f32 %v9086_v29, %v2533_v47  ;;  %v2508_v11 = vmul.f32 %v9093_v55, %v2500_v38  ;;  %v7629_v53 = vld [vmem:[#allocation2 + $0x2c0] ss:$-296 sps:$4 sm:$0xff]  }
 0x540   :  { %v7333_v15 = vpack.c.bf16 %v2540_v56, %v2540_v56  ;;  %v7328_v37 = vpack.c.bf16 %v2508_v11, %v2508_v11 }
 0x541   :  { %v2502_v42 = vpop.permute.xlu0 %2501  ;;  %v2479_v4 = vpop.permute.xlu1 %2478  ;;  %v7626_v8 = vld [vmem:[#allocation2 + $0x1d8] ss:$168 sps:$4 sm:$0xff]  }
 0x542   :  { %2550 = vst [vmem:[#allocation2 + $0x340] sm:$0xf] %v7333_v15  ;;  %2518 = vst [vmem:[#allocation2 + $0x18] sm:$0xf] %v7328_v37  ;;  %v2509_v2 = vmul.f32 %v9093_v55, %v2502_v42  ;;  %v2487_v26 = vmul.f32 %v9100_v33, %v2479_v4  ;;  %2739 = vmatpush1.bf16.msra.mxu0 %v7626_v8 }
 0x543   :  { %2740 = vmatprep.subr.bf16.mxu0 %v8862_v51 }
 0x544   :  { %v7329_v16 = vpack.c.bf16 %v2509_v2, %v2509_v2  ;;  %v7326_v41 = vpack.c.bf16 %v2487_v26, %v2487_v26 }
 0x545   :  { %v2481_v52 = vpop.permute.xlu0 %2480  ;;  %v2458_v22 = vpop.permute.xlu1 %2457  ;;  %v7627_v57 = vld [vmem:[#allocation2 + $0x190] ss:$-392 sps:$4 sm:$0xff]  }
 0x546   :  { %2519 = vst [vmem:[#allocation2 + $0x318] sm:$0xf] %v7329_v16  ;;  %2497 = vst [vmem:[#allocation2 + $0x80] sm:$0xf] %v7326_v41  ;;  %v2488_v14 = vmul.f32 %v9100_v33, %v2481_v52  ;;  %v2466_v63 = vmul.f32 %v9107_v31, %v2458_v22  ;;  %2741 = vmatpush1.bf16.msra.mxu0 %v7627_v57  ;;  %v7635_v57 = vld [vmem:[%s11194_s1 + $0x40] ss:$16 sps:$4 sm:$0xff]  }
 0x547   :  { %2742 = vmatprep.subr.bf16.mxu0 %v8862_v51 }
 0x548   :  { %v7327_v59 = vpack.c.bf16 %v2488_v14, %v2488_v14  ;;  %v7324_v23 = vpack.c.bf16 %v2466_v63, %v2466_v63  ;;  %v7636_v14 = vld [vmem:[%s11194_s1 + $0x64] ss:$16 sps:$4 sm:$0xff]   ;;  %v7638_v63 = vld [vmem:[%s11194_s1 + $0x60] ss:$16 sps:$4 sm:$0xff]  }
 0x549   :  { %v2460_v44 = vpop.permute.xlu0 %2459  ;;  %v2437_v62 = vpop.permute.xlu1 %2436  ;;  %v7628_v54 = vld [vmem:[#allocation2 + $0x2d0] ss:$112 sps:$4 sm:$0xff]   ;;  %v2624_v15 = vld [vmem:[#allocation2 + $0x18] sm:$0xf] }
 0x54a   :  { %2498 = vst [vmem:[#allocation2 + $0x138] sm:$0xf] %v7327_v59  ;;  %2476 = vst [vmem:[#allocation2 + $0x320] sm:$0xf] %v7324_v23  ;;  %v2467_v60 = vmul.f32 %v9107_v31, %v2460_v44  ;;  %v2445_v48 = vmul.f32 %v9115_v43, %v2437_v62  ;;  %2743 = vmatpush1.bf16.msra.mxu0 %v7628_v54 }
 0x54b   :  { %2744 = vmatprep.subr.bf16.mxu0 %v8862_v51 }
 0x54c   :  { %v7325_v46 = vpack.c.bf16 %v2467_v60, %v2467_v60  ;;  %v7322_v10 = vpack.c.bf16 %v2445_v48, %v2445_v48 }
 0x54d   :  { %v2439_v3 = vpop.permute.xlu0 %2438  ;;  %v2594_v0 = vpop.permute.xlu1 %2593  ;;  %v2625_v38 = vld [vmem:[#allocation2 + $0x318] sm:$0xf] }
 0x54e   :  { %2477 = vst [vmem:[#allocation2 + $0xf8] sm:$0xf] %v7325_v46  ;;  %2455 = vst [vmem:[#allocation2 + $0x2b0] sm:$0xf] %v7322_v10  ;;  %v2446_v61 = vmul.f32 %v9115_v43, %v2439_v3  ;;  %v2602_v47 = vmul.f32 %v9123_v21, %v2594_v0  ;;  %2745 = vmatpush1.bf16.msra.mxu0 %v7629_v53  ;;  %v6918_v42 = vcombine.low %v2624_v15, %v2625_v38 }
 0x54f   :  { %2746 = vmatprep.subr.bf16.mxu0 %v8862_v51 }
 0x550   :  { %v7323_v56 = vpack.c.bf16 %v2446_v61, %v2446_v61  ;;  %v7338_v11 = vpack.c.bf16 %v2602_v47, %v2602_v47 }
 0x551   :  { %v2596_v37 = vpop.permute.xlu0 %2595  ;;  %v7630_v2 = vld [vmem:[#allocation2 + $0x80] ss:$184 sps:$4 sm:$0xff]  }
 0x552   :  { %2456 = vst [vmem:[#allocation2 + $0x10] sm:$0xf] %v7323_v56  ;;  %2612 = vst [vmem:[#allocation2 + $0x158] sm:$0xf] %v7338_v11  ;;  %v2603_v4 = vmul.f32 %v9123_v21, %v2596_v37  ;;  %2747 = vmatpush1.bf16.msra.mxu0 %v6918_v42 }
 0x553   :  { %2748 = vmatprep.subr.bf16.mxu0 %v8862_v51 }
 0x554   :  { %v7339_v8 = vpack.c.bf16 %v2603_v4, %v2603_v4 }
 0x555   :  { %v7631_v26 = vld [vmem:[#allocation2 + $0x320] ss:$-552 sps:$4 sm:$0xff]   ;;  %v2618_v41 = vld [vmem:[#allocation2 + $0x2b0] sm:$0xf] }
 0x556   :  { %2613 = vst [vmem:[#allocation2 + $0xc0] sm:$0xf] %v7339_v8  ;;  %2749 = vmatpush1.bf16.msra.mxu0 %v7630_v2 }
 0x557   :  { %2750 = vmatprep.subr.bf16.mxu0 %v8862_v51 }
 0x559   :  { %v2619_v16 = vld [vmem:[#allocation2 + $0x10] sm:$0xf] }
 0x55a   :  { %2751 = vmatpush1.bf16.msra.mxu0 %v7631_v26  ;;  %v6915_v52 = vcombine.low %v2618_v41, %v2619_v16  ;;  %v2653_v59 = vpop.permute.xlu1 %2652  ;;  %v7653_v16 = vld [vmem:[%s11194_s1 + $0x84] ss:$16 sps:$4 sm:$0xff]  }
 0x55b   :  { %2752 = vmatprep.subr.bf16.mxu0 %v8862_v51  ;;  %3352 = vmatprep.mubr.bf16.mxu1 %v7653_v16  ;;  %v3151_v41 = vld [vmem:[%s11195_s2 + $0x40] sm:$0xff] }
 0x55d   :  { %v7632_v22 = vld [vmem:[#allocation2 + $0x158] ss:$-152 sps:$4 sm:$0xff]  }
 0x55e   :  { %2753 = vmatpush1.bf16.msra.mxu0 %v6915_v52  ;;  %v2658_v23 = vpop.permute.xlu0 %2657  ;;  %v2643_v44 = vpop.permute.xlu1 %2642  ;;  %v3152_v52 = vld [vmem:[%s11195_s2 + $0x48] sm:$0xff] }
 0x55f   :  { %2768 = vmatprep.subr.bf16.mxu0 %v8862_v51 }
 0x562   :  { %2769 = vmatpush2.bf16.msra.mxu0 %v7632_v22  ;;  %v2648_v46 = vpop.permute.xlu0 %2647  ;;  %v3153_v22 = vld [vmem:[%s11195_s2 + $0x50] sm:$0xff] }
 0x565   :  { %2771 = vmatmul.mubr.bf16.vlgmr.msra.gmra.mxu0 %v7635_v57  ;;  %v3154_v57 = vld [vmem:[%s11195_s2 + $0x58] sm:$0xff] }
 0x566   :  { %6925 = vmatprep.mubr.msk.bf16.mxu0 %vm880_vm0, %v7636_v14 }
 0x56d   :  { %2779 = vmatmul.mubr.bf16.gmra.mxu0 %v7638_v63 }
 0x56e   :  { %3648 = vmatprep.mubr.bf16.mxu0 %v8862_v51 }
 0x625   :  { %v2772_v62 = vpop.f32.mrf.mxu0 }
 0x626   :  { %v2773_v54 = vadd.f32 %v2772_v62, %v2643_v44 }
 0x627   :  { %v2774_v60 = vpop.f32.mrf.mxu0 }
 0x628   :  { %v2787_v48 = vmax.f32 %v2773_v54, 0.0 }
 0x629   :  { %v2775_v10 = vpop.f32.mrf.mxu0 }
 0x62a   :  { %v7356_v3 = vpack.c.bf16 %v2787_v48, %v2787_v48  ;;  %v2776_v0 = vadd.f32 %v2775_v10, %v2648_v46  ;;  %3033 = vrot.lane.b32.xlu1 %v2787_v48, %s7885_s15 }
 0x62b   :  { %v2777_v53 = vpop.f32.mrf.mxu0 }
 0x62c   :  { %2955 = vst [vmem:[#allocation2 + $0x158] sm:$0xf] %v7356_v3  ;;  %v2788_v61 = vmax.f32 %v2776_v0, 0.0 }
 0x62d   :  { %v2780_v47 = vpop.f32.mrf.mxu0 }
 0x62e   :  { %v7357_v38 = vpack.c.bf16 %v2788_v61, %v2788_v61  ;;  %v2781_v56 = vadd.f32 %v2780_v47, %v2653_v59  ;;  %3035 = vrot.lane.b32.xlu0 %v2788_v61, %s7885_s15  ;;  %2902 = vrot.lane.b32.xlu1 %v2787_v48, %s7880_s28 }
 0x62f   :  { %v2782_v11 = vpop.f32.mrf.mxu0 }
 0x630   :  { %2956 = vst [vmem:[#allocation2 + $0xc0] sm:$0xf] %v7357_v38  ;;  %v2789_v15 = vmax.f32 %v2781_v56, 0.0 }
 0x631   :  { %v2783_v37 = vpop.f32.mrf.mxu0 }
 0x632   :  { %v2784_v42 = vadd.f32 %v2783_v37, %v2658_v23  ;;  %2904 = vrot.lane.b32.xlu0 %v2788_v61, %s7880_s28  ;;  %2996 = vrot.lane.b32.xlu1 %v2787_v48, %s7886_s16  ;;  %v7358_v4 = vpack.c.bf16 %v2789_v15, %v2789_v15 }
 0x633   :  { %v2785_v8 = vpop.f32.mrf.mxu0 }
 0x634   :  { %v2790_v2 = vmax.f32 %v2784_v42, 0.0  ;;  %2957 = vst [vmem:[#allocation2 + $0x1d0] sm:$0xf] %v7358_v4  ;;  %v7432_v42 = vpack.c.bf16 %v8781_v39, %v8704_v49  ;;  %v7434_v4 = vpack.c.bf16 %v8799_v50, %v8710_v7  ;;  %v7684_v8 = vld [vmem:[%s11199_s6 + $0xe0] ss:$16 sps:$4 sm:$0xff]  }
 0x636   :  { %2998 = vrot.lane.b32.xlu0 %v2788_v61, %s7886_s16  ;;  %2865 = vrot.lane.b32.xlu1 %v2787_v48, %s7887_s17  ;;  %v7359_v26 = vpack.c.bf16 %v2790_v2, %v2790_v2 }
 0x638   :  { %2958 = vst [vmem:[#allocation2 + $0x2d8] sm:$0xf] %v7359_v26 }
 0x63a   :  { %2867 = vrot.lane.b32.xlu0 %v2788_v61, %s7887_s17  ;;  %2959 = vrot.lane.b32.xlu1 %v2787_v48, %s7879_s27 }
 0x63e   :  { %2961 = vrot.lane.b32.xlu0 %v2788_v61, %s7879_s27  ;;  %3037 = vrot.lane.b32.xlu1 %v2789_v15, %s7885_s15 }
 0x642   :  { %3039 = vrot.lane.b32.xlu0 %v2790_v2, %s7885_s15  ;;  %2906 = vrot.lane.b32.xlu1 %v2789_v15, %s7880_s28 }
 0x646   :  { %2908 = vrot.lane.b32.xlu0 %v2790_v2, %s7880_s28  ;;  %3000 = vrot.lane.b32.xlu1 %v2789_v15, %s7886_s16 }
 0x64a   :  { %3002 = vrot.lane.b32.xlu0 %v2790_v2, %s7886_s16  ;;  %2869 = vrot.lane.b32.xlu1 %v2789_v15, %s7887_s17 }
 0x64e   :  { %2871 = vrot.lane.b32.xlu0 %v2790_v2, %s7887_s17  ;;  %2963 = vrot.lane.b32.xlu1 %v2789_v15, %s7879_s27 }
 0x652   :  { %2965 = vrot.lane.b32.xlu0 %v2790_v2, %s7879_s27  ;;  %2832 = vrot.lane.b32.xlu1 %v2789_v15, %s7888_s18 }
 0x656   :  { %2834 = vrot.lane.b32.xlu0 %v2790_v2, %s7888_s18  ;;  %2828 = vrot.lane.b32.xlu1 %v2787_v48, %s7888_s18 }
 0x65a   :  { %2830 = vrot.lane.b32.xlu0 %v2788_v61, %s7888_s18  ;;  %2795 = vrot.lane.b32.xlu1 %v2789_v15, %s7889_s19 }
 0x65e   :  { %2797 = vrot.lane.b32.xlu0 %v2790_v2, %s7889_s19  ;;  %2791 = vrot.lane.b32.xlu1 %v2787_v48, %s7889_s19 }
 0x662   :  { %2793 = vrot.lane.b32.xlu0 %v2788_v61, %s7889_s19  ;;  %3074 = vrot.lane.b32.xlu1 %v2789_v15, %s7890_s20 }
 0x666   :  { %3076 = vrot.lane.b32.xlu0 %v2790_v2, %s7890_s20  ;;  %3070 = vrot.lane.b32.xlu1 %v2787_v48, %s7890_s20  ;;  %v7686_v2 = vld [vmem:[%s11199_s6 + $0xe4] ss:$16 sps:$4 sm:$0xff]  }
 0x667   :  { %3616 = vmatprep.subr.bf16.mxu0 %v7686_v2 }
 0x668   :  { %3617 = vmatpush1.bf16.msra.mxu0 %v7684_v8 }
 0x66a   :  { %3072 = vrot.lane.b32.xlu0 %v2788_v61, %s7890_s20  ;;  %3157 = vperm.xlu1 %7586, %v3151_v41  }
 0x66e   :  { %3162 = vperm.xlu0 %7585, %v3152_v52   ;;  %3167 = vperm.xlu1 %7586, %v3153_v22  }
 0x672   :  { %3172 = vperm.xlu0 %7585, %v3154_v57   ;;  %4088 = vrot.lane.b32.xlu1 %v8704_v49, %s7882_s30 }
 0x676   :  { %4090 = vrot.lane.b32.xlu0 %v8710_v7, %s7882_s30  ;;  %4092 = vrot.lane.b32.xlu1 %v8781_v39, %s7882_s30 }
 0x67a   :  { %4094 = vrot.lane.b32.xlu0 %v8799_v50, %s7882_s30  ;;  %4100 = vrot.lane.b32.xlu1 %v8712_v17, %s7882_s30 }
 0x67e   :  { %4102 = vrot.lane.b32.xlu0 %v8723_v5, %s7882_s30  ;;  %5044 = vrot.lane.b32.xlu1 %v8704_v49, %s7878_s26 }
 0x682   :  { %5046 = vrot.lane.b32.xlu0 %v8710_v7, %s7878_s26  ;;  %5048 = vrot.lane.b32.xlu1 %v8781_v39, %s7878_s26 }
 0x686   :  { %5050 = vrot.lane.b32.xlu0 %v8799_v50, %s7878_s26  ;;  %5052 = vrot.lane.b32.xlu1 %v8708_v58, %s7878_s26 }
 0x68a   :  { %5054 = vrot.lane.b32.xlu0 %v8718_v1, %s7878_s26  ;;  %3864 = vrot.lane.b32.xlu1 %v8704_v49, %s7883_s8 }
 0x68e   :  { %3866 = vrot.lane.b32.xlu0 %v8710_v7, %s7883_s8  ;;  %3868 = vrot.lane.b32.xlu1 %v8781_v39, %s7883_s8 }
 0x692   :  { %3870 = vrot.lane.b32.xlu0 %v8799_v50, %s7883_s8  ;;  %3876 = vrot.lane.b32.xlu1 %v8712_v17, %s7883_s8 }
 0x696   :  { %3878 = vrot.lane.b32.xlu0 %v8723_v5, %s7883_s8  ;;  %4536 = vrot.lane.b32.xlu1 %v8704_v49, %s7880_s28 }
 0x69a   :  { %4538 = vrot.lane.b32.xlu0 %v8710_v7, %s7880_s28  ;;  %4540 = vrot.lane.b32.xlu1 %v8781_v39, %s7880_s28 }
 0x69c   :  { %v3034_v14 = vpop.permute.xlu1 %3033 }
 0x69d   :  { %v3046_v63 = vmul.f32 %v9073_v36, %v3034_v14 }
 0x69e   :  { %4542 = vrot.lane.b32.xlu0 %v8799_v50, %s7880_s28  ;;  %4548 = vrot.lane.b32.xlu1 %v8712_v17, %s7880_s28 }
 0x69f   :  { %v7368_v59 = vpack.c.bf16 %v3046_v63, %v3046_v63 }
 0x6a0   :  { %v3036_v23 = vpop.permute.xlu0 %3035  ;;  %v2903_v44 = vpop.permute.xlu1 %2902 }
 0x6a1   :  { %3066 = vst [vmem:[#allocation2 + $0x270] sm:$0xf] %v7368_v59  ;;  %v3047_v62 = vmul.f32 %v9073_v36, %v3036_v23  ;;  %v2915_v54 = vmul.f32 %v9093_v55, %v2903_v44 }
 0x6a2   :  { %4550 = vrot.lane.b32.xlu0 %v8723_v5, %s7880_s28  ;;  %4096 = vrot.lane.b32.xlu1 %v8708_v58, %s7882_s30 }
 0x6a3   :  { %v7369_v60 = vpack.c.bf16 %v3047_v62, %v3047_v62  ;;  %v7352_v48 = vpack.c.bf16 %v2915_v54, %v2915_v54 }
 0x6a4   :  { %v2905_v46 = vpop.permute.xlu0 %2904  ;;  %v2997_v10 = vpop.permute.xlu1 %2996 }
 0x6a5   :  { %3067 = vst [vmem:[#allocation2 + $0xe0] sm:$0xf] %v7369_v60  ;;  %2935 = vst [vmem:[#allocation2 + $0x190] sm:$0xf] %v7352_v48  ;;  %v2916_v3 = vmul.f32 %v9093_v55, %v2905_v46  ;;  %v3009_v0 = vmul.f32 %v9079_v12, %v2997_v10 }
 0x6a6   :  { %4098 = vrot.lane.b32.xlu0 %v8718_v1, %s7882_s30  ;;  %4312 = vrot.lane.b32.xlu1 %v8704_v49, %s7881_s29 }
 0x6a7   :  { %v7353_v53 = vpack.c.bf16 %v2916_v3, %v2916_v3  ;;  %v7364_v61 = vpack.c.bf16 %v3009_v0, %v3009_v0 }
 0x6a8   :  { %v2999_v47 = vpop.permute.xlu0 %2998  ;;  %v2866_v38 = vpop.permute.xlu1 %2865 }
 0x6a9   :  { %2936 = vst [vmem:[#allocation2 + $0x8] sm:$0xf] %v7353_v53  ;;  %3029 = vst [vmem:[#allocation2 + $0x2b8] sm:$0xf] %v7364_v61  ;;  %v3010_v56 = vmul.f32 %v9079_v12, %v2999_v47  ;;  %v2878_v11 = vmul.f32 %v9100_v33, %v2866_v38 }
 0x6aa   :  { %4314 = vrot.lane.b32.xlu0 %v8710_v7, %s7881_s29  ;;  %4316 = vrot.lane.b32.xlu1 %v8781_v39, %s7881_s29 }
 0x6ab   :  { %v7365_v15 = vpack.c.bf16 %v3010_v56, %v3010_v56  ;;  %v7348_v37 = vpack.c.bf16 %v2878_v11, %v2878_v11 }
 0x6ac   :  { %v2868_v26 = vpop.permute.xlu0 %2867  ;;  %v2960_v16 = vpop.permute.xlu1 %2959  ;;  %v9267_v41 = vld [vmem:[#allocation2 + $0x270] ss:$-400 sps:$4 sm:$0xff]  }
 0x6ad   :  { %3030 = vst [vmem:[#allocation2 + $0x178] sm:$0xf] %v7365_v15  ;;  %2898 = vst [vmem:[#allocation2 + $0x2c0] sm:$0xf] %v7348_v37  ;;  %v2879_v52 = vmul.f32 %v9100_v33, %v2868_v26  ;;  %v2972_v49 = vmul.f32 %v9086_v29, %v2960_v16 }
 0x6ae   :  { %4698 = vst [vmem:[#allocation2 + $0x270] sm:$0xff] %v7432_v42  ;;  %4700 = vst [vmem:[#allocation2 + $0xe0] sm:$0xff] %v7434_v4  ;;  %4318 = vrot.lane.b32.xlu0 %v8799_v50, %s7881_s29 }
 0x6af   :  { %v7349_v7 = vpack.c.bf16 %v2879_v52, %v2879_v52  ;;  %v7360_v39 = vpack.c.bf16 %v2972_v49, %v2972_v49 }
 0x6b0   :  { %v2962_v22 = vpop.permute.xlu0 %2961  ;;  %v3038_v57 = vpop.permute.xlu1 %3037 }
 0x6b1   :  { %2899 = vst [vmem:[#allocation2 + $0x198] sm:$0xf] %v7349_v7  ;;  %2992 = vst [vmem:[#allocation2 + $0x1a8] sm:$0xf] %v7360_v39  ;;  %v2973_v14 = vmul.f32 %v9086_v29, %v2962_v22  ;;  %v3048_v63 = vmul.f32 %v9073_v36, %v3038_v57 }
 0x6b3   :  { %v7361_v59 = vpack.c.bf16 %v2973_v14, %v2973_v14  ;;  %v7370_v23 = vpack.c.bf16 %v3048_v63, %v3048_v63 }
 0x6b4   :  { %v3040_v44 = vpop.permute.xlu0 %3039  ;;  %v2907_v62 = vpop.permute.xlu1 %2906 }
 0x6b5   :  { %2993 = vst [vmem:[#allocation2 + $0x328] sm:$0xf] %v7361_v59  ;;  %3068 = vst [vmem:[#allocation2 + $0xb8] sm:$0xf] %v7370_v23  ;;  %v3049_v54 = vmul.f32 %v9073_v36, %v3040_v44  ;;  %v2917_v50 = vmul.f32 %v9093_v55, %v2907_v62  ;;  %v3140_v44 = vld [vmem:[#allocation2 + $0x178] sm:$0xf] }
 0x6b7   :  { %v7371_v60 = vpack.c.bf16 %v3049_v54, %v3049_v54  ;;  %v7354_v48 = vpack.c.bf16 %v2917_v50, %v2917_v50  ;;  %v3139_v54 = vld [vmem:[#allocation2 + $0x2b8] sm:$0xf] }
 0x6b8   :  { %v2909_v46 = vpop.permute.xlu0 %2908  ;;  %v3001_v10 = vpop.permute.xlu1 %3000 }
 0x6b9   :  { %3069 = vst [vmem:[#allocation2 + $0x140] sm:$0xf] %v7371_v60  ;;  %2937 = vst [vmem:[#allocation2 + $0x1d8] sm:$0xf] %v7354_v48  ;;  %v2918_v3 = vmul.f32 %v9093_v55, %v2909_v46  ;;  %v3011_v0 = vmul.f32 %v9079_v12, %v3001_v10  ;;  %v6988_v10 = vcombine.low %v3139_v54, %v3140_v44 }
 0x6bb   :  { %v7355_v53 = vpack.c.bf16 %v2918_v3, %v2918_v3  ;;  %v7366_v61 = vpack.c.bf16 %v3011_v0, %v3011_v0 }
 0x6bc   :  { %v3003_v47 = vpop.permute.xlu0 %3002  ;;  %v2870_v38 = vpop.permute.xlu1 %2869 }
 0x6bd   :  { %2938 = vst [vmem:[#allocation2 + $0x280] sm:$0xf] %v7355_v53  ;;  %3031 = vst [vmem:[#allocation2 + $0x2e8] sm:$0xf] %v7366_v61  ;;  %v3012_v36 = vmul.f32 %v9079_v12, %v3003_v47  ;;  %v2880_v56 = vmul.f32 %v9100_v33, %v2870_v38  ;;  %v7645_v47 = vld [vmem:[#allocation2 + $0x2c0] ss:$-296 sps:$4 sm:$0xff]  }
 0x6bf   :  { %v7367_v11 = vpack.c.bf16 %v3012_v36, %v3012_v36  ;;  %v7350_v15 = vpack.c.bf16 %v2880_v56, %v2880_v56 }
 0x6c0   :  { %v2872_v37 = vpop.permute.xlu0 %2871  ;;  %v2964_v42 = vpop.permute.xlu1 %2963  ;;  %v7639_v4 = vld [vmem:[#allocation2 + $0xb8] ss:$136 sps:$4 sm:$0xff]  }
 0x6c1   :  { %3032 = vst [vmem:[#allocation2 + $0x2f8] sm:$0xf] %v7367_v11  ;;  %2900 = vst [vmem:[#allocation2 + $0x2d0] sm:$0xf] %v7350_v15  ;;  %v2881_v55 = vmul.f32 %v9100_v33, %v2872_v37  ;;  %v2974_v8 = vmul.f32 %v9086_v29, %v2964_v42  ;;  %7528 = vmatprep.subr.bf16.mxu1 %v7639_v4  ;;  %v7642_v33 = vld [vmem:[#allocation2 + $0x190] ss:$-392 sps:$4 sm:$0xff]  }
 0x6c2   :  { %v3136_v15 = vld [vmem:[#allocation2 + $0x328] sm:$0xf] }
 0x6c3   :  { %v7351_v2 = vpack.c.bf16 %v2881_v55, %v2881_v55  ;;  %v7362_v26 = vpack.c.bf16 %v2974_v8, %v2974_v8 }
 0x6c4   :  { %v2966_v16 = vpop.permute.xlu0 %2965  ;;  %v2833_v52 = vpop.permute.xlu1 %2832  ;;  %v7640_v49 = vld [vmem:[#allocation2 + $0x1d8] ss:$168 sps:$4 sm:$0xff]  }
 0x6c5   :  { %2901 = vst [vmem:[#allocation2 + $0x340] sm:$0xf] %v7351_v2  ;;  %2994 = vst [vmem:[#allocation2 + $0x1c8] sm:$0xf] %v7362_v26  ;;  %v2975_v12 = vmul.f32 %v9086_v29, %v2966_v16  ;;  %v2843_v7 = vmul.f32 %v9107_v31, %v2833_v52  ;;  %7529 = vmatpush3.bf16.msra.mxu1 %v7640_v49  ;;  %v3135_v16 = vld [vmem:[#allocation2 + $0x1a8] sm:$0xf] }
 0x6c6   :  { %7530 = vmatprep.subr.bf16.mxu1 %v9267_v41  ;;  %v6986_v52 = vcombine.low %v3135_v16, %v3136_v15 }
 0x6c7   :  { %v7363_v39 = vpack.c.bf16 %v2975_v12, %v2975_v12  ;;  %v7346_v22 = vpack.c.bf16 %v2843_v7, %v2843_v7 }
 0x6c8   :  { %v2835_v57 = vpop.permute.xlu0 %2834  ;;  %v2829_v14 = vpop.permute.xlu1 %2828  ;;  %v7643_v63 = vld [vmem:[#allocation2 + $0x2e8] ss:$16 sps:$4 sm:$0xff]  }
 0x6c9   :  { %2995 = vst [vmem:[#allocation2 + $0x298] sm:$0xf] %v7363_v39  ;;  %2863 = vst [vmem:[#allocation2 + $0x18] sm:$0xf] %v7346_v22  ;;  %v2844_v59 = vmul.f32 %v9107_v31, %v2835_v57  ;;  %v2841_v23 = vmul.f32 %v9107_v31, %v2829_v14  ;;  %7531 = vmatpush3.bf16.msra.mxu1 %v7642_v33  ;;  %v7648_v14 = vld [vmem:[#allocation2 + $0x1d0] ss:$264 sps:$4 sm:$0xff]  }
 0x6ca   :  { %7532 = vmatprep.subr.bf16.mxu1 %v7643_v63 }
 0x6cb   :  { %v7347_v29 = vpack.c.bf16 %v2844_v59, %v2844_v59  ;;  %v7344_v62 = vpack.c.bf16 %v2841_v23, %v2841_v23 }
 0x6cc   :  { %v2831_v50 = vpop.permute.xlu0 %2830  ;;  %v2796_v60 = vpop.permute.xlu1 %2795  ;;  %v7644_v48 = vld [vmem:[#allocation2 + $0x2d0] ss:$112 sps:$4 sm:$0xff]  }
 0x6cd   :  { %2864 = vst [vmem:[#allocation2 + $0x318] sm:$0xf] %v7347_v29  ;;  %2861 = vst [vmem:[#allocation2 + $0x80] sm:$0xf] %v7344_v62  ;;  %v2842_v41 = vmul.f32 %v9107_v31, %v2831_v50  ;;  %v2806_v46 = vmul.f32 %v9115_v43, %v2796_v60  ;;  %7533 = vmatpush3.bf16.msra.mxu1 %v7644_v48  ;;  %v7650_v29 = vld [vmem:[#allocation2 + $0x158] ss:$-152 sps:$4 sm:$0xff]  }
 0x6ce   :  { %7534 = vmatprep.subr.bf16.mxu1 %v6988_v10 }
 0x6cf   :  { %v7345_v3 = vpack.c.bf16 %v2842_v41, %v2842_v41  ;;  %v7342_v0 = vpack.c.bf16 %v2806_v46, %v2806_v46  ;;  %v7651_v41 = vld [vmem:[%s11194_s1 + $0x80] ss:$16 sps:$4 sm:$0xff]  }
 0x6d0   :  { %v2798_v53 = vpop.permute.xlu0 %2797  ;;  %v2792_v61 = vpop.permute.xlu1 %2791  ;;  %v7646_v38 = vld [vmem:[#allocation2 + $0x1c8] ss:$208 sps:$4 sm:$0xff]  }
 0x6d1   :  { %2862 = vst [vmem:[#allocation2 + $0x138] sm:$0xf] %v7345_v3  ;;  %2826 = vst [vmem:[#allocation2 + $0x320] sm:$0xf] %v7342_v0  ;;  %v2807_v36 = vmul.f32 %v9115_v43, %v2798_v53  ;;  %v2804_v56 = vmul.f32 %v9115_v43, %v2792_v61  ;;  %7535 = vmatpush3.bf16.msra.mxu1 %v7645_v47  ;;  %v3121_v4 = vld [vmem:[#allocation2 + $0x18] sm:$0xf] }
 0x6d2   :  { %7536 = vmatprep.subr.bf16.mxu1 %v7646_v38  ;;  %v7661_v0 = vld [vmem:[%s11199_s6 + $0xec] ss:$16 sps:$4 sm:$0xff]   ;;  %v7657_v53 = vld [vmem:[%s11194_s1 + $0xa0] ss:$16 sps:$4 sm:$0xff]  }
 0x6d3   :  { %v7343_v11 = vpack.c.bf16 %v2807_v36, %v2807_v36  ;;  %v7340_v31 = vpack.c.bf16 %v2804_v56, %v2804_v56  ;;  %v9330_v61 = vld [vmem:[%s11196_s3 + $0x1] ss:$8 sm:$0xf] }
 0x6d4   :  { %v2794_v37 = vpop.permute.xlu0 %2793  ;;  %v3075_v42 = vpop.permute.xlu1 %3074  ;;  %v3122_v55 = vld [vmem:[#allocation2 + $0x318] sm:$0xf]  ;;  %v4121_v56 = vrot.slane %v9330_v61, %v8036_v25 }
 0x6d5   :  { %2827 = vst [vmem:[#allocation2 + $0xf8] sm:$0xf] %v7343_v11  ;;  %2824 = vst [vmem:[#allocation2 + $0x2b0] sm:$0xf] %v7340_v31  ;;  %v2805_v8 = vmul.f32 %v9115_v43, %v2794_v37  ;;  %v3085_v2 = vmul.f32 %v9123_v21, %v3075_v42  ;;  %v6979_v26 = vcombine.low %v3121_v4, %v3122_v55  ;;  %v7662_v36 = vld [vmem:[%s11194_s1 + $0xa8] ss:$16 sps:$4 sm:$0xff]  }
 0x6d6   :  { %v4117_v11 = vrot.slane %v9330_v61, %v8033_v24  ;;  %v7659_v31 = vld [vmem:[%s11199_s6 + $0xe8] ss:$16 sps:$4 sm:$0xff]   ;;  %v7665_v37 = vld [vmem:[%s11199_s6 + $0xcc] ss:$16 sps:$4 sm:$0xff]  }
 0x6d7   :  { %v7341_v49 = vpack.c.bf16 %v2805_v8, %v2805_v8  ;;  %v7374_v12 = vpack.c.bf16 %v3085_v2, %v3085_v2  ;;  %7537 = vmatpush3.bf16.msra.mxu1 %v6979_v26  ;;  %v7663_v26 = vld [vmem:[%s11199_s6 + $0xc8] ss:$16 sps:$4 sm:$0xff]  }
 0x6d8   :  { %v3077_v7 = vpop.permute.xlu0 %3076  ;;  %7538 = vmatprep.subr.bf16.mxu1 %v6986_v52  ;;  %v3071_v39 = vpop.permute.xlu1 %3070  ;;  %v7647_v22 = vld [vmem:[#allocation2 + $0x80] ss:$184 sps:$4 sm:$0xff]   ;;  %v7668_v52 = vld [vmem:[%s11199_s6 + $0xac] ss:$16 sps:$4 sm:$0xff]  }
 0x6d9   :  { %2825 = vst [vmem:[#allocation2 + $0x10] sm:$0xf] %v7341_v49  ;;  %3105 = vst [vmem:[#allocation2 + $0x358] sm:$0xf] %v7374_v12  ;;  %v3086_v33 = vmul.f32 %v9123_v21, %v3077_v7  ;;  %v3083_v57 = vmul.f32 %v9123_v21, %v3071_v39 }
 0x6db   :  { %v7375_v43 = vpack.c.bf16 %v3086_v33, %v3086_v33  ;;  %v7372_v63 = vpack.c.bf16 %v3083_v57, %v3083_v57  ;;  %7539 = vmatpush3.bf16.msra.mxu1 %v7647_v22  ;;  %v7666_v57 = vld [vmem:[%s11199_s6 + $0xa8] ss:$16 sps:$4 sm:$0xff]  }
 0x6dc   :  { %v3073_v59 = vpop.permute.xlu0 %3072  ;;  %7540 = vmatprep.subr.bf16.mxu1 %v7648_v14  ;;  %v7649_v23 = vld [vmem:[#allocation2 + $0x320] ss:$-552 sps:$4 sm:$0xff]   ;;  %v3115_v54 = vld [vmem:[#allocation2 + $0x2b0] sm:$0xf] }
 0x6dd   :  { %3106 = vst [vmem:[#allocation2 + $0x1f8] sm:$0xf] %v7375_v43  ;;  %3103 = vst [vmem:[#allocation2 + $0x90] sm:$0xf] %v7372_v63  ;;  %v3084_v44 = vmul.f32 %v9123_v21, %v3073_v59  ;;  %v7655_v21 = vld [vmem:[%s11194_s1 + $0xa4] ss:$16 sps:$4 sm:$0xff]  }
 0x6de   :  { %v7117_v14 = vld [vmem:[%s11196_s3 + $0x6] ss:$8 sm:$0xf] }
 0x6df   :  { %v7373_v62 = vpack.c.bf16 %v3084_v44, %v3084_v44  ;;  %7541 = vmatpush3.bf16.msra.mxu1 %v7649_v23  ;;  %v7671_v43 = vld [vmem:[%s11199_s6 + $0x8c] ss:$16 sps:$4 sm:$0xff]   ;;  %v5073_v44 = vrot.slane %v7117_v14, %v8033_v24 }
 0x6e0   :  { %7542 = vmatprep.subr.bf16.mxu1 %v7650_v29  ;;  %v3116_v50 = vld [vmem:[#allocation2 + $0x10] sm:$0xf]  ;;  %v3149_v60 = vld [vmem:[#allocation2 + $0x358] sm:$0xf]  ;;  %v5077_v29 = vrot.slane %v7117_v14, %v8036_v25 }
 0x6e1   :  { %3104 = vst [vmem:[#allocation2 + $0x218] sm:$0xf] %v7373_v62  ;;  %v6976_v48 = vcombine.low %v3115_v54, %v3116_v50  ;;  %4898 = vst [vmem:[#allocation2 + $0x358] sm:$0xff] %v7444_v30  ;;  %v7669_v62 = vld [vmem:[%s11199_s6 + $0x88] ss:$16 sps:$4 sm:$0xff]  }
 0x6e2   :  { %v7674_v50 = vld [vmem:[%s11199_s6 + $0x6c] ss:$16 sps:$4 sm:$0xff]  }
 0x6e3   :  { %7543 = vmatpush3.bf16.msra.mxu1 %v6976_v48 }
 0x6e4   :  { %v3150_v46 = vld [vmem:[#allocation2 + $0x1f8] sm:$0xf] }
 0x6e5   :  { %v9306_v10 = vpop.permute.xlu1 %3157  ;;  %v6993_v3 = vcombine.low %v3149_v60, %v3150_v46  ;;  %4900 = vst [vmem:[#allocation2 + $0x1f8] sm:$0xff] %v7446_v45 }
 0x6e6   :  { %3353 = vmatmul.mubr.bf16.vlgmr.msra.gmra.mxu1 %v7651_v41 }
 0x6e7   :  { %7560 = vmatprep.subr.bf16.mxu1 %v6993_v3  ;;  %3360 = vmatprep.mubr.bf16.mxu1 %v7655_v21 }
 0x6e8   :  { %7561 = vmatpush3.bf16.msra.mxu1 %v6993_v3  ;;  %v7654_v34 = vld [vmem:[#allocation2 + $0x90] ss:$392 sps:$4 sm:$0xff]  }
 0x6e9   :  { %v9311_v35 = vpop.permute.xlu0 %3162  ;;  %v9313_v30 = vpop.permute.xlu1 %3167  ;;  %7562 = vmatprep.subr.bf16.mxu1 %v7654_v34  ;;  %v7672_v3 = vld [vmem:[%s11199_s6 + $0x68] ss:$16 sps:$4 sm:$0xff]  }
 0x6ec   :  { %7563 = vmatpush3.bf16.msra.mxu1 %v7654_v34 }
 0x6ed   :  { %v9324_v28 = vpop.permute.xlu0 %3172  ;;  %v4089_v45 = vpop.permute.xlu1 %4088  ;;  %3669 = vmatprep.subr.bf16.mxu1 %v7661_v0  ;;  %v7677_v0 = vld [vmem:[%s11199_s6 + $0x4c] ss:$16 sps:$4 sm:$0xff]  }
 0x6ee   :  { %3361 = vmatmul.mubr.bf16.gmra.mxu1 %v7657_v53 }
 0x6ef   :  { %7564 = vmatprep.mubr.msk.bf16.mxu1 %vm3313_vm9, %v7658_v27 }
 0x6f1   :  { %v4091_v47 = vpop.permute.xlu0 %4090  ;;  %v9332_v38 = vpop.permute.xlu1 %4092 }
 0x6f2   :  { %v4108_v15 = vsel %vm225_vm6, %v4089_v45, %v9332_v38 }
 0x6f3   :  { %v4135_v8 = vmul.f32 %v4121_v56, %v4108_v15  ;;  %v7680_v15 = vld [vmem:[%s11199_s6 + $0x2c] ss:$16 sps:$4 sm:$0xff]  }
 0x6f5   :  { %v9350_v42 = vpop.permute.xlu0 %4094  ;;  %v9352_v4 = vpop.permute.xlu1 %4100 }
 0x6f6   :  { %v4110_v55 = vsel %vm225_vm6, %v9352_v4, %v4089_v45  ;;  %7565 = vmatmul.mubr.msk.bf16.vlgmr.msra.gmra.mxu1 %vm3313_vm9, %v7662_v36  ;;  %v4109_v16 = vsel %vm225_vm6, %v4091_v47, %v9350_v42 }
 0x6f7   :  { %v4134_v2 = vmul.f32 %v4117_v11, %v4110_v55  ;;  %3670 = vmatpush1.bf16.msra.mxu1 %v7659_v31  ;;  %3701 = vmatprep.mubr.bf16.mxu1 %v8862_v51  ;;  %v4139_v22 = vmul.f32 %v4121_v56, %v4109_v16  ;;  %v3888_v31 = vld [vmem:[%s11196_s3] ss:$8 sm:$0xf] }
 0x6f8   :  { %3671 = vmatprep.subr.bf16.mxu1 %v7665_v37  ;;  %v7678_v16 = vld [vmem:[%s11199_s6 + $0x28] ss:$16 sps:$4 sm:$0xff]  }
 0x6f9   :  { %v7396_v49 = vpack.c.bf16 %v4135_v8, %v4134_v2  ;;  %v9368_v12 = vpop.permute.xlu0 %4102  ;;  %v9370_v7 = vpop.permute.xlu1 %5044  ;;  %v3897_v2 = vrot.slane %v3888_v31, %v8036_v25 }
 0x6fa   :  { %11333 = vst [vmem:[#allocation9_spill] sm:$0xff] %v9370_v7  ;;  %v4111_v39 = vsel %vm225_vm6, %v9368_v12, %v4091_v47 }
 0x6fb   :  { %4166 = vst [vmem:[#allocation2 + $0x2d0] sm:$0xff] %v7396_v49  ;;  %v4138_v33 = vmul.f32 %v4117_v11, %v4111_v39  ;;  %3672 = vmatpush1.bf16.msra.mxu1 %v7663_v26  ;;  %v7675_v11 = vld [vmem:[%s11199_s6 + $0x48] ss:$16 sps:$4 sm:$0xff]   ;;  %v3893_v26 = vrot.slane %v3888_v31, %v8033_v24  ;;  %v7683_v49 = vld [vmem:[%s11199_s6 + $0xc] ss:$16 sps:$4 sm:$0xff]  }
 0x6fc   :  { %3673 = vmatprep.subr.bf16.mxu1 %v7668_v52 }
 0x6fd   :  { %v7398_v63 = vpack.c.bf16 %v4139_v22, %v4138_v33  ;;  %v9384_v59 = vpop.permute.xlu0 %5046  ;;  %v5049_v23 = vpop.permute.xlu1 %5048 }
 0x6fe   :  { %11334 = vst [vmem:[#allocation12_spill] sm:$0xff] %v9384_v59  ;;  %v5064_v54 = vsel %vm475_vm2, %v9370_v7, %v5049_v23 }
 0x6ff   :  { %4168 = vst [vmem:[#allocation2 + $0x340] sm:$0xff] %v7398_v63  ;;  %3674 = vmatpush1.bf16.msra.mxu1 %v7666_v57  ;;  %v5090_v21 = vmul.f32 %v5073_v44, %v5064_v54  ;;  %v7759_v54 = vld [vmem:[#allocation2 + $0x2a0] sm:$0xff] }
 0x700   :  { %3675 = vmatprep.subr.bf16.mxu1 %v7671_v43  ;;  %v7681_v43 = vld [vmem:[%s11199_s6 + $0x8] ss:$16 sps:$4 sm:$0xff]  }
 0x701   :  { %v5051_v60 = vpop.permute.xlu0 %5050  ;;  %v9397_v48 = vpop.permute.xlu1 %5052 }
 0x702   :  { %11335 = vst [vmem:[#allocation13_spill] sm:$0xff] %v9397_v48  ;;  %v5062_v41 = vsel %vm475_vm2, %v5049_v23, %v9397_v48  ;;  %v5065_v34 = vsel %vm475_vm2, %v9384_v59, %v5051_v60  ;;  %v9821_v59 = vrot.slane %v7054_v32, %v8033_v24 }
 0x703   :  { %v5091_v46 = vmul.f32 %v5077_v29, %v5062_v41  ;;  %3676 = vmatpush1.bf16.msra.mxu1 %v7669_v62  ;;  %v5094_v36 = vmul.f32 %v5073_v44, %v5065_v34 }
 0x704   :  { %3677 = vmatprep.subr.bf16.mxu1 %v7674_v50  ;;  %v7760_v50 = vld [vmem:[#allocation2 + $0x220] sm:$0xff] }
 0x705   :  { %v7456_v53 = vpack.c.bf16 %v5091_v46, %v5090_v21  ;;  %v9411_v27 = vpop.permute.xlu0 %5054  ;;  %v3865_v45 = vpop.permute.xlu1 %3864  ;;  %v7077_v46 = vld [vmem:[%s11196_s3 + $0x3] ss:$8 sm:$0xf] }
 0x706   :  { %11336 = vst [vmem:[#allocation14_spill] sm:$0xff] %v9411_v27  ;;  %v5063_v47 = vsel %vm475_vm2, %v5051_v60, %v9411_v27  ;;  %v7247_v60 = vcombine.high %v7760_v50, %v7759_v54  ;;  %v9824_v27 = vrot.slane %v7054_v32, %v8027_v20 }
 0x707   :  { %5122 = vst [vmem:[#allocation2 + $0x70] sm:$0xff] %v7456_v53  ;;  %v5095_v56 = vmul.f32 %v5077_v29, %v5063_v47  ;;  %3678 = vmatpush1.bf16.msra.mxu1 %v7672_v3  ;;  %v4569_v53 = vrot.slane %v7077_v46, %v8036_v25 }
 0x708   :  { %3679 = vmatprep.subr.bf16.mxu1 %v7677_v0 }
 0x709   :  { %v7458_v37 = vpack.c.bf16 %v5095_v56, %v5094_v36  ;;  %v3867_v55 = vpop.permute.xlu0 %3866  ;;  %v9425_v8 = vpop.permute.xlu1 %3868 }
 0x70a   :  { %11337 = vst [vmem:[#allocation15_spill] sm:$0xff] %v9425_v8  ;;  %v3884_v52 = vsel %vm168_vm7, %v3865_v45, %v9425_v8 }
 0x70b   :  { %5124 = vst [vmem:[#allocation2 + $0x50] sm:$0xff] %v7458_v37  ;;  %3680 = vmatpush1.bf16.msra.mxu1 %v7675_v11  ;;  %v3911_v57 = vmul.f32 %v3897_v2, %v3884_v52  ;;  %v4125_v37 = vrot.slane %v9330_v61, %v8024_v19 }
 0x70c   :  { %3681 = vmatprep.subr.bf16.mxu1 %v7680_v15 }
 0x70d   :  { %v9438_v39 = vpop.permute.xlu0 %3870  ;;  %v9440_v22 = vpop.permute.xlu1 %3876 }
 0x70e   :  { %11338 = vst [vmem:[#allocation16_spill] sm:$0xff] %v9438_v39  ;;  %11339 = vst [vmem:[#allocation17_spill] sm:$0xff] %v9440_v22  ;;  %v3886_v33 = vsel %vm168_vm7, %v9440_v22, %v3865_v45  ;;  %v3885_v63 = vsel %vm168_vm7, %v3867_v55, %v9438_v39  ;;  %v4565_v45 = vrot.slane %v7077_v46, %v8033_v24  ;;  %v7693_v46 = vld [vmem:[%s11199_s6 + $0x80] ss:$16 sps:$4 sm:$0xff]  }
 0x70f   :  { %v3910_v14 = vmul.f32 %v3893_v26, %v3886_v33  ;;  %3682 = vmatpush1.bf16.msra.mxu1 %v7678_v16  ;;  %v3915_v41 = vmul.f32 %v3897_v2, %v3885_v63 }
 0x710   :  { %3683 = vmatprep.subr.bf16.mxu1 %v7683_v49 }
 0x711   :  { %v7384_v23 = vpack.c.bf16 %v3911_v57, %v3910_v14  ;;  %v9451_v44 = vpop.permute.xlu0 %3878  ;;  %v4537_v29 = vpop.permute.xlu1 %4536 }
 0x712   :  { %11340 = vst [vmem:[#allocation18_spill] sm:$0xff] %v9451_v44  ;;  %v3887_v62 = vsel %vm168_vm7, %v9451_v44, %v3867_v55  ;;  %v4129_v55 = vrot.slane %v9330_v61, %v8027_v20 }
 0x713   :  { %3942 = vst [vmem:[#allocation2 + $0x80] sm:$0xff] %v7384_v23  ;;  %v3914_v21 = vmul.f32 %v3893_v26, %v3887_v62  ;;  %3684 = vmatpush1.bf16.msra.mxu1 %v7681_v43 }
 0x714   :  { %6256 = vmatprep.subr.bf16.mxu1 %v7247_v60 }
 0x715   :  { %v7386_v3 = vpack.c.bf16 %v3915_v41, %v3914_v21  ;;  %v4539_v34 = vpop.permute.xlu0 %4538  ;;  %v9459_v0 = vpop.permute.xlu1 %4540  ;;  %v7687_v41 = vld [vmem:[%s11199_s6 + $0xc0] ss:$16 sps:$4 sm:$0xff]   ;;  %v7689_v21 = vld [vmem:[%s11199_s6 + $0xc4] ss:$16 sps:$4 sm:$0xff]  }
 0x716   :  { %11341 = vst [vmem:[#allocation19_spill] sm:$0xff] %v9459_v0  ;;  %v4556_v47 = vsel %vm341_vm4, %v4537_v29, %v9459_v0  ;;  %3618 = vmatprep.subr.bf16.mxu0 %v7689_v21  ;;  %v7122_v0 = vld [vmem:[%s11196_s3 + $0x7] ss:$8 sm:$0xf] }
 0x717   :  { %3944 = vst [vmem:[#allocation2 + $0x138] sm:$0xff] %v7386_v3  ;;  %v4583_v31 = vmul.f32 %v4569_v53, %v4556_v47  ;;  %3619 = vmatpush1.bf16.msra.mxu0 %v7687_v41  ;;  %v7695_v3 = vld [vmem:[%s11199_s6 + $0x84] ss:$16 sps:$4 sm:$0xff]   ;;  %v9832_v39 = vrot.slane %v7122_v0, %v8033_v24  ;;  %v9835_v44 = vrot.slane %v7122_v0, %v8036_v25 }
 0x718   :  { %v7701_v47 = vld [vmem:[%s11199_s6 + $0x44] ss:$16 sps:$4 sm:$0xff]  }
 0x719   :  { %v9466_v36 = vpop.permute.xlu0 %4542  ;;  %v9468_v56 = vpop.permute.xlu1 %4548 }
 0x71a   :  { %11342 = vst [vmem:[#allocation20_spill] sm:$0xff] %v9466_v36  ;;  %11343 = vst [vmem:[#allocation21_spill] sm:$0xff] %v9468_v56  ;;  %v4558_v11 = vsel %vm341_vm4, %v9468_v56, %v4537_v29  ;;  %v4557_v2 = vsel %vm341_vm4, %v4539_v34, %v9466_v36  ;;  %v9814_v56 = vrot.slane %v7054_v32, %v8024_v19 }
 0x71b   :  { %v4582_v15 = vmul.f32 %v4565_v45, %v4558_v11  ;;  %v4587_v57 = vmul.f32 %v4569_v53, %v4557_v2  ;;  %v7698_v53 = vld [vmem:[%s11199_s6 + $0x64] ss:$16 sps:$4 sm:$0xff]  }
 0x71c   :  { %v7704_v11 = vld [vmem:[%s11199_s6 + $0x24] ss:$16 sps:$4 sm:$0xff]  }
 0x71d   :  { %v7420_v26 = vpack.c.bf16 %v4583_v31, %v4582_v15  ;;  %v9480_v16 = vpop.permute.xlu0 %4550  ;;  %v4097_v52 = vpop.permute.xlu1 %4096  ;;  %v7702_v31 = vld [vmem:[%s11199_s6 + $0x20] ss:$16 sps:$4 sm:$0xff]  }
 0x71e   :  { %11344 = vst [vmem:[#allocation22_spill] sm:$0xff] %v9480_v16  ;;  %v4559_v49 = vsel %vm341_vm4, %v9480_v16, %v4539_v34  ;;  %v4104_v33 = vsel %vm225_vm6, %v4097_v52, %v9352_v4  ;;  %v4106_v61 = vsel %vm225_vm6, %v9332_v38, %v4097_v52  ;;  %v7696_v34 = vld [vmem:[%s11199_s6 + $0x60] ss:$16 sps:$4 sm:$0xff]   ;;  %v9808_v16 = vrot.slane %v7054_v32, %v8036_v25 }
 0x71f   :  { %4614 = vst [vmem:[#allocation2 + $0x1c8] sm:$0xff] %v7420_v26  ;;  %v4586_v14 = vmul.f32 %v4565_v45, %v4559_v49  ;;  %v4136_v43 = vmul.f32 %v4125_v37, %v4106_v61  ;;  %v4137_v63 = vmul.f32 %v4129_v55, %v4104_v33  ;;  %v7699_v45 = vld [vmem:[%s11199_s6 + $0x40] ss:$16 sps:$4 sm:$0xff]  }
 0x720   :  { %v7705_v15 = vld [vmem:[%s11199_s6] ss:$16 sps:$4 sm:$0xff]  }
 0x721   :  { %v7422_v23 = vpack.c.bf16 %v4587_v57, %v4586_v14  ;;  %v7397_v29 = vpack.c.bf16 %v4137_v63, %v4136_v43  ;;  %v4099_v62 = vpop.permute.xlu0 %4098 }
 0x722   :  { %v4105_v54 = vsel %vm225_vm6, %v4099_v62, %v9368_v12  ;;  %v4107_v4 = vsel %vm225_vm6, %v9350_v42, %v4099_v62  ;;  %v7690_v42 = vld [vmem:[%s11199_s6 + $0xa0] ss:$16 sps:$4 sm:$0xff]   ;;  %v7692_v12 = vld [vmem:[%s11199_s6 + $0xa4] ss:$16 sps:$4 sm:$0xff]  }
 0x723   :  { %4616 = vst [vmem:[#allocation2 + $0x298] sm:$0xff] %v7422_v23  ;;  %4167 = vst [vmem:[#allocation2 + $0x268] sm:$0xff] %v7397_v29  ;;  %v4140_v50 = vmul.f32 %v4125_v37, %v4107_v4  ;;  %v4141_v38 = vmul.f32 %v4129_v55, %v4105_v54  ;;  %3620 = vmatprep.subr.bf16.mxu0 %v7692_v12  ;;  %v7707_v37 = vld [vmem:[%s11199_s6 + $0x4] ss:$16 sps:$4 sm:$0xff]  }
 0x724   :  { %3621 = vmatpush1.bf16.msra.mxu0 %v7690_v42 }
 0x725   :  { %v7399_v60 = vpack.c.bf16 %v4141_v38, %v4140_v50  ;;  %3622 = vmatprep.subr.bf16.mxu0 %v7695_v3 }
 0x727   :  { %4169 = vst [vmem:[#allocation2 + $0x110] sm:$0xff] %v7399_v60 }
 0x728   :  { %3623 = vmatpush1.bf16.msra.mxu0 %v7693_v46 }
 0x729   :  { %3624 = vmatprep.subr.bf16.mxu0 %v7698_v53 }
 0x72c   :  { %3625 = vmatpush1.bf16.msra.mxu0 %v7696_v34 }
 0x72d   :  { %3626 = vmatprep.subr.bf16.mxu0 %v7701_v47 }
 0x730   :  { %3627 = vmatpush1.bf16.msra.mxu0 %v7699_v45 }
 0x731   :  { %3628 = vmatprep.subr.bf16.mxu0 %v7704_v11 }
 0x734   :  { %3629 = vmatpush1.bf16.msra.mxu0 %v7702_v31 }
 0x735   :  { %3630 = vmatprep.subr.bf16.mxu0 %v7707_v37 }
 0x738   :  { %3631 = vmatpush1.bf16.msra.mxu0 %v7705_v15 }
 0x7a6   :  { %v7544_v55 = vpop.f32.mrf.mxu1 }
 0x7a8   :  { %v7545_v2 = vpop.f32.mrf.mxu1 }
 0x7a9   :  { %v7546_v14 = vadd.f32 %v7545_v2, %v7544_v55 }
 0x7aa   :  { %v7547_v26 = vpop.f32.mrf.mxu1 }
 0x7ab   :  { %v3355_v29 = vadd.f32 %v7546_v14, %v9306_v10 }
 0x7ac   :  { %v7548_v52 = vpop.f32.mrf.mxu1 }
 0x7ad   :  { %v7549_v63 = vadd.f32 %v7548_v52, %v7547_v26 }
 0x7ae   :  { %v7550_v49 = vpop.f32.mrf.mxu1 }
 0x7af   :  { %v3358_v50 = vadd.f32 %v7549_v63, %v9311_v35 }
 0x7b0   :  { %v7551_v33 = vpop.f32.mrf.mxu1 }
 0x7b1   :  { %v7552_v60 = vadd.f32 %v7551_v33, %v7550_v49 }
 0x7b2   :  { %v7553_v61 = vpop.f32.mrf.mxu1 }
 0x7b3   :  { %v3363_v46 = vadd.f32 %v7552_v60, %v9313_v30 }
 0x7b4   :  { %v7554_v57 = vpop.f32.mrf.mxu1 }
 0x7b5   :  { %v7555_v54 = vadd.f32 %v7554_v57, %v7553_v61 }
 0x7b6   :  { %v7566_v43 = vpop.f32.mrf.mxu1 }
 0x7b7   :  { %v3366_v42 = vadd.f32 %v7555_v54, %v9324_v28  ;;  %v3412_v53 = vadd.f32 %v7566_v43, %v3363_v46  ;;  %v9676_v54 = vpop.permute.xlu1 %4312 }
 0x7b8   :  { %v3403_v23 = vpop.f32.mrf.mxu1  ;;  %11347 = vst [vmem:[#allocation25_spill] sm:$0xff] %v9676_v54 }
 0x7b9   :  { %v3404_v4 = vadd.f32 %v3403_v23, %v3355_v29  ;;  %v3420_v35 = vmax.f32 %v3412_v53, 0.0 }
 0x7ba   :  { %v7567_v62 = vpop.f32.mrf.mxu1 }
 0x7bb   :  { %v3418_v21 = vmax.f32 %v3404_v4, 0.0  ;;  %v3415_v3 = vadd.f32 %v7567_v62, %v3366_v42  ;;  %v9682_v4 = vpop.permute.xlu0 %4314 }
 0x7bc   :  { %v3406_v38 = vpop.f32.mrf.mxu1  ;;  %11348 = vst [vmem:[#allocation26_spill] sm:$0xff] %v9682_v4 }
 0x7bd   :  { %v3407_v41 = vadd.f32 %v3406_v38, %v3358_v50  ;;  %v3421_v10 = vmax.f32 %v3415_v3, 0.0  ;;  %v9688_v50 = vpop.permute.xlu1 %4316 }
 0x7be   :  { %11349 = vst [vmem:[#allocation27_spill] sm:$0xff] %v9688_v50 }
 0x7bf   :  { %v3419_v12 = vmax.f32 %v3407_v41, 0.0  ;;  %v3423_v45 = vpack.c.bf16 %v3421_v10, %v3420_v35  ;;  %v9694_v38 = vpop.permute.xlu0 %4318 }
 0x7c0   :  { %11350 = vst [vmem:[#allocation28_spill] sm:$0xff] %v9694_v38 }
 0x7c1   :  { %v3422_v34 = vpack.c.bf16 %v3419_v12, %v3418_v21 }
 0x7c3   :  { %3649 = vmatmul.mubr.bf16.vlgmr.msra.gmra.mxu0 %v3422_v34  ;;  %3702 = vmatmul.mubr.bf16.vlgmr.msra.gmra.mxu1 %v3422_v34 }
 0x7c4   :  { %6257 = vmatpush1.bf16.msra.mxu1 %v7246_v6  ;;  %3658 = vmatprep.mubr.bf16.mxu0 %v8862_v51 }
 0x7c5   :  { %3711 = vmatprep.mubr.bf16.mxu1 %v8862_v51 }
 0x7cb   :  { %3659 = vmatmul.mubr.bf16.gmra.mxu0 %v3423_v45  ;;  %3712 = vmatmul.mubr.bf16.gmra.mxu1 %v3423_v45 }
 0x883   :  { %v3650_v28 = vpop.f32.mrf.mxu0  ;;  %v9548_v30 = vpop.f32.mrf.mxu1 }
 0x884   :  { %4170 = vrot.lane.b32.xlu1 %v3650_v28, %s7881_s29 }
 0x885   :  { %v9551_v47 = vpop.f32.mrf.mxu0  ;;  %v9553_v11 = vpop.f32.mrf.mxu1 }
 0x886   :  { %11345 = vst [vmem:[#allocation23_spill] sm:$0xff] %v9553_v11  ;;  %v7424_v13 = vpack.c.bf16 %v9551_v47, %v3650_v28  ;;  %v7425_v9 = vpack.c.bf16 %v9553_v11, %v9548_v30 }
 0x887   :  { %v3654_v6 = vpop.f32.mrf.mxu0  ;;  %v9558_v31 = vpop.f32.mrf.mxu1 }
 0x888   :  { %4666 = vst [vmem:[#allocation2 + $0x2b8] sm:$0xff] %v7424_v13  ;;  %4667 = vst [vmem:[#allocation2 + $0x228] sm:$0xff] %v7425_v9  ;;  %5126 = vrot.lane.b32.xlu1 %v3650_v28, %s7877_s0  ;;  %4172 = vrot.lane.b32.xlu0 %v3654_v6, %s7881_s29 }
 0x889   :  { %v9562_v15 = vpop.f32.mrf.mxu0  ;;  %v9564_v37 = vpop.f32.mrf.mxu1 }
 0x88a   :  { %11346 = vst [vmem:[#allocation24_spill] sm:$0xff] %v9564_v37  ;;  %v7426_v55 = vpack.c.bf16 %v9562_v15, %v3654_v6  ;;  %v7427_v2 = vpack.c.bf16 %v9564_v37, %v9558_v31 }
 0x88b   :  { %v9569_v26 = vpop.f32.mrf.mxu0  ;;  %v9571_v52 = vpop.f32.mrf.mxu1 }
 0x88c   :  { %4668 = vst [vmem:[#allocation2 + $0x178] sm:$0xff] %v7426_v55  ;;  %4669 = vst [vmem:[#allocation2 + $0x200] sm:$0xff] %v7427_v2  ;;  %5142 = vrot.lane.b32.xlu1 %v9548_v30, %s7877_s0  ;;  %5128 = vrot.lane.b32.xlu0 %v3654_v6, %s7877_s0 }
 0x88d   :  { %v9576_v49 = vpop.f32.mrf.mxu0  ;;  %v9578_v33 = vpop.f32.mrf.mxu1 }
 0x88e   :  { %v7428_v61 = vpack.c.bf16 %v9576_v49, %v9569_v26  ;;  %v7429_v57 = vpack.c.bf16 %v9578_v33, %v9571_v52 }
 0x88f   :  { %v9584_v14 = vpop.f32.mrf.mxu0  ;;  %v9586_v43 = vpop.f32.mrf.mxu1 }
 0x890   :  { %4670 = vst [vmem:[#allocation2 + $0x2e8] sm:$0xff] %v7428_v61  ;;  %4671 = vst [vmem:[#allocation2 + $0x208] sm:$0xff] %v7429_v57  ;;  %3946 = vrot.lane.b32.xlu1 %v3650_v28, %s7882_s30  ;;  %5144 = vrot.lane.b32.xlu0 %v9558_v31, %s7877_s0 }
 0x891   :  { %v9591_v63 = vpop.f32.mrf.mxu0  ;;  %v9593_v23 = vpop.f32.mrf.mxu1 }
 0x892   :  { %v7430_v29 = vpack.c.bf16 %v9591_v63, %v9584_v14  ;;  %v7431_v62 = vpack.c.bf16 %v9593_v23, %v9586_v43 }
 0x894   :  { %4672 = vst [vmem:[#allocation2 + $0x2f8] sm:$0xff] %v7430_v29  ;;  %4673 = vst [vmem:[#allocation2 + $0xa8] sm:$0xff] %v7431_v62  ;;  %4902 = vrot.lane.b32.xlu1 %v3650_v28, %s7878_s26  ;;  %3948 = vrot.lane.b32.xlu0 %v3654_v6, %s7882_s30 }
 0x898   :  { %4918 = vrot.lane.b32.xlu1 %v9548_v30, %s7878_s26  ;;  %4904 = vrot.lane.b32.xlu0 %v3654_v6, %s7878_s26 }
 0x89c   :  { %3722 = vrot.lane.b32.xlu1 %v3650_v28, %s7883_s8  ;;  %4920 = vrot.lane.b32.xlu0 %v9558_v31, %s7878_s26 }
 0x8a0   :  { %4702 = vrot.lane.b32.xlu1 %v3650_v28, %s7879_s27  ;;  %3724 = vrot.lane.b32.xlu0 %v3654_v6, %s7883_s8 }
 0x8a4   :  { %4718 = vrot.lane.b32.xlu1 %v9548_v30, %s7879_s27  ;;  %4704 = vrot.lane.b32.xlu0 %v3654_v6, %s7879_s27 }
 0x8a8   :  { %5326 = vrot.lane.b32.xlu1 %v3650_v28, %s7884_s9  ;;  %4720 = vrot.lane.b32.xlu0 %v9558_v31, %s7879_s27 }
 0x8ac   :  { %5342 = vrot.lane.b32.xlu1 %v9548_v30, %s7884_s9  ;;  %5328 = vrot.lane.b32.xlu0 %v3654_v6, %s7884_s9 }
 0x8b0   :  { %4186 = vrot.lane.b32.xlu1 %v9548_v30, %s7881_s29  ;;  %5344 = vrot.lane.b32.xlu0 %v9558_v31, %s7884_s9 }
 0x8b4   :  { %4394 = vrot.lane.b32.xlu1 %v3650_v28, %s7880_s28  ;;  %4188 = vrot.lane.b32.xlu0 %v9558_v31, %s7881_s29 }
 0x8b8   :  { %3962 = vrot.lane.b32.xlu1 %v9548_v30, %s7882_s30  ;;  %4396 = vrot.lane.b32.xlu0 %v3654_v6, %s7880_s28 }
 0x8bc   :  { %4178 = vrot.lane.b32.xlu1 %v9551_v47, %s7881_s29  ;;  %3964 = vrot.lane.b32.xlu0 %v9558_v31, %s7882_s30 }
 0x8c0   :  { %4194 = vrot.lane.b32.xlu1 %v9553_v11, %s7881_s29  ;;  %4180 = vrot.lane.b32.xlu0 %v9562_v15, %s7881_s29 }
 0x8c4   :  { %5134 = vrot.lane.b32.xlu1 %v9551_v47, %s7877_s0  ;;  %4196 = vrot.lane.b32.xlu0 %v9564_v37, %s7881_s29 }
 0x8c8   :  { %3954 = vrot.lane.b32.xlu1 %v9551_v47, %s7882_s30  ;;  %5136 = vrot.lane.b32.xlu0 %v9562_v15, %s7877_s0 }
 0x8cc   :  { %3970 = vrot.lane.b32.xlu1 %v9553_v11, %s7882_s30  ;;  %3956 = vrot.lane.b32.xlu0 %v9562_v15, %s7882_s30 }
 0x8d0   :  { %4910 = vrot.lane.b32.xlu1 %v9551_v47, %s7878_s26  ;;  %3972 = vrot.lane.b32.xlu0 %v9564_v37, %s7882_s30 }
 0x8d4   :  { %3730 = vrot.lane.b32.xlu1 %v9551_v47, %s7883_s8  ;;  %4912 = vrot.lane.b32.xlu0 %v9562_v15, %s7878_s26 }
 0x8d8   :  { %3746 = vrot.lane.b32.xlu1 %v9553_v11, %s7883_s8  ;;  %3732 = vrot.lane.b32.xlu0 %v9562_v15, %s7883_s8 }
 0x8dc   :  { %4710 = vrot.lane.b32.xlu1 %v9551_v47, %s7879_s27  ;;  %3748 = vrot.lane.b32.xlu0 %v9564_v37, %s7883_s8 }
 0x8e0   :  { %5334 = vrot.lane.b32.xlu1 %v9551_v47, %s7884_s9  ;;  %4712 = vrot.lane.b32.xlu0 %v9562_v15, %s7879_s27 }
 0x8e4   :  { %4402 = vrot.lane.b32.xlu1 %v9551_v47, %s7880_s28  ;;  %5336 = vrot.lane.b32.xlu0 %v9562_v15, %s7884_s9 }
 0x8e8   :  { %4418 = vrot.lane.b32.xlu1 %v9553_v11, %s7880_s28  ;;  %4404 = vrot.lane.b32.xlu0 %v9562_v15, %s7880_s28 }
 0x8ec   :  { %4420 = vrot.lane.b32.xlu0 %v9564_v37, %s7880_s28  ;;  %4174 = vrot.lane.b32.xlu1 %v9569_v26, %s7881_s29 }
 0x8f0   :  { %5130 = vrot.lane.b32.xlu1 %v9569_v26, %s7877_s0  ;;  %4176 = vrot.lane.b32.xlu0 %v9584_v14, %s7881_s29 }
 0x8f4   :  { %5146 = vrot.lane.b32.xlu1 %v9571_v52, %s7877_s0  ;;  %5132 = vrot.lane.b32.xlu0 %v9584_v14, %s7877_s0 }
 0x8f6   :  { %v9696_v60 = vpop.permute.xlu1 %4170 }
 0x8f8   :  { %3950 = vrot.lane.b32.xlu1 %v9569_v26, %s7882_s30  ;;  %5148 = vrot.lane.b32.xlu0 %v9586_v43, %s7877_s0 }
 0x8fa   :  { %v9702_v41 = vpop.permute.xlu1 %5126  ;;  %v9704_v21 = vpop.permute.xlu0 %4172 }
 0x8fb   :  { %11351 = vst [vmem:[#allocation29_spill] sm:$0xff] %v9702_v41 }
 0x8fc   :  { %4906 = vrot.lane.b32.xlu1 %v9569_v26, %s7878_s26  ;;  %3952 = vrot.lane.b32.xlu0 %v9584_v14, %s7882_s30 }
 0x8fe   :  { %v9710_v42 = vpop.permute.xlu1 %5142  ;;  %v9712_v12 = vpop.permute.xlu0 %5128 }
 0x8ff   :  { %11352 = vst [vmem:[#allocation30_spill] sm:$0xff] %v9710_v42  ;;  %11353 = vst [vmem:[#allocation31_spill] sm:$0xff] %v9712_v12 }
 0x900   :  { %4922 = vrot.lane.b32.xlu1 %v9571_v52, %s7878_s26  ;;  %4908 = vrot.lane.b32.xlu0 %v9584_v14, %s7878_s26 }
 0x902   :  { %v9718_v46 = vpop.permute.xlu1 %3946  ;;  %v9720_v3 = vpop.permute.xlu0 %5144 }
 0x903   :  { %11354 = vst [vmem:[#allocation32_spill] sm:$0xff] %v9720_v3 }
 0x904   :  { %3726 = vrot.lane.b32.xlu1 %v9569_v26, %s7883_s8  ;;  %4924 = vrot.lane.b32.xlu0 %v9586_v43, %s7878_s26 }
 0x906   :  { %v9726_v34 = vpop.permute.xlu1 %4902  ;;  %v9728_v53 = vpop.permute.xlu0 %3948 }
 0x907   :  { %11355 = vst [vmem:[#allocation33_spill] sm:$0xff] %v9726_v34 }
 0x908   :  { %4706 = vrot.lane.b32.xlu1 %v9569_v26, %s7879_s27  ;;  %3728 = vrot.lane.b32.xlu0 %v9584_v14, %s7883_s8 }
 0x90a   :  { %v9734_v10 = vpop.permute.xlu1 %4918  ;;  %v9736_v35 = vpop.permute.xlu0 %4904 }
 0x90b   :  { %11356 = vst [vmem:[#allocation34_spill] sm:$0xff] %v9734_v10  ;;  %11357 = vst [vmem:[#allocation35_spill] sm:$0xff] %v9736_v35 }
 0x90c   :  { %4722 = vrot.lane.b32.xlu1 %v9571_v52, %s7879_s27  ;;  %4708 = vrot.lane.b32.xlu0 %v9584_v14, %s7879_s27 }
 0x90e   :  { %v9742_v45 = vpop.permute.xlu1 %3722  ;;  %v9744_v28 = vpop.permute.xlu0 %4920 }
 0x90f   :  { %11358 = vst [vmem:[#allocation36_spill] sm:$0xff] %v9744_v28 }
 0x910   :  { %5330 = vrot.lane.b32.xlu1 %v9569_v26, %s7884_s9  ;;  %4724 = vrot.lane.b32.xlu0 %v9586_v43, %s7879_s27 }
 0x912   :  { %v9750_v47 = vpop.permute.xlu1 %4702  ;;  %v9752_v13 = vpop.permute.xlu0 %3724 }
 0x913   :  { %11359 = vst [vmem:[#allocation37_spill] sm:$0xff] %v9750_v47 }
 0x914   :  { %5346 = vrot.lane.b32.xlu1 %v9571_v52, %s7884_s9  ;;  %5332 = vrot.lane.b32.xlu0 %v9584_v14, %s7884_s9 }
 0x916   :  { %v9758_v9 = vpop.permute.xlu1 %4718  ;;  %v9760_v6 = vpop.permute.xlu0 %4704 }
 0x917   :  { %11360 = vst [vmem:[#allocation38_spill] sm:$0xff] %v9758_v9  ;;  %11361 = vst [vmem:[#allocation39_spill] sm:$0xff] %v9760_v6 }
 0x918   :  { %4190 = vrot.lane.b32.xlu1 %v9571_v52, %s7881_s29  ;;  %5348 = vrot.lane.b32.xlu0 %v9586_v43, %s7884_s9 }
 0x91a   :  { %v9766_v15 = vpop.permute.xlu1 %5326  ;;  %v9768_v55 = vpop.permute.xlu0 %4720 }
 0x91b   :  { %11362 = vst [vmem:[#allocation40_spill] sm:$0xff] %v9766_v15  ;;  %11363 = vst [vmem:[#allocation41_spill] sm:$0xff] %v9768_v55 }
 0x91c   :  { %4398 = vrot.lane.b32.xlu1 %v9569_v26, %s7880_s28  ;;  %4192 = vrot.lane.b32.xlu0 %v9586_v43, %s7881_s29 }
 0x91e   :  { %v9774_v2 = vpop.permute.xlu1 %5342  ;;  %v9776_v61 = vpop.permute.xlu0 %5328 }
 0x91f   :  { %11364 = vst [vmem:[#allocation42_spill] sm:$0xff] %v9774_v2  ;;  %11365 = vst [vmem:[#allocation43_spill] sm:$0xff] %v9776_v61 }
 0x920   :  { %3966 = vrot.lane.b32.xlu1 %v9571_v52, %s7882_s30  ;;  %4400 = vrot.lane.b32.xlu0 %v9584_v14, %s7880_s28 }
 0x922   :  { %v4187_v57 = vpop.permute.xlu1 %4186  ;;  %v9782_v29 = vpop.permute.xlu0 %5344 }
 0x923   :  { %11366 = vst [vmem:[#allocation44_spill] sm:$0xff] %v9782_v29 }
 0x924   :  { %4182 = vrot.lane.b32.xlu1 %v9576_v49, %s7881_s29  ;;  %3968 = vrot.lane.b32.xlu0 %v9586_v43, %s7882_s30 }
 0x926   :  { %v9788_v26 = vpop.permute.xlu1 %4394  ;;  %v4189_v62 = vpop.permute.xlu0 %4188 }
 0x928   :  { %4198 = vrot.lane.b32.xlu1 %v9578_v33, %s7881_s29  ;;  %4184 = vrot.lane.b32.xlu0 %v9591_v63, %s7881_s29 }
 0x92a   :  { %v9794_v40 = vpop.permute.xlu1 %3962  ;;  %v9796_v14 = vpop.permute.xlu0 %4396 }
 0x92c   :  { %5138 = vrot.lane.b32.xlu1 %v9576_v49, %s7877_s0  ;;  %4200 = vrot.lane.b32.xlu0 %v9593_v23, %s7881_s29 }
 0x92e   :  { %v4179_v51 = vpop.permute.xlu1 %4178  ;;  %v9805_v36 = vpop.permute.xlu0 %3964 }
 0x92f   :  { %v4206_v7 = vsel %vm283_vm5, %v4179_v51, %v4187_v57  ;;  %v4210_v48 = vsel %vm283_vm5, %v9696_v60, %v4179_v51 }
 0x930   :  { %3958 = vrot.lane.b32.xlu1 %v9576_v49, %s7882_s30  ;;  %5140 = vrot.lane.b32.xlu0 %v9591_v63, %s7877_s0  ;;  %v9848_v54 = vmul.f32 %v9808_v16, %v4210_v48  ;;  %v4242_v0 = vmul.f32 %v9814_v56, %v4206_v7 }
 0x932   :  { %v4195_v8 = vpop.permute.xlu1 %4194  ;;  %v4181_v22 = vpop.permute.xlu0 %4180  ;;  %11367 = vst [vmem:[#allocation45_spill] sm:$0xff] %v9848_v54 }
 0x933   :  { %v4202_v4 = vsel %vm283_vm5, %v4187_v57, %v4195_v8  ;;  %v4214_v32 = vsel %vm283_vm5, %v4195_v8, %v9696_v60  ;;  %v4207_v38 = vsel %vm283_vm5, %v4181_v22, %v4189_v62  ;;  %v4211_v51 = vsel %vm283_vm5, %v9704_v21, %v4181_v22 }
 0x934   :  { %v9852_v50 = vmul.f32 %v9821_v59, %v4214_v32  ;;  %v4243_v57 = vmul.f32 %v9824_v27, %v4202_v4  ;;  %3974 = vrot.lane.b32.xlu1 %v9578_v33, %s7882_s30  ;;  %3960 = vrot.lane.b32.xlu0 %v9591_v63, %s7882_s30  ;;  %v9862_v48 = vmul.f32 %v9808_v16, %v4211_v51 }
 0x935   :  { %v4246_v7 = vmul.f32 %v9814_v56, %v4207_v38 }
 0x936   :  { %11368 = vst [vmem:[#allocation46_spill] sm:$0xff] %v9852_v50  ;;  %v7400_v8 = vpack.c.bf16 %v9848_v54, %v9852_v50  ;;  %v7401_v22 = vpack.c.bf16 %v4243_v57, %v4242_v0  ;;  %11369 = vst [vmem:[#allocation47_spill] sm:$0xff] %v9862_v48  ;;  %v5135_v60 = vpop.permute.xlu1 %5134  ;;  %v4197_v32 = vpop.permute.xlu0 %4196 }
 0x937   :  { %v5162_v4 = vsel %vm533_vm1, %v5135_v60, %v9710_v42  ;;  %v5166_v37 = vsel %vm533_vm1, %v9702_v41, %v5135_v60  ;;  %v4203_v11 = vsel %vm283_vm5, %v4189_v62, %v4197_v32  ;;  %v4215_v51 = vsel %vm283_vm5, %v4197_v32, %v9704_v21  ;;  %v7040_v21 = vld [vmem:[%s11196_s3 + $0x1] ss:$8 sm:$0xf] }
 0x938   :  { %4304 = vst [vmem:[#allocation2 + $0x190] sm:$0xff] %v7400_v8  ;;  %4305 = vst [vmem:[#allocation2 + $0x250] sm:$0xff] %v7401_v22  ;;  %v9877_v38 = vmul.f32 %v9832_v39, %v5166_v37  ;;  %v9880_v0 = vmul.f32 %v9835_v44, %v5162_v4  ;;  %v9883_v57 = vmul.f32 %v9821_v59, %v4215_v51  ;;  %4914 = vrot.lane.b32.xlu1 %v9576_v49, %s7878_s26 }
 0x939   :  { %v4247_v60 = vmul.f32 %v9824_v27, %v4203_v11  ;;  %3976 = vrot.lane.b32.xlu0 %v9593_v23, %s7882_s30  ;;  %v9896_v32 = vrot.slane %v7040_v21, %v8036_v25  ;;  %v9899_v11 = vrot.slane %v7040_v21, %v8024_v19 }
 0x93a   :  { %11370 = vst [vmem:[#allocation48_spill] sm:$0xff] %v9883_v57  ;;  %v7402_v37 = vpack.c.bf16 %v9862_v48, %v9883_v57  ;;  %v3955_v8 = vpop.permute.xlu1 %3954  ;;  %v5137_v22 = vpop.permute.xlu0 %5136 }
 0x93b   :  { %v7403_v62 = vpack.c.bf16 %v4247_v60, %v4246_v7  ;;  %v5163_v4 = vsel %vm533_vm1, %v5137_v22, %v9720_v3  ;;  %v5167_v51 = vsel %vm533_vm1, %v9712_v12, %v5137_v22  ;;  %v7108_v7 = vld [vmem:[%s11196_s3 + $0x6] ss:$8 sm:$0xf]  ;;  %v9919_v3 = vrot.slane %v7040_v21, %v8033_v24 }
 0x93c   :  { %4306 = vst [vmem:[#allocation2 + $0x8] sm:$0xff] %v7402_v37  ;;  %v9911_v60 = vmul.f32 %v9832_v39, %v5167_v51  ;;  %v9914_v41 = vmul.f32 %v9835_v44, %v5163_v4  ;;  %3734 = vrot.lane.b32.xlu1 %v9576_v49, %s7883_s8  ;;  %v9922_v22 = vrot.slane %v7040_v21, %v8027_v20 }
 0x93d   :  { %4307 = vst [vmem:[#allocation2 + $0x120] sm:$0xff] %v7403_v62  ;;  %v3982_v37 = vsel %vm225_vm6, %v3955_v8, %v9794_v40  ;;  %v3986_v62 = vsel %vm225_vm6, %v9718_v46, %v3955_v8  ;;  %4916 = vrot.lane.b32.xlu0 %v9591_v63, %s7878_s26  ;;  %v9937_v42 = vrot.slane %v7108_v7, %v8033_v24 }
 0x93e   :  { %v3971_v12 = vpop.permute.xlu1 %3970  ;;  %v3957_v21 = vpop.permute.xlu0 %3956  ;;  %v9940_v20 = vrot.slane %v7108_v7, %v8036_v25  ;;  %v9955_v50 = vmul.f32 %v9896_v32, %v3986_v62  ;;  %v4018_v7 = vmul.f32 %v9899_v11, %v3982_v37 }
 0x93f   :  { %v3978_v8 = vsel %vm225_vm6, %v9794_v40, %v3971_v12  ;;  %v3990_v19 = vsel %vm225_vm6, %v3971_v12, %v9718_v46  ;;  %v3983_v4 = vsel %vm225_vm6, %v3957_v21, %v9805_v36  ;;  %v3987_v51 = vsel %vm225_vm6, %v9728_v53, %v3957_v21 }
 0x940   :  { %v9959_v57 = vmul.f32 %v9919_v3, %v3990_v19  ;;  %v4019_v40 = vmul.f32 %v9922_v22, %v3978_v8  ;;  %3750 = vrot.lane.b32.xlu1 %v9578_v33, %s7883_s8  ;;  %v9973_v19 = vmul.f32 %v9896_v32, %v3987_v51  ;;  %v4022_v21 = vmul.f32 %v9899_v11, %v3983_v4 }
 0x941   :  { %3736 = vrot.lane.b32.xlu0 %v9591_v63, %s7883_s8 }
 0x942   :  { %11371 = vst [vmem:[#allocation49_spill] sm:$0xff] %v9959_v57  ;;  %v7388_v37 = vpack.c.bf16 %v9955_v50, %v9959_v57  ;;  %v7389_v62 = vpack.c.bf16 %v4019_v40, %v4018_v7  ;;  %v4911_v8 = vpop.permute.xlu1 %4910  ;;  %v3973_v54 = vpop.permute.xlu0 %3972 }
 0x943   :  { %v4938_v48 = vsel %vm475_vm2, %v4911_v8, %v9734_v10  ;;  %v4942_v12 = vsel %vm475_vm2, %v9726_v34, %v4911_v8  ;;  %v3979_v46 = vsel %vm225_vm6, %v9805_v36, %v3973_v54  ;;  %v3991_v51 = vsel %vm225_vm6, %v3973_v54, %v9728_v53  ;;  %v10003_v36 = vld [vmem:[%s11196_s3] ss:$8 sm:$0xf] }
 0x944   :  { %4080 = vst [vmem:[#allocation2 + $0x18] sm:$0xff] %v7388_v37  ;;  %4081 = vst [vmem:[#allocation2 + $0x2c8] sm:$0xff] %v7389_v62  ;;  %v9989_v4 = vmul.f32 %v9937_v42, %v4942_v12  ;;  %v9992_v7 = vmul.f32 %v9940_v20, %v4938_v48  ;;  %v9995_v40 = vmul.f32 %v9919_v3, %v3991_v51  ;;  %4714 = vrot.lane.b32.xlu1 %v9576_v49, %s7879_s27 }
 0x945   :  { %v4023_v8 = vmul.f32 %v9922_v22, %v3979_v46  ;;  %11374 = vst [vmem:[#allocation52_spill] sm:$0xff] %v10003_v36  ;;  %3752 = vrot.lane.b32.xlu0 %v9593_v23, %s7883_s8  ;;  %v10013_v46 = vrot.slane %v10003_v36, %v8036_v25 }
 0x946   :  { %11372 = vst [vmem:[#allocation50_spill] sm:$0xff] %v9989_v4  ;;  %11373 = vst [vmem:[#allocation51_spill] sm:$0xff] %v9992_v7  ;;  %v7390_v54 = vpack.c.bf16 %v9973_v19, %v9995_v40  ;;  %v10009_v48 = vpop.permute.xlu1 %3730  ;;  %v4913_v12 = vpop.permute.xlu0 %4912 }
 0x947   :  { %v7391_v53 = vpack.c.bf16 %v4023_v8, %v4022_v21  ;;  %11375 = vst [vmem:[#allocation53_spill] sm:$0xff] %v10009_v48  ;;  %v4939_v37 = vsel %vm475_vm2, %v4913_v12, %v9744_v28  ;;  %v4943_v62 = vsel %vm475_vm2, %v9736_v35, %v4913_v12  ;;  %v10031_v8 = vrot.slane %v10003_v36, %v8033_v24  ;;  %v10036_v28 = vld [vmem:[%s11196_s3 + $0x5] ss:$8 sm:$0xf] }
 0x948   :  { %4082 = vst [vmem:[#allocation2 + $0x318] sm:$0xff] %v7390_v54  ;;  %v10022_v51 = vmul.f32 %v9937_v42, %v4943_v62  ;;  %v10025_v21 = vmul.f32 %v9940_v20, %v4939_v37  ;;  %4324 = vrot.lane.b32.xlu1 %v8712_v17, %s7881_s29  ;;  %11377 = vst [vmem:[#allocation55_spill] sm:$0xff] %v10036_v28  ;;  %v10058_v35 = vrot.slane %v10036_v28, %v8033_v24  ;;  %v7136_v12 = vld [vmem:[%s11196_s3 + $0x20] ss:$8 sm:$0xf] }
 0x949   :  { %4083 = vst [vmem:[#allocation2 + $0x20] sm:$0xff] %v7391_v53  ;;  %v3762_v53 = vsel %vm168_vm7, %v9742_v45, %v10009_v48  ;;  %4716 = vrot.lane.b32.xlu0 %v9591_v63, %s7879_s27  ;;  %v10062_v34 = vrot.slane %v10036_v28, %v8036_v25  ;;  %v10090_v57 = vrot.slane %v7136_v12, %v8033_v24 }
 0x94a   :  { %11376 = vst [vmem:[#allocation54_spill] sm:$0xff] %v10022_v51  ;;  %v10048_v37 = vpop.permute.xlu1 %3746  ;;  %v10050_v62 = vpop.permute.xlu0 %3732  ;;  %v10068_v10 = vmul.f32 %v10013_v46, %v3762_v53  ;;  %v10103_v4 = vrot.slane %v7136_v12, %v8036_v25 }
 0x94b   :  { %11378 = vst [vmem:[#allocation56_spill] sm:$0xff] %v10048_v37  ;;  %11379 = vst [vmem:[#allocation57_spill] sm:$0xff] %v10050_v62  ;;  %v3766_v54 = vsel %vm168_vm7, %v10048_v37, %v9742_v45  ;;  %v3763_v37 = vsel %vm168_vm7, %v9752_v13, %v10050_v62 }
 0x94c   :  { %11380 = vst [vmem:[#allocation58_spill] sm:$0xff] %v10068_v10  ;;  %v10071_v48 = vmul.f32 %v10031_v8, %v3766_v54  ;;  %5338 = vrot.lane.b32.xlu1 %v9576_v49, %s7884_s9  ;;  %11383 = vst [vmem:[#allocation61_spill] sm:$0xff] %v10090_v57  ;;  %v10106_v51 = vmul.f32 %v10013_v46, %v3763_v37 }
 0x94d   :  { %4326 = vrot.lane.b32.xlu0 %v8723_v5, %s7881_s29  ;;  %11384 = vst [vmem:[#allocation62_spill] sm:$0xff] %v10103_v4 }
 0x94e   :  { %11381 = vst [vmem:[#allocation59_spill] sm:$0xff] %v10071_v48  ;;  %v7376_v54 = vpack.c.bf16 %v10068_v10, %v10071_v48  ;;  %v4711_v53 = vpop.permute.xlu1 %4710  ;;  %v10087_v36 = vpop.permute.xlu0 %3748  ;;  %11385 = vst [vmem:[#allocation63_spill] sm:$0xff] %v10106_v51 }
 0x94f   :  { %11382 = vst [vmem:[#allocation60_spill] sm:$0xff] %v10087_v36  ;;  %v4738_v45 = vsel %vm417_vm3, %v4711_v53, %v9758_v9  ;;  %v4742_v28 = vsel %vm417_vm3, %v9750_v47, %v4711_v53  ;;  %v3767_v62 = vsel %vm168_vm7, %v10087_v36, %v9752_v13  ;;  %v7722_v47 = vld [vmem:[%s11194_s1 + $0xcc] ss:$16 sps:$4 sm:$0xff]  }
 0x950   :  { %3856 = vst [vmem:[#allocation2 + $0x2b0] sm:$0xff] %v7376_v54  ;;  %v10109_v7 = vmul.f32 %v10058_v35, %v4742_v28  ;;  %v10112_v9 = vmul.f32 %v10062_v34, %v4738_v45  ;;  %v10115_v53 = vmul.f32 %v10031_v8, %v3767_v62  ;;  %4406 = vrot.lane.b32.xlu1 %v9576_v49, %s7880_s28 }
 0x951   :  { %5340 = vrot.lane.b32.xlu0 %v9591_v63, %s7884_s9  ;;  %7262 = vmatprep.mubr.msk.bf16.mxu1 %vm6209_vm10, %v7722_v47 }
 0x952   :  { %11386 = vst [vmem:[#allocation64_spill] sm:$0xff] %v10109_v7  ;;  %11387 = vst [vmem:[#allocation65_spill] sm:$0xff] %v10112_v9  ;;  %v7436_v13 = vpack.c.bf16 %v10112_v9, %v10109_v7  ;;  %v7378_v12 = vpack.c.bf16 %v10106_v51, %v10115_v53  ;;  %v5335_v28 = vpop.permute.xlu1 %5334  ;;  %v4713_v37 = vpop.permute.xlu0 %4712 }
 0x953   :  { %11388 = vst [vmem:[#allocation66_spill] sm:$0xff] %v10115_v53  ;;  %v5362_v45 = vsel %vm591_vm8, %v5335_v28, %v9774_v2  ;;  %v5366_v62 = vsel %vm591_vm8, %v9766_v15, %v5335_v28  ;;  %v4739_v49 = vsel %vm417_vm3, %v4713_v37, %v9768_v55  ;;  %v4743_v54 = vsel %vm417_vm3, %v9760_v6, %v4713_v37 }
 0x954   :  { %4836 = vst [vmem:[#allocation2 + $0xb8] sm:$0xff] %v7436_v13  ;;  %3858 = vst [vmem:[#allocation2 + $0x10] sm:$0xff] %v7378_v12  ;;  %v10141_v2 = vmul.f32 %v10090_v57, %v5366_v62  ;;  %v10144_v36 = vmul.f32 %v10103_v4, %v5362_v45  ;;  %v10147_v28 = vmul.f32 %v10058_v35, %v4743_v54  ;;  %4422 = vrot.lane.b32.xlu1 %v9578_v33, %s7880_s28  ;;  %v7068_v13 = vld [vmem:[%s11196_s3 + $0x3] ss:$8 sm:$0xf] }
 0x955   :  { %v10150_v15 = vmul.f32 %v10062_v34, %v4739_v49  ;;  %3874 = vrot.lane.b32.xlu0 %v8718_v1, %s7883_s8  ;;  %v10168_v54 = vrot.slane %v7068_v13, %v8036_v25  ;;  %v10186_v48 = vrot.slane %v7068_v13, %v8033_v24 }
 0x956   :  { %11389 = vst [vmem:[#allocation67_spill] sm:$0xff] %v10141_v2  ;;  %11390 = vst [vmem:[#allocation68_spill] sm:$0xff] %v10144_v36  ;;  %v10165_v62 = vpop.permute.xlu1 %4402  ;;  %v5337_v49 = vpop.permute.xlu0 %5336 }
 0x957   :  { %11391 = vst [vmem:[#allocation69_spill] sm:$0xff] %v10147_v28  ;;  %11392 = vst [vmem:[#allocation70_spill] sm:$0xff] %v10150_v15  ;;  %v7438_v45 = vpack.c.bf16 %v10150_v15, %v10147_v28  ;;  %v5363_v6 = vsel %vm591_vm8, %v5337_v49, %v9782_v29  ;;  %v5367_v12 = vsel %vm591_vm8, %v9776_v61, %v5337_v49 }
 0x958   :  { %11393 = vst [vmem:[#allocation71_spill] sm:$0xff] %v10165_v62  ;;  %11394 = vst [vmem:[#allocation72_spill] sm:$0xff] %v10168_v54  ;;  %v10178_v37 = vmul.f32 %v10090_v57, %v5367_v12  ;;  %v10181_v55 = vmul.f32 %v10103_v4, %v5363_v6  ;;  %3872 = vrot.lane.b32.xlu1 %v8708_v58, %s7883_s8  ;;  %v4434_v47 = vsel %vm341_vm4, %v9788_v26, %v10165_v62 }
 0x959   :  { %4838 = vst [vmem:[#allocation2 + $0x140] sm:$0xff] %v7438_v45  ;;  %11397 = vst [vmem:[#allocation75_spill] sm:$0xff] %v10186_v48  ;;  %3744 = vrot.lane.b32.xlu0 %v9586_v43, %s7883_s8  ;;  %v4465_v49 = vmul.f32 %v10168_v54, %v4434_v47 }
 0x95a   :  { %11395 = vst [vmem:[#allocation73_spill] sm:$0xff] %v10178_v37  ;;  %11396 = vst [vmem:[#allocation74_spill] sm:$0xff] %v10181_v55  ;;  %v10198_v12 = vpop.permute.xlu1 %4418  ;;  %v10200_v45 = vpop.permute.xlu0 %4404 }
 0x95b   :  { %11398 = vst [vmem:[#allocation76_spill] sm:$0xff] %v10198_v12  ;;  %11399 = vst [vmem:[#allocation77_spill] sm:$0xff] %v10200_v45  ;;  %v4438_v13 = vsel %vm341_vm4, %v10198_v12, %v9788_v26  ;;  %v4435_v62 = vsel %vm341_vm4, %v9796_v14, %v10200_v45 }
 0x95c   :  { %v4464_v29 = vmul.f32 %v10186_v48, %v4438_v13  ;;  %3742 = vrot.lane.b32.xlu1 %v9571_v52, %s7883_s8  ;;  %v4469_v6 = vmul.f32 %v10168_v54, %v4435_v62  ;;  %v11403_v62 = vld [vmem:[#allocation24_spill] sm:$0xff] }
 0x95d   :  { %3740 = vrot.lane.b32.xlu0 %v9558_v31, %s7883_s8 }
 0x95e   :  { %v7412_v26 = vpack.c.bf16 %v4465_v49, %v4464_v29  ;;  %v10220_v47 = vpop.permute.xlu0 %4420  ;;  %v10222_v13 = vpop.permute.xlu1 %4174 }
 0x95f   :  { %11400 = vst [vmem:[#allocation78_spill] sm:$0xff] %v10220_v47  ;;  %v4439_v61 = vsel %vm341_vm4, %v10220_v47, %v9796_v14 }
 0x960   :  { %4528 = vst [vmem:[#allocation2 + $0x1d0] sm:$0xff] %v7412_v26  ;;  %v4468_v12 = vmul.f32 %v10186_v48, %v4439_v61  ;;  %5154 = vrot.lane.b32.xlu1 %v9578_v33, %s7877_s0  ;;  %v10260_v26 = vld [vmem:[%s11194_s1 + $0xc4] ss:$16 sps:$4 sm:$0xff]  }
 0x961   :  { %4408 = vrot.lane.b32.xlu0 %v9591_v63, %s7880_s28  ;;  %v11402_v63 = vld [vmem:[#allocation23_spill] sm:$0xff]  ;;  %6245 = vmatprep.mubr.bf16.mxu0 %v10260_v26 }
 0x962   :  { %v10234_v29 = vpack.c.bf16 %v4469_v6, %v4468_v12  ;;  %v10236_v49 = vpop.permute.xlu1 %5130  ;;  %v10238_v45 = vpop.permute.xlu0 %4176  ;;  %11404 = vst [vmem:[#allocation23_spill] sm:$0xff] %v10260_v26 }
 0x964   :  { %11401 = vst [vmem:[#allocation79_spill] sm:$0xff] %v10234_v29  ;;  %4530 = vst [vmem:[#allocation2 + $0x2d8] sm:$0xff] %v10234_v29  ;;  %3738 = vrot.lane.b32.xlu1 %v9548_v30, %s7883_s8 }
 0x965   :  { %4424 = vrot.lane.b32.xlu0 %v9593_v23, %s7880_s28 }
 0x966   :  { %v10245_v61 = vpop.permute.xlu1 %5146  ;;  %v10247_v14 = vpop.permute.xlu0 %5132 }
 0x968   :  { %5150 = vrot.lane.b32.xlu1 %v11402_v63, %s7877_s0 }
 0x969   :  { %5152 = vrot.lane.b32.xlu0 %v11403_v62, %s7877_s0 }
 0x96a   :  { %v10253_v6 = vpop.permute.xlu1 %3950  ;;  %v10255_v12 = vpop.permute.xlu0 %5148 }
 0x96c   :  { %4726 = vrot.lane.b32.xlu1 %v11402_v63, %s7879_s27 }
 0x96d   :  { %4728 = vrot.lane.b32.xlu0 %v11403_v62, %s7879_s27 }
 0x96e   :  { %v10267_v47 = vpop.permute.xlu1 %4906  ;;  %v10269_v29 = vpop.permute.xlu0 %3952 }
 0x970   :  { %5056 = vrot.lane.b32.xlu1 %v8712_v17, %s7878_s26 }
 0x971   :  { %5058 = vrot.lane.b32.xlu0 %v8723_v5, %s7878_s26 }
 0x972   :  { %v10275_v2 = vpop.permute.xlu1 %4922  ;;  %v10277_v37 = vpop.permute.xlu0 %4908 }
 0x974   :  { %4930 = vrot.lane.b32.xlu1 %v9578_v33, %s7878_s26 }
 0x975   :  { %5156 = vrot.lane.b32.xlu0 %v9593_v23, %s7877_s0 }
 0x976   :  { %v10283_v26 = vpop.permute.xlu1 %3726  ;;  %v10285_v36 = vpop.permute.xlu0 %4924 }
 0x978   :  { %4926 = vrot.lane.b32.xlu1 %v11402_v63, %s7878_s26 }
 0x979   :  { %4928 = vrot.lane.b32.xlu0 %v11403_v62, %s7878_s26 }
 0x97a   :  { %v10291_v17 = vpop.permute.xlu1 %4706  ;;  %v10293_v5 = vpop.permute.xlu0 %3728 }
 0x97c   :  { %4544 = vrot.lane.b32.xlu1 %v8708_v58, %s7880_s28 }
 0x97d   :  { %4546 = vrot.lane.b32.xlu0 %v8718_v1, %s7880_s28 }
 0x97e   :  { %v10299_v55 = vpop.permute.xlu1 %4722  ;;  %v10301_v7 = vpop.permute.xlu0 %4708 }
 0x97f   :  { %11405 = vst [vmem:[#allocation24_spill] sm:$0xff] %v10301_v7 }
 0x980   :  { %4730 = vrot.lane.b32.xlu1 %v9578_v33, %s7879_s27 }
 0x981   :  { %4932 = vrot.lane.b32.xlu0 %v9593_v23, %s7878_s26 }
 0x982   :  { %v10307_v28 = vpop.permute.xlu1 %5330  ;;  %v10309_v48 = vpop.permute.xlu0 %4724 }
 0x983   :  { %11406 = vst [vmem:[#allocation80_spill] sm:$0xff] %v10307_v28  ;;  %11407 = vst [vmem:[#allocation81_spill] sm:$0xff] %v10309_v48 }
 0x984   :  { %4414 = vrot.lane.b32.xlu1 %v9571_v52, %s7880_s28 }
 0x985   :  { %4416 = vrot.lane.b32.xlu0 %v9586_v43, %s7880_s28 }
 0x986   :  { %v10315_v54 = vpop.permute.xlu1 %5346  ;;  %v10317_v9 = vpop.permute.xlu0 %5332 }
 0x987   :  { %11408 = vst [vmem:[#allocation82_spill] sm:$0xff] %v10315_v54  ;;  %11409 = vst [vmem:[#allocation83_spill] sm:$0xff] %v10317_v9 }
 0x988   :  { %4410 = vrot.lane.b32.xlu1 %v9548_v30, %s7880_s28 }
 0x989   :  { %4412 = vrot.lane.b32.xlu0 %v9558_v31, %s7880_s28 }
 0x98a   :  { %v4191_v15 = vpop.permute.xlu1 %4190  ;;  %v10323_v53 = vpop.permute.xlu0 %5348 }
 0x98b   :  { %11410 = vst [vmem:[#allocation84_spill] sm:$0xff] %v10323_v53 }
 0x98c   :  { %5354 = vrot.lane.b32.xlu1 %v9578_v33, %s7884_s9  ;;  %v5638_v33 = vld [vmem:[%s11195_s2 + $0x60] sm:$0xff] }
 0x98d   :  { %4732 = vrot.lane.b32.xlu0 %v9593_v23, %s7879_s27 }
 0x98e   :  { %v10329_v52 = vpop.permute.xlu1 %4398  ;;  %v4193_v43 = vpop.permute.xlu0 %4192 }
 0x98f   :  { %11411 = vst [vmem:[#allocation85_spill] sm:$0xff] %v10329_v52 }
 0x990   :  { %4320 = vrot.lane.b32.xlu1 %v8708_v58, %s7881_s29 }
 0x991   :  { %4322 = vrot.lane.b32.xlu0 %v8718_v1, %s7881_s29 }
 0x992   :  { %v3967_v30 = vpop.permute.xlu1 %3966  ;;  %v10335_v31 = vpop.permute.xlu0 %4400 }
 0x993   :  { %11412 = vst [vmem:[#allocation86_spill] sm:$0xff] %v10335_v31 }
 0x994   :  { %5350 = vrot.lane.b32.xlu1 %v11402_v63, %s7884_s9 }
 0x995   :  { %5356 = vrot.lane.b32.xlu0 %v9593_v23, %s7884_s9  ;;  %v6398_v23 = vld [vmem:[%s11195_s2 + $0x70] sm:$0x7] }
 0x996   :  { %v4183_v52 = vpop.permute.xlu1 %4182  ;;  %v10344_v9 = vpop.permute.xlu0 %3968 }
 0x997   :  { %v4208_v58 = vsel %vm283_vm5, %v4183_v52, %v4191_v15  ;;  %v4212_v1 = vsel %vm283_vm5, %v10222_v13, %v4183_v52 }
 0x998   :  { %5642 = vperm.xlu1 %7586, %v5638_v33   ;;  %v5639_v33 = vld [vmem:[%s11195_s2 + $0x68] sm:$0xff]  ;;  %v4249_v51 = vmul.f32 %v9808_v16, %v4212_v1  ;;  %v10371_v4 = vmul.f32 %v9814_v56, %v4208_v58 }
 0x999   :  { %5352 = vrot.lane.b32.xlu0 %v11403_v62, %s7884_s9 }
 0x99a   :  { %v4199_v63 = vpop.permute.xlu1 %4198  ;;  %v4185_v31 = vpop.permute.xlu0 %4184 }
 0x99b   :  { %v4204_v53 = vsel %vm283_vm5, %v4191_v15, %v4199_v63  ;;  %v4216_v52 = vsel %vm283_vm5, %v4199_v63, %v10222_v13  ;;  %v4209_v62 = vsel %vm283_vm5, %v4185_v31, %v4193_v43  ;;  %v4213_v10 = vsel %vm283_vm5, %v10238_v45, %v4185_v31 }
 0x99c   :  { %v4248_v57 = vmul.f32 %v9821_v59, %v4216_v52  ;;  %v10375_v15 = vmul.f32 %v9824_v27, %v4204_v53  ;;  %6401 = vperm.xlu1 %7586, %v6398_v23   ;;  %v4253_v28 = vmul.f32 %v9808_v16, %v4213_v10  ;;  %v10381_v31 = vmul.f32 %v9814_v56, %v4209_v62 }
 0x99d   :  { %5647 = vperm.xlu0 %7585, %v5639_v33  }
 0x99e   :  { %v7404_v13 = vpack.c.bf16 %v4249_v51, %v4248_v57  ;;  %v7405_v63 = vpack.c.bf16 %v10375_v15, %v10371_v4  ;;  %11413 = vst [vmem:[#allocation87_spill] sm:$0xff] %v10381_v31  ;;  %v5139_v1 = vpop.permute.xlu1 %5138  ;;  %v4201_v54 = vpop.permute.xlu0 %4200 }
 0x99f   :  { %v5164_v58 = vsel %vm533_vm1, %v5139_v1, %v10245_v61  ;;  %v5168_v53 = vsel %vm533_vm1, %v10236_v49, %v5139_v1  ;;  %v4205_v23 = vsel %vm283_vm5, %v4193_v43, %v4201_v54  ;;  %v4217_v16 = vsel %vm283_vm5, %v4201_v54, %v10238_v45 }
 0x9a0   :  { %4308 = vst [vmem:[#allocation2 + $0x1d8] sm:$0xff] %v7404_v13  ;;  %4309 = vst [vmem:[#allocation2 + $0x248] sm:$0xff] %v7405_v63  ;;  %v5204_v56 = vmul.f32 %v9832_v39, %v5168_v53  ;;  %v5205_v10 = vmul.f32 %v9835_v44, %v5164_v58  ;;  %v4252_v33 = vmul.f32 %v9821_v59, %v4217_v16 }
 0x9a1   :  { %v10398_v52 = vmul.f32 %v9824_v27, %v4205_v23  ;;  %v7822_v58 = vpack.c.bf16 %v4253_v28, %v4249_v51 }
 0x9a2   :  { %v7406_v62 = vpack.c.bf16 %v4253_v28, %v4252_v33  ;;  %v3959_v1 = vpop.permute.xlu1 %3958  ;;  %v5141_v31 = vpop.permute.xlu0 %5140  ;;  %v7821_v63 = vpack.c.bf16 %v4252_v33, %v4248_v57  ;;  %v11414_v28 = vld [vmem:[#allocation47_spill] sm:$0xff] }
 0x9a3   :  { %v5165_v43 = vsel %vm533_vm1, %v5141_v31, %v10255_v12  ;;  %v5169_v54 = vsel %vm533_vm1, %v10247_v14, %v5141_v31  ;;  %v3988_v45 = vsel %vm225_vm6, %v10253_v6, %v3959_v1  ;;  %v3984_v13 = vsel %vm225_vm6, %v3959_v1, %v3967_v30  ;;  %6213 = vmatprep.subr.bf16.mxu0 %v7822_v58 }
 0x9a4   :  { %4310 = vst [vmem:[#allocation2 + $0x280] sm:$0xff] %v7406_v62  ;;  %v5208_v59 = vmul.f32 %v9832_v39, %v5169_v54  ;;  %v5209_v27 = vmul.f32 %v9835_v44, %v5165_v43  ;;  %v4025_v23 = vmul.f32 %v9896_v32, %v3988_v45  ;;  %v10420_v39 = vmul.f32 %v9899_v11, %v3984_v13 }
 0x9a5   :  { %6214 = vmatpush1.bf16.msra.mxu0 %v7821_v63 }
 0x9a6   :  { %v3975_v53 = vpop.permute.xlu1 %3974  ;;  %v3961_v62 = vpop.permute.xlu0 %3960  ;;  %v7824_v1 = vpack.c.bf16 %v5209_v27, %v5205_v10 }
 0x9a7   :  { %v3980_v31 = vsel %vm225_vm6, %v3967_v30, %v3975_v53  ;;  %v3992_v16 = vsel %vm225_vm6, %v3975_v53, %v10253_v6  ;;  %v3989_v51 = vsel %vm225_vm6, %v10269_v29, %v3961_v62  ;;  %v11415_v30 = vld [vmem:[#allocation45_spill] sm:$0xff]  ;;  %v7823_v6 = vpack.c.bf16 %v5208_v59, %v5204_v56 }
 0x9a8   :  { %v4024_v44 = vmul.f32 %v9919_v3, %v3992_v16  ;;  %v10424_v57 = vmul.f32 %v9922_v22, %v3980_v31  ;;  %v11416_v33 = vpack.c.bf16 %v11414_v28, %v11415_v30  ;;  %v3985_v45 = vsel %vm225_vm6, %v3961_v62, %v10344_v9  ;;  %6258 = vmatprep.subr.bf16.mxu1 %v7824_v1  ;;  %v7710_v59 = vld [vmem:[#allocation2 + $0x2d4] ss:$112 sps:$4 sm:$0xff]   ;;  %v11417_v16 = vld [vmem:[#allocation48_spill] sm:$0xff]  ;;  %v11418_v62 = vld [vmem:[#allocation46_spill] sm:$0xff] }
 0x9a9   :  { %v4029_v58 = vmul.f32 %v9896_v32, %v3989_v51  ;;  %v11419_v51 = vpack.c.bf16 %v11417_v16, %v11418_v62  ;;  %v10456_v28 = vmul.f32 %v9899_v11, %v3985_v45  ;;  %6259 = vmatpush1.bf16.msra.mxu1 %v7823_v6  ;;  %v5612_v1 = vld [vmem:[#allocation2 + $0x50] sm:$0xff]  ;;  %v11421_v45 = vpack.c.bf16 %v9911_v60, %v9877_v38 }
 0x9aa   :  { %6215 = vmatprep.subr.bf16.mxu0 %v11416_v33  ;;  %v7392_v43 = vpack.c.bf16 %v4025_v23, %v4024_v44  ;;  %v7393_v54 = vpack.c.bf16 %v10424_v57, %v10420_v39  ;;  %v4915_v13 = vpop.permute.xlu1 %4914  ;;  %v11422_v60 = vpack.c.bf16 %v9973_v19, %v9955_v50 }
 0x9ab   :  { %v4940_v63 = vsel %vm475_vm2, %v4915_v13, %v10275_v2  ;;  %v4944_v56 = vsel %vm475_vm2, %v10267_v47, %v4915_v13  ;;  %v3977_v10 = vpop.permute.xlu0 %3976  ;;  %6216 = vmatpush1.bf16.msra.mxu0 %v11419_v51 }
 0x9ac   :  { %4084 = vst [vmem:[#allocation2 + $0x2c0] sm:$0xff] %v7392_v43  ;;  %4085 = vst [vmem:[#allocation2 + $0x188] sm:$0xff] %v7393_v54  ;;  %v4980_v27 = vmul.f32 %v9937_v42, %v4944_v56  ;;  %v4981_v53 = vmul.f32 %v9940_v20, %v4940_v63  ;;  %v3981_v32 = vsel %vm225_vm6, %v10344_v9, %v3977_v10  ;;  %6217 = vmatprep.subr.bf16.mxu0 %v7710_v59  ;;  %v7708_v43 = vld [vmem:[#allocation2 + $0x2d0] ss:$112 sps:$4 sm:$0xff]  }
 0x9ad   :  { %v3993_v31 = vsel %vm225_vm6, %v3977_v10, %v10269_v29  ;;  %v10460_v33 = vmul.f32 %v9922_v22, %v3981_v32  ;;  %v11420_v29 = vpack.c.bf16 %v9914_v41, %v9880_v0  ;;  %v5610_v63 = vld [vmem:[#allocation2 + $0x70] sm:$0xff]  ;;  %v7826_v10 = vpack.c.bf16 %v4029_v58, %v4025_v23 }
 0x9ae   :  { %v4028_v30 = vmul.f32 %v9919_v3, %v3993_v31  ;;  %v10462_v9 = vpop.permute.xlu1 %3734  ;;  %v7235_v6 = vcombine.high %v5610_v63, %v5612_v1  ;;  %v7234_v16 = vcombine.low %v5610_v63, %v5612_v1  ;;  %v11424_v1 = vld [vmem:[#allocation25_spill] sm:$0xff] }
 0x9af   :  { %6260 = vmatprep.subr.bf16.mxu1 %v11420_v29  ;;  %v4917_v13 = vpop.permute.xlu0 %4916  ;;  %v3764_v3 = vsel %vm168_vm7, %v10283_v26, %v10462_v9  ;;  %6218 = vmatpush1.bf16.msra.mxu0 %v7708_v43  ;;  %v11425_v63 = vld [vmem:[#allocation49_spill] sm:$0xff] }
 0x9b0   :  { %v7394_v54 = vpack.c.bf16 %v4029_v58, %v4028_v30  ;;  %v4941_v11 = vsel %vm475_vm2, %v4917_v13, %v10285_v36  ;;  %v4945_v22 = vsel %vm475_vm2, %v10277_v37, %v4917_v13  ;;  %6261 = vmatpush1.bf16.msra.mxu1 %v11421_v45  ;;  %v7825_v56 = vpack.c.bf16 %v4028_v30, %v4024_v44  ;;  %v11423_v30 = vld [vmem:[#allocation27_spill] sm:$0xff] }
 0x9b1   :  { %v4984_v41 = vmul.f32 %v9937_v42, %v4945_v22  ;;  %v4985_v0 = vmul.f32 %v9940_v20, %v4941_v11  ;;  %6262 = vmatprep.subr.bf16.mxu1 %v7235_v6  ;;  %6219 = vmatprep.subr.bf16.mxu0 %v7826_v10  ;;  %v10493_v20 = vld [vmem:[%s11196_s3 + $0x2] ss:$8 sm:$0xf]  ;;  %v3801_v42 = vmul.f32 %v10013_v46, %v3764_v3 }
 0x9b2   :  { %4086 = vst [vmem:[#allocation2 + $0x198] sm:$0xff] %v7394_v54  ;;  %v10482_v59 = vpop.permute.xlu1 %3750  ;;  %v4345_v51 = vrot.slane %v10493_v20, %v8036_v25  ;;  %v4332_v43 = vsel %vm283_vm5, %v11424_v1, %v11423_v30  ;;  %v4341_v13 = vrot.slane %v10493_v20, %v8033_v24  ;;  %v11426_v3 = vpack.c.bf16 %v9995_v40, %v11425_v63  ;;  %v5600_v11 = vld [vmem:[#allocation2 + $0x1f8] sm:$0xff] }
 0x9b3   :  { %v3768_v32 = vsel %vm168_vm7, %v10482_v59, %v10283_v26  ;;  %v10488_v31 = vpop.permute.xlu0 %3736  ;;  %6220 = vmatpush1.bf16.msra.mxu0 %v7825_v56  ;;  %v7827_v26 = vpack.c.bf16 %v4984_v41, %v4980_v27  ;;  %v7828_v23 = vpack.c.bf16 %v4985_v0, %v4981_v53  ;;  %v7713_v53 = vld [vmem:[#allocation2 + $0x84] ss:$184 sps:$4 sm:$0xff]   ;;  %v7711_v45 = vld [vmem:[#allocation2 + $0x80] ss:$184 sps:$4 sm:$0xff]  }
 0x9b4   :  { %v10497_v38 = vmul.f32 %v10031_v8, %v3768_v32  ;;  %6263 = vmatpush1.bf16.msra.mxu1 %v7234_v16  ;;  %6221 = vmatprep.subr.bf16.mxu0 %v11422_v60  ;;  %v3765_v58 = vsel %vm168_vm7, %v10293_v5, %v10488_v31  ;;  %v5598_v24 = vld [vmem:[#allocation2 + $0x358] sm:$0xff]  ;;  %v10542_v10 = vmul.f32 %v4345_v51, %v4332_v43  ;;  %v11430_v16 = vld [vmem:[#allocation28_spill] sm:$0xff] }
 0x9b5   :  { %6264 = vmatprep.subr.bf16.mxu1 %v7828_v23  ;;  %v3805_v22 = vmul.f32 %v10013_v46, %v3765_v58  ;;  %v7223_v32 = vcombine.high %v5598_v24, %v5600_v11  ;;  %v11431_v60 = vld [vmem:[#allocation26_spill] sm:$0xff] }
 0x9b6   :  { %v7380_v44 = vpack.c.bf16 %v3801_v42, %v10497_v38  ;;  %v4715_v62 = vpop.permute.xlu1 %4714  ;;  %v11433_v43 = vld [vmem:[#allocation50_spill] sm:$0xff] }
 0x9b7   :  { %v4740_v50 = vsel %vm417_vm3, %v4715_v62, %v10299_v55  ;;  %v4744_v19 = vsel %vm417_vm3, %v10291_v17, %v4715_v62  ;;  %v10519_v27 = vpop.permute.xlu0 %3752  ;;  %6222 = vmatpush1.bf16.msra.mxu0 %v11426_v3  ;;  %v5580_v30 = vld [vmem:[#allocation2 + $0x178] sm:$0xff] }
 0x9b8   :  { %3860 = vst [vmem:[#allocation2 + $0x320] sm:$0xff] %v7380_v44  ;;  %v10522_v25 = vmul.f32 %v10058_v35, %v4744_v19  ;;  %v4781_v29 = vmul.f32 %v10062_v34, %v4740_v50  ;;  %v3769_v54 = vsel %vm168_vm7, %v10519_v27, %v10293_v5  ;;  %6265 = vmatpush1.bf16.msra.mxu1 %v7827_v26  ;;  %v11428_v5 = vld [vmem:[#allocation51_spill] sm:$0xff] }
 0x9b9   :  { %v3804_v6 = vmul.f32 %v10031_v8, %v3769_v54  ;;  %6223 = vmatprep.subr.bf16.mxu0 %v7713_v53  ;;  %v11429_v56 = vpack.c.bf16 %v10025_v21, %v11428_v5  ;;  %v4333_v26 = vsel %vm283_vm5, %v11431_v60, %v11430_v16  ;;  %v7830_v53 = vpack.c.bf16 %v3805_v22, %v3801_v42  ;;  %v11438_v42 = vld [vmem:[#allocation61_spill] sm:$0xff] }
 0x9ba   :  { %v7440_v41 = vpack.c.bf16 %v4781_v29, %v10522_v25  ;;  %v10537_v0 = vpop.permute.xlu1 %4324 }
 0x9bb   :  { %11427 = vst [vmem:[#allocation47_spill] sm:$0xff] %v10537_v0  ;;  %6266 = vmatprep.subr.bf16.mxu1 %v11429_v56  ;;  %v7382_v40 = vpack.c.bf16 %v3805_v22, %v3804_v6  ;;  %v4334_v46 = vsel %vm283_vm5, %v10537_v0, %v11424_v1  ;;  %v4717_v8 = vpop.permute.xlu0 %4716  ;;  %6224 = vmatpush1.bf16.msra.mxu0 %v7711_v45  ;;  %v11432_v1 = vld [vmem:[#allocation54_spill] sm:$0xff]  ;;  %v11462_v0 = vld [vmem:[#allocation17_spill] sm:$0xff] }
 0x9bc   :  { %4840 = vst [vmem:[#allocation2 + $0x90] sm:$0xff] %v7440_v41  ;;  %v10552_v23 = vmul.f32 %v4341_v13, %v4334_v46  ;;  %v4741_v21 = vsel %vm417_vm3, %v4717_v8, %v10309_v48  ;;  %v4745_v44 = vsel %vm417_vm3, %v10301_v7, %v4717_v8  ;;  %v11434_v50 = vpack.c.bf16 %v11432_v1, %v11433_v43  ;;  %v11435_v41 = vld [vmem:[#allocation82_spill] sm:$0xff]  ;;  %v5636_v8 = vld [vmem:[#allocation2 + $0x130] sm:$0xff]  ;;  %v11482_v7 = vld [vmem:[#allocation31_spill] sm:$0xff] }
 0x9bd   :  { %3862 = vst [vmem:[#allocation2 + $0xf8] sm:$0xff] %v7382_v40  ;;  %v4784_v58 = vmul.f32 %v10058_v35, %v4745_v44  ;;  %v4785_v62 = vmul.f32 %v10062_v34, %v4741_v21  ;;  %v7829_v19 = vpack.c.bf16 %v3804_v6, %v10497_v38  ;;  %v11436_v35 = vld [vmem:[#allocation80_spill] sm:$0xff]  ;;  %v7222_v56 = vcombine.low %v5598_v24, %v5600_v11  ;;  %v11439_v6 = vld [vmem:[#allocation62_spill] sm:$0xff]  ;;  %v11440_v11 = vld [vmem:[#allocation63_spill] sm:$0xff] }
 0x9be   :  { %6267 = vmatpush1.bf16.msra.mxu1 %v11434_v50  ;;  %v7408_v54 = vpack.c.bf16 %v10542_v10, %v10552_v23  ;;  %v5339_v63 = vpop.permute.xlu1 %5338  ;;  %6225 = vmatprep.subr.bf16.mxu0 %v7830_v53  ;;  %v10576_v38 = vmul.f32 %v4345_v51, %v4333_v26  ;;  %v11441_v51 = vld [vmem:[#allocation58_spill] sm:$0xff]  ;;  %v5634_v1 = vld [vmem:[#allocation2 + $0x1f0] sm:$0xff]  ;;  %v11444_v53 = vld [vmem:[#allocation83_spill] sm:$0xff] }
 0x9bf   :  { %6268 = vmatprep.subr.bf16.mxu1 %v7223_v32  ;;  %v7442_v3 = vpack.c.bf16 %v4785_v62, %v4784_v58  ;;  %v5364_v45 = vsel %vm591_vm8, %v5339_v63, %v11435_v41  ;;  %v5368_v34 = vsel %vm591_vm8, %v11436_v35, %v5339_v63  ;;  %v10574_v5 = vpop.permute.xlu0 %4326  ;;  %6226 = vmatpush1.bf16.msra.mxu0 %v7829_v19  ;;  %v11443_v19 = vld [vmem:[#allocation84_spill] sm:$0xff] }
 0x9c0   :  { %11437 = vst [vmem:[#allocation45_spill] sm:$0xff] %v10574_v5  ;;  %4390 = vst [vmem:[#allocation2 + $0x158] sm:$0xff] %v7408_v54  ;;  %v10579_v22 = vmul.f32 %v11438_v42, %v5368_v34  ;;  %v5405_v40 = vmul.f32 %v11439_v6, %v5364_v45  ;;  %v4335_v46 = vsel %vm283_vm5, %v10574_v5, %v11431_v60  ;;  %v11448_v45 = vld [vmem:[#allocation59_spill] sm:$0xff] }
 0x9c1   :  { %4842 = vst [vmem:[#allocation2 + $0x218] sm:$0xff] %v7442_v3  ;;  %v10586_v32 = vmul.f32 %v4341_v13, %v4335_v46  ;;  %v11442_v24 = vpack.c.bf16 %v11440_v11, %v11441_v51  ;;  %v7831_v26 = vpack.c.bf16 %v4784_v58, %v10522_v25  ;;  %v7832_v21 = vpack.c.bf16 %v4785_v62, %v4781_v29  ;;  %v7761_v25 = vld [vmem:[%s11196_s3] ss:$8 sm:$0xf] }
 0x9c2   :  { %6269 = vmatpush1.bf16.msra.mxu1 %v7222_v56  ;;  %v10592_v44 = vpop.permute.xlu1 %4406  ;;  %v7259_v50 = vcombine.high %v5634_v1, %v5636_v8  ;;  %v11445_v29 = vld [vmem:[#allocation4_spill] sm:$0xff]  ;;  %v11446_v62 = vld [vmem:[#allocation5_spill] sm:$0xff]  ;;  %v11447_v3 = vld [vmem:[#allocation66_spill] sm:$0xff] }
 0x9c3   :  { %6227 = vmatprep.subr.bf16.mxu0 %v11442_v24  ;;  %v7410_v43 = vpack.c.bf16 %v10576_v38, %v10586_v32  ;;  %v5341_v60 = vpop.permute.xlu0 %5340  ;;  %6270 = vmatprep.subr.bf16.mxu1 %v7832_v21  ;;  %v3901_v58 = vrot.slane %v7761_v25, %v11445_v29  ;;  %v3905_v63 = vrot.slane %v7761_v25, %v11446_v62  ;;  %v11450_v56 = vld [vmem:[#allocation85_spill] sm:$0xff]  ;;  %v11451_v24 = vld [vmem:[#allocation70_spill] sm:$0xff] }
 0x9c4   :  { %v5365_v13 = vsel %vm591_vm8, %v5341_v60, %v11443_v19  ;;  %v5369_v54 = vsel %vm591_vm8, %v11444_v53, %v5341_v60  ;;  %v11449_v34 = vpack.c.bf16 %v11447_v3, %v11448_v45  ;;  %v4436_v46 = vsel %vm341_vm4, %v11450_v56, %v10592_v44  ;;  %v11452_v21 = vld [vmem:[#allocation65_spill] sm:$0xff]  ;;  %v11454_v45 = vld [vmem:[#allocation52_spill] sm:$0xff] }
 0x9c5   :  { %4392 = vst [vmem:[#allocation2 + $0xc0] sm:$0xff] %v7410_v43  ;;  %v5408_v11 = vmul.f32 %v11438_v42, %v5369_v54  ;;  %v5409_v51 = vmul.f32 %v11439_v6, %v5365_v13  ;;  %v11453_v60 = vpack.c.bf16 %v11451_v24, %v11452_v21  ;;  %v7258_v53 = vcombine.low %v5634_v1, %v5636_v8  ;;  %v11455_v13 = vld [vmem:[#allocation72_spill] sm:$0xff]  ;;  %v11456_v8 = vld [vmem:[#allocation75_spill] sm:$0xff]  ;;  %v11459_v21 = vld [vmem:[#allocation69_spill] sm:$0xff] }
 0x9c6   :  { %6228 = vmatpush1.bf16.msra.mxu0 %v11449_v34  ;;  %6271 = vmatpush1.bf16.msra.mxu1 %v7831_v26  ;;  %v10619_v25 = vpop.permute.xlu1 %4422  ;;  %v10627_v42 = vrot.slane %v11454_v45, %v11445_v29  ;;  %v10631_v6 = vrot.slane %v11454_v45, %v11446_v62  ;;  %v7716_v26 = vld [vmem:[#allocation2 + $0x274] ss:$-400 sps:$4 sm:$0xff]   ;;  %v10634_v54 = vmul.f32 %v11455_v13, %v4436_v46 }
 0x9c7   :  { %6229 = vmatprep.subr.bf16.mxu0 %v11453_v60  ;;  %6282 = vmatprep.subr.bf16.mxu1 %v7259_v50  ;;  %v4440_v43 = vsel %vm341_vm4, %v10619_v25, %v11450_v56  ;;  %v3875_v3 = vpop.permute.xlu0 %3874  ;;  %v11457_v50 = vld [vmem:[#allocation18_spill] sm:$0xff]  ;;  %v11458_v56 = vld [vmem:[#allocation16_spill] sm:$0xff]  ;;  %v7833_v46 = vpack.c.bf16 %v5408_v11, %v10579_v22  ;;  %v7834_v5 = vpack.c.bf16 %v5409_v51, %v5405_v40 }
 0x9c8   :  { %v10637_v1 = vmul.f32 %v11456_v8, %v4440_v43  ;;  %v3881_v34 = vsel %vm168_vm7, %v3875_v3, %v11457_v50  ;;  %v3883_v24 = vsel %vm168_vm7, %v11458_v56, %v3875_v3  ;;  %v11460_v60 = vld [vmem:[#allocation64_spill] sm:$0xff]  ;;  %v11463_v56 = vld [vmem:[#allocation15_spill] sm:$0xff]  ;;  %v5578_v51 = vld [vmem:[#allocation2 + $0x2b8] sm:$0xff] }
 0x9c9   :  { %v11461_v19 = vpack.c.bf16 %v11459_v21, %v11460_v60  ;;  %v10648_v45 = vmul.f32 %v3901_v58, %v3883_v24  ;;  %v10650_v16 = vmul.f32 %v3905_v63, %v3881_v34  ;;  %v7714_v24 = vld [vmem:[#allocation2 + $0x270] ss:$-400 sps:$4 sm:$0xff]  }
 0x9ca   :  { %6283 = vmatpush2.bf16.msra.mxu1 %v7258_v53  ;;  %v7416_v43 = vpack.c.bf16 %v10634_v54, %v10637_v1  ;;  %v3873_v50 = vpop.permute.xlu1 %3872 }
 0x9cb   :  { %6230 = vmatpush2.bf16.msra.mxu0 %v11461_v19  ;;  %v3880_v3 = vsel %vm168_vm7, %v3873_v50, %v11462_v0  ;;  %v3882_v19 = vsel %vm168_vm7, %v11463_v56, %v3873_v50  ;;  %v3745_v34 = vpop.permute.xlu0 %3744  ;;  %6284 = vmatprep.subr.bf16.mxu1 %v7834_v5  ;;  %v7719_v0 = vld [vmem:[#allocation2 + $0x2ec] ss:$16 sps:$4 sm:$0xff]  }
 0x9cc   :  { %6231 = vmatprep.subr.bf16.mxu0 %v7716_v26  ;;  %4532 = vst [vmem:[#allocation2 + $0x1a8] sm:$0xff] %v7416_v43  ;;  %v10661_v53 = vmul.f32 %v3901_v58, %v3882_v19  ;;  %v10663_v22 = vmul.f32 %v3905_v63, %v3880_v3  ;;  %v3757_v40 = vsel %vm168_vm7, %v3745_v34, %v10519_v27  ;;  %v11464_v43 = vld [vmem:[#allocation74_spill] sm:$0xff]  ;;  %v11465_v50 = vld [vmem:[#allocation68_spill] sm:$0xff] }
 0x9cd   :  { %v3761_v11 = vsel %vm168_vm7, %v10488_v31, %v3745_v34  ;;  %v10675_v21 = vmul.f32 %v10631_v6, %v3757_v40  ;;  %v7203_v58 = vcombine.high %v5578_v51, %v5580_v30  ;;  %v7762_v31 = vld [vmem:[%s11196_s3 + $0x7] ss:$8 sm:$0xf]  ;;  %v11466_v3 = vpack.c.bf16 %v11464_v43, %v11465_v50  ;;  %v7717_v34 = vld [vmem:[#allocation2 + $0x2e8] ss:$16 sps:$4 sm:$0xff]  }
 0x9ce   :  { %v10672_v26 = vmul.f32 %v10627_v42, %v3761_v11  ;;  %6285 = vmatpush2.bf16.msra.mxu1 %v7833_v46  ;;  %v7385_v63 = vpack.c.bf16 %v10663_v22, %v10661_v53  ;;  %v3743_v27 = vpop.permute.xlu1 %3742  ;;  %v10683_v5 = vrot.slane %v7762_v31, %v11445_v29  ;;  %v10686_v60 = vrot.slane %v7762_v31, %v11446_v62  ;;  %v11468_v31 = vld [vmem:[#allocation57_spill] sm:$0xff]  ;;  %v11471_v43 = vld [vmem:[#allocation67_spill] sm:$0xff] }
 0x9cf   :  { %6232 = vmatpush2.bf16.msra.mxu0 %v7714_v24  ;;  %6286 = vmatprep.subr.bf16.mxu1 %v11466_v3  ;;  %v3756_v46 = vsel %vm168_vm7, %v3743_v27, %v10482_v59  ;;  %v3760_v56 = vsel %vm168_vm7, %v10462_v9, %v3743_v27  ;;  %v3741_v19 = vpop.permute.xlu0 %3740  ;;  %v7835_v24 = vpack.c.bf16 %v10398_v52, %v10375_v15  ;;  %v10714_v27 = vld [vmem:[%s11194_s1 + $0xc8] ss:$16 sps:$4 sm:$0xff]  }
 0x9d0   :  { %6233 = vmatprep.subr.bf16.mxu0 %v7719_v0  ;;  %3943 = vst [vmem:[#allocation2 + $0x308] sm:$0xff] %v7385_v63  ;;  %v10700_v40 = vmul.f32 %v10627_v42, %v3760_v56  ;;  %v10703_v11 = vmul.f32 %v10631_v6, %v3756_v46  ;;  %v11467_v0 = vld [vmem:[#allocation60_spill] sm:$0xff]  ;;  %v3759_v9 = vsel %vm168_vm7, %v11468_v31, %v3741_v19  ;;  %11469 = vst [vmem:[#allocation48_spill] sm:$0xff] %v10714_v27  ;;  %v11470_v63 = vld [vmem:[#allocation73_spill] sm:$0xff] }
 0x9d1   :  { %v3755_v59 = vsel %vm168_vm7, %v3741_v19, %v11467_v0  ;;  %v10717_v15 = vmul.f32 %v10627_v42, %v3759_v9  ;;  %v11472_v50 = vpack.c.bf16 %v11470_v63, %v11471_v43  ;;  %v7202_v56 = vcombine.low %v5578_v51, %v5580_v30  ;;  %v7725_v51 = vld [vmem:[#allocation2 + $0x1cc] ss:$208 sps:$4 sm:$0xff]   ;;  %v11476_v43 = vld [vmem:[#allocation53_spill] sm:$0xff] }
 0x9d2   :  { %v10720_v52 = vmul.f32 %v10631_v6, %v3755_v59  ;;  %v7381_v3 = vpack.c.bf16 %v10703_v11, %v10700_v40  ;;  %v5155_v46 = vpop.permute.xlu1 %5154  ;;  %v11473_v59 = vld [vmem:[#allocation87_spill] sm:$0xff] }
 0x9d3   :  { %6234 = vmatpush2.bf16.msra.mxu0 %v7717_v34  ;;  %6287 = vmatpush2.bf16.msra.mxu1 %v11472_v50  ;;  %v5160_v19 = vsel %vm533_vm1, %v10245_v61, %v5155_v46  ;;  %v5172_v0 = vsel %vm533_vm1, %v5155_v46, %v10236_v49  ;;  %v10733_v34 = vpop.permute.xlu0 %4408  ;;  %v7836_v31 = vpack.c.bf16 %v11473_v59, %v10371_v4  ;;  %v7728_v61 = vld [vmem:[#allocation2 + $0x254] ss:$-304 sps:$4 sm:$0xff]   ;;  %v11474_v49 = vld [vmem:[#allocation86_spill] sm:$0xff]  ;;  %v11475_v4 = vld [vmem:[#allocation56_spill] sm:$0xff] }
 0x9d4   :  { %6235 = vmatprep.subr.bf16.mxu0 %v7203_v58  ;;  %6299 = vmatprep.subr.bf16.mxu1 %v7835_v24  ;;  %3861 = vst [vmem:[#allocation2 + $0x38] sm:$0xff] %v7381_v3  ;;  %v10738_v9 = vmul.f32 %v10683_v5, %v5160_v19  ;;  %v10741_v30 = vmul.f32 %v10686_v60, %v5172_v0  ;;  %v7723_v46 = vld [vmem:[#allocation2 + $0x1c8] ss:$208 sps:$4 sm:$0xff]   ;;  %v11477_v19 = vld [vmem:[#allocation23_spill] sm:$0xff] }
 0x9d5   :  { %v4437_v58 = vsel %vm341_vm4, %v11474_v49, %v10733_v34 }
 0x9d6   :  { %6289 = vmatmul.mubr.bf16.vlgmr.msra.gmra.mxu1 %v10714_v27  ;;  %v3739_v24 = vpop.permute.xlu1 %3738  ;;  %v11481_v27 = vld [vmem:[#allocation32_spill] sm:$0xff] }
 0x9d7   :  { %6236 = vmatpush2.bf16.msra.mxu0 %v7202_v56  ;;  %6300 = vmatpush1.bf16.msra.mxu1 %v7836_v31  ;;  %v3754_v63 = vsel %vm168_vm7, %v3739_v24, %v11475_v4  ;;  %v3758_v50 = vsel %vm168_vm7, %v11476_v43, %v3739_v24  ;;  %v10754_v3 = vpop.permute.xlu0 %4424  ;;  %v7726_v56 = vld [vmem:[#allocation2 + $0x250] ss:$-304 sps:$4 sm:$0xff]   ;;  %v11524_v18 = vld [vmem:[#allocation48_spill] sm:$0xff] }
 0x9d8   :  { %6237 = vmatprep.subr.bf16.mxu0 %v7725_v51  ;;  %6301 = vmatprep.subr.bf16.mxu1 %v7728_v61  ;;  %v10758_v0 = vmul.f32 %v10627_v42, %v3758_v50  ;;  %v10761_v59 = vmul.f32 %v10631_v6, %v3754_v63  ;;  %v4441_v31 = vsel %vm341_vm4, %v10754_v3, %v11474_v49  ;;  %v7731_v51 = vld [vmem:[#allocation2 + $0x26c] ss:$-344 sps:$4 sm:$0xff]   ;;  %v11478_v43 = vld [vmem:[#allocation55_spill] sm:$0xff]  ;;  %v11479_v50 = vld [vmem:[#allocation30_spill] sm:$0xff] }
 0x9d9   :  { %6331 = vmatprep.mubr.bf16.mxu1 %v11477_v19  ;;  %v4477_v61 = vmul.f32 %v11455_v13, %v4437_v58  ;;  %v4476_v24 = vmul.f32 %v11456_v8, %v4441_v31  ;;  %v10773_v6 = vrot.slane %v11478_v43, %v11445_v29  ;;  %v10777_v63 = vrot.slane %v11478_v43, %v11446_v62  ;;  %v11480_v8 = vld [vmem:[#allocation29_spill] sm:$0xff] }
 0x9da   :  { %v7377_v4 = vpack.c.bf16 %v10761_v59, %v10758_v0  ;;  %v5151_v42 = vpop.permute.xlu1 %5150  ;;  %v7837_v19 = vpack.c.bf16 %v10460_v33, %v10424_v57  ;;  %v5566_v31 = vld [vmem:[#allocation2 + $0x1d0] sm:$0xff] }
 0x9db   :  { %6238 = vmatpush2.bf16.msra.mxu0 %v7723_v46  ;;  %6302 = vmatpush1.bf16.msra.mxu1 %v7726_v56  ;;  %v7418_v49 = vpack.c.bf16 %v4477_v61, %v4476_v24  ;;  %v5158_v13 = vsel %vm533_vm1, %v11479_v50, %v5151_v42  ;;  %v5170_v58 = vsel %vm533_vm1, %v5151_v42, %v11480_v8  ;;  %v5153_v46 = vpop.permute.xlu0 %5152  ;;  %v7729_v56 = vld [vmem:[#allocation2 + $0x268] ss:$-344 sps:$4 sm:$0xff]  }
 0x9dc   :  { %6303 = vmatprep.subr.bf16.mxu1 %v7731_v51  ;;  %3857 = vst [vmem:[#allocation2 + $0xd0] sm:$0xff] %v7377_v4  ;;  %v10788_v43 = vmul.f32 %v10683_v5, %v5158_v13  ;;  %v10791_v51 = vmul.f32 %v10686_v60, %v5170_v58  ;;  %v5159_v50 = vsel %vm533_vm1, %v11481_v27, %v5153_v46  ;;  %v7763_v27 = vld [vmem:[%s11196_s3 + $0x6] ss:$8 sm:$0xf] }
 0x9dd   :  { %v5171_v42 = vsel %vm533_vm1, %v5153_v46, %v11482_v7  ;;  %4534 = vst [vmem:[#allocation2 + $0x328] sm:$0xff] %v7418_v49  ;;  %v10800_v8 = vmul.f32 %v10683_v5, %v5159_v50  ;;  %v7838_v33 = vpack.c.bf16 %v4476_v24, %v10637_v1  ;;  %v7839_v4 = vpack.c.bf16 %v4477_v61, %v10634_v54  ;;  %v11483_v49 = vld [vmem:[#allocation79_spill] sm:$0xff]  ;;  %v11484_v50 = vld [vmem:[#allocation38_spill] sm:$0xff] }
 0x9de   :  { %v10803_v57 = vmul.f32 %v10686_v60, %v5171_v42  ;;  %v4727_v13 = vpop.permute.xlu1 %4726  ;;  %v5081_v58 = vrot.slane %v7763_v27, %v11445_v29  ;;  %v5085_v7 = vrot.slane %v7763_v27, %v11446_v62  ;;  %v7191_v46 = vcombine.high %v5566_v31, %v11483_v49  ;;  %v11485_v42 = vld [vmem:[#allocation37_spill] sm:$0xff] }
 0x9df   :  { %6304 = vmatpush1.bf16.msra.mxu1 %v7729_v56  ;;  %v4734_v56 = vsel %vm417_vm3, %v11484_v50, %v4727_v13  ;;  %v4746_v54 = vsel %vm417_vm3, %v4727_v13, %v11485_v42  ;;  %v4729_v1 = vpop.permute.xlu0 %4728  ;;  %v7840_v61 = vpack.c.bf16 %v10456_v28, %v10420_v39  ;;  %6239 = vmatprep.subr.bf16.mxu0 %v7839_v4  ;;  %v11486_v27 = vld [vmem:[#allocation41_spill] sm:$0xff]  ;;  %v11487_v50 = vld [vmem:[#allocation39_spill] sm:$0xff] }
 0x9e0   :  { %6305 = vmatprep.subr.bf16.mxu1 %v7837_v19  ;;  %v10822_v24 = vmul.f32 %v10773_v6, %v4734_v56  ;;  %v10825_v19 = vmul.f32 %v10777_v63, %v4746_v54  ;;  %v4735_v48 = vsel %vm417_vm3, %v11486_v27, %v4729_v1  ;;  %v4747_v35 = vsel %vm417_vm3, %v4729_v1, %v11487_v50  ;;  %v7734_v13 = vld [vmem:[#allocation2 + $0x2cc] ss:$-680 sps:$4 sm:$0xff]  }
 0x9e1   :  { %6240 = vmatpush2.bf16.msra.mxu0 %v7838_v33  ;;  %v10834_v42 = vmul.f32 %v10773_v6, %v4735_v48  ;;  %v10837_v39 = vmul.f32 %v10777_v63, %v4747_v35  ;;  %v7190_v28 = vcombine.low %v5566_v31, %v11483_v49  ;;  %v7764_v56 = vld [vmem:[%s11196_s3 + $0x6] ss:$8 sm:$0xf]  ;;  %v7841_v48 = vpack.c.bf16 %v10576_v38, %v10542_v10 }
 0x9e2   :  { %6241 = vmatprep.subr.bf16.mxu0 %v7191_v46  ;;  %v5057_v4 = vpop.permute.xlu1 %5056  ;;  %v10844_v54 = vrot.slane %v7764_v56, %v11445_v29  ;;  %v10847_v33 = vrot.slane %v7764_v56, %v11446_v62  ;;  %v11488_v35 = vld [vmem:[#allocation13_spill] sm:$0xff]  ;;  %v7842_v27 = vpack.c.bf16 %v10650_v16, %v10663_v22  ;;  %v11491_v38 = vld [vmem:[#allocation12_spill] sm:$0xff]  ;;  %v7843_v22 = vpack.c.bf16 %v10586_v32, %v10552_v23 }
 0x9e3   :  { %6306 = vmatpush1.bf16.msra.mxu1 %v7840_v61  ;;  %v5060_v31 = vsel %vm475_vm2, %v11488_v35, %v5057_v4  ;;  %v11489_v49 = vld [vmem:[#allocation9_spill] sm:$0xff]  ;;  %v5059_v1 = vpop.permute.xlu0 %5058  ;;  %v7732_v61 = vld [vmem:[#allocation2 + $0x2c8] ss:$-680 sps:$4 sm:$0xff]  }
 0x9e4   :  { %6307 = vmatprep.subr.bf16.mxu1 %v7734_v13  ;;  %v5066_v46 = vsel %vm475_vm2, %v5057_v4, %v11489_v49  ;;  %v10859_v50 = vmul.f32 %v5081_v58, %v5060_v31  ;;  %v11490_v13 = vld [vmem:[#allocation14_spill] sm:$0xff]  ;;  %v5067_v35 = vsel %vm475_vm2, %v5059_v1, %v11491_v38  ;;  %v7844_v31 = vpack.c.bf16 %v10648_v45, %v10661_v53  ;;  %v10888_v23 = vld [vmem:[%s11194_s1 + $0xc0] ss:$16 sps:$4 sm:$0xff]  }
 0x9e5   :  { %v10861_v56 = vmul.f32 %v5085_v7, %v5066_v46  ;;  %v5061_v10 = vsel %vm475_vm2, %v11490_v13, %v5059_v1  ;;  %6242 = vmatpush2.bf16.msra.mxu0 %v7190_v28  ;;  %v10871_v4 = vmul.f32 %v5085_v7, %v5067_v35  ;;  %v7845_v28 = vpack.c.bf16 %v10675_v21, %v10703_v11  ;;  %v7765_v46 = vld [vmem:[%s11196_s3 + $0x3] ss:$8 sm:$0xf] }
 0x9e6   :  { %v10869_v41 = vmul.f32 %v5081_v58, %v5061_v10  ;;  %6243 = vmatprep.subr.bf16.mxu0 %v7841_v48  ;;  %v4931_v16 = vpop.permute.xlu1 %4930  ;;  %v7737_v48 = vld [vmem:[#allocation2 + $0x2c] ss:$592 sps:$4 sm:$0xff]   ;;  %v4573_v1 = vrot.slane %v7765_v46, %v11445_v29  ;;  %v7847_v38 = vpack.c.bf16 %v10720_v52, %v10761_v59 }
 0x9e7   :  { %6308 = vmatpush1.bf16.msra.mxu1 %v7732_v61  ;;  %v4936_v49 = vsel %vm475_vm2, %v10275_v2, %v4931_v16  ;;  %v4948_v58 = vsel %vm475_vm2, %v4931_v16, %v10267_v47  ;;  %v5157_v7 = vpop.permute.xlu0 %5156  ;;  %v7846_v61 = vpack.c.bf16 %v10672_v26, %v10700_v40  ;;  %v11494_v40 = vld [vmem:[#allocation36_spill] sm:$0xff] }
 0x9e8   :  { %6309 = vmatprep.subr.bf16.mxu1 %v7842_v27  ;;  %v10891_v32 = vmul.f32 %v10844_v54, %v4936_v49  ;;  %v10894_v45 = vmul.f32 %v10847_v33, %v4948_v58  ;;  %v5161_v2 = vsel %vm533_vm1, %v10255_v12, %v5157_v7  ;;  %v5173_v47 = vsel %vm533_vm1, %v5157_v7, %v10247_v14  ;;  %v7735_v14 = vld [vmem:[#allocation2 + $0x28] ss:$592 sps:$4 sm:$0xff]  }
 0x9e9   :  { %6244 = vmatpush2.bf16.msra.mxu0 %v7843_v22  ;;  %v5210_v53 = vmul.f32 %v10683_v5, %v5161_v2  ;;  %v5211_v21 = vmul.f32 %v10686_v60, %v5173_v47  ;;  %v4577_v12 = vrot.slane %v7765_v46, %v11446_v62  ;;  %v11492_v27 = vld [vmem:[#allocation34_spill] sm:$0xff]  ;;  %v11493_v60 = vld [vmem:[#allocation33_spill] sm:$0xff]  ;;  %v11495_v22 = vld [vmem:[#allocation35_spill] sm:$0xff] }
 0x9ea   :  { %6342 = vmatprep.subr.bf16.mxu0 %v7737_v48  ;;  %v4927_v11 = vpop.permute.xlu1 %4926  ;;  %v7851_v48 = vpack.c.bf16 %v10803_v57, %v10791_v51  ;;  %v7766_v2 = vld [vmem:[%s11194_s1 + $0xcc] ss:$16 sps:$4 sm:$0xff]   ;;  %v11496_v47 = vld [vmem:[#allocation21_spill] sm:$0xff] }
 0x9eb   :  { %6310 = vmatpush1.bf16.msra.mxu1 %v7844_v31  ;;  %v4934_v5 = vsel %vm475_vm2, %v11492_v27, %v4927_v11  ;;  %v4946_v13 = vsel %vm475_vm2, %v4927_v11, %v11493_v60  ;;  %v4929_v10 = vpop.permute.xlu0 %4928  ;;  %v7848_v59 = vpack.c.bf16 %v5210_v53, %v10738_v9  ;;  %v7849_v58 = vpack.c.bf16 %v5211_v21, %v10741_v30  ;;  %v11497_v53 = vld [vmem:[#allocation19_spill] sm:$0xff]  ;;  %v11498_v57 = vld [vmem:[#allocation22_spill] sm:$0xff]  ;;  %v11499_v46 = vld [vmem:[#allocation20_spill] sm:$0xff] }
 0x9ec   :  { %6311 = vmatprep.subr.bf16.mxu1 %v7845_v28  ;;  %6246 = vmatmul.mubr.bf16.vlgmr.msra.gmra.mxu0 %v10888_v23  ;;  %v10921_v35 = vmul.f32 %v10844_v54, %v4934_v5  ;;  %v10924_v26 = vmul.f32 %v10847_v33, %v4946_v13  ;;  %v4935_v16 = vsel %vm475_vm2, %v11494_v40, %v4929_v10 }
 0x9ed   :  { %v4947_v31 = vsel %vm475_vm2, %v4929_v10, %v11495_v22  ;;  %6343 = vmatpush1.bf16.msra.mxu0 %v7735_v14  ;;  %v10933_v49 = vmul.f32 %v10844_v54, %v4935_v16  ;;  %v7850_v28 = vpack.c.bf16 %v10717_v15, %v10758_v0  ;;  %7263 = vmatprep.mubr.msk.bf16.mxu0 %vm6209_vm10, %v7766_v2  ;;  %v11501_v22 = vld [vmem:[#allocation6_spill] sm:$0xff]  ;;  %v11504_v2 = vld [vmem:[#allocation7_spill] sm:$0xff] }
 0x9ee   :  { %v10936_v52 = vmul.f32 %v10847_v33, %v4947_v31  ;;  %v4545_v7 = vpop.permute.xlu1 %4544  ;;  %6344 = vmatprep.subr.bf16.mxu0 %v7849_v58  ;;  %v7852_v15 = vpack.c.bf16 %v10837_v39, %v10825_v19  ;;  %v7767_v19 = vld [vmem:[%s11196_s3 + $0x3] ss:$8 sm:$0xf]  ;;  %v7853_v13 = vpack.c.bf16 %v10834_v42, %v10822_v24  ;;  %v7855_v40 = vpack.c.bf16 %v10871_v4, %v10861_v56 }
 0x9ef   :  { %6312 = vmatpush1.bf16.msra.mxu1 %v7846_v61  ;;  %v4552_v9 = vsel %vm341_vm4, %v4545_v7, %v11496_v47  ;;  %v4554_v30 = vsel %vm341_vm4, %v11497_v53, %v4545_v7  ;;  %v4547_v21 = vpop.permute.xlu0 %4546  ;;  %v4455_v39 = vrot.slane %v7767_v19, %v11445_v29  ;;  %v4459_v60 = vrot.slane %v7767_v19, %v11446_v62  ;;  %v11500_v4 = vld [vmem:[#allocation8_spill] sm:$0xff] }
 0x9f0   :  { %6313 = vmatprep.subr.bf16.mxu1 %v7847_v38  ;;  %v10956_v0 = vmul.f32 %v4573_v1, %v4554_v30  ;;  %v10958_v51 = vmul.f32 %v4577_v12, %v4552_v9  ;;  %v4553_v11 = vsel %vm341_vm4, %v4547_v21, %v11498_v57  ;;  %v4555_v61 = vsel %vm341_vm4, %v11499_v46, %v4547_v21  ;;  %v11506_v57 = vld [vmem:[#allocation76_spill] sm:$0xff] }
 0x9f1   :  { %6345 = vmatpush1.bf16.msra.mxu0 %v7848_v59  ;;  %v10966_v14 = vmul.f32 %v4573_v1, %v4555_v61  ;;  %v10968_v27 = vmul.f32 %v4577_v12, %v4553_v11  ;;  %v7854_v1 = vpack.c.bf16 %v10800_v8, %v10788_v43  ;;  %v11502_v31 = vpack.c.bf16 %v11500_v4, %v11501_v22  ;;  %v5583_v59 = vld [vmem:[#allocation2 + $0x208] sm:$0xff] }
 0x9f2   :  { %6346 = vmatprep.subr.bf16.mxu0 %v7851_v48  ;;  %v4731_v5 = vpop.permute.xlu1 %4730  ;;  %v7859_v61 = vpack.c.bf16 %v10936_v52, %v10924_v26  ;;  %v4349_v52 = vrot.slane %v10493_v20, %v11445_v29  ;;  %v7741_v4 = vld [vmem:[#allocation2 + $0x228] ss:$-40 sps:$4 sm:$0xff]   ;;  %v7746_v22 = vld [vmem:[#allocation2 + $0x5c] ss:$592 sps:$4 sm:$0xff]  }
 0x9f3   :  { %6314 = vmatpush1.bf16.msra.mxu1 %v7850_v28  ;;  %v4736_v12 = vsel %vm417_vm3, %v10299_v55, %v4731_v5  ;;  %v4748_v10 = vsel %vm417_vm3, %v4731_v5, %v10291_v17  ;;  %v4933_v38 = vpop.permute.xlu0 %4932  ;;  %v5585_v17 = vld [vmem:[#allocation2 + $0xa8] sm:$0xff] }
 0x9f4   :  { %6315 = vmatprep.subr.bf16.mxu1 %v7852_v15  ;;  %v10988_v16 = vmul.f32 %v10773_v6, %v4736_v12  ;;  %v10991_v24 = vmul.f32 %v10777_v63, %v4748_v10  ;;  %v4937_v43 = vsel %vm475_vm2, %v10285_v36, %v4933_v38  ;;  %v4949_v55 = vsel %vm475_vm2, %v4933_v38, %v10277_v37  ;;  %v11509_v12 = vld [vmem:[#allocation77_spill] sm:$0xff]  ;;  %v7743_v38 = vld [vmem:[#allocation2 + $0x22c] ss:$-40 sps:$4 sm:$0xff]  }
 0x9f5   :  { %6347 = vmatpush1.bf16.msra.mxu0 %v7854_v1  ;;  %v4986_v8 = vmul.f32 %v10844_v54, %v4937_v43  ;;  %v4987_v42 = vmul.f32 %v10847_v33, %v4949_v55  ;;  %v7856_v36 = vpack.c.bf16 %v10869_v41, %v10859_v50  ;;  %v7209_v58 = vcombine.high %v5583_v59, %v5585_v17 }
 0x9f6   :  { %6348 = vmatprep.subr.bf16.mxu0 %v7855_v40  ;;  %v4415_v56 = vpop.permute.xlu1 %4414  ;;  %v7208_v15 = vcombine.low %v5583_v59, %v5585_v17  ;;  %v4353_v55 = vrot.slane %v10493_v20, %v11446_v62  ;;  %v7860_v17 = vpack.c.bf16 %v10933_v49, %v10921_v35  ;;  %v11512_v35 = vld [vmem:[#allocation81_spill] sm:$0xff] }
 0x9f7   :  { %6316 = vmatpush2.bf16.msra.mxu1 %v7853_v13  ;;  %v4428_v37 = vsel %vm341_vm4, %v4415_v56, %v10619_v25  ;;  %v4432_v54 = vsel %vm341_vm4, %v10592_v44, %v4415_v56  ;;  %v4417_v33 = vpop.permute.xlu0 %4416  ;;  %v11503_v44 = vld [vmem:[#allocation10_spill] sm:$0xff]  ;;  %v7857_v9 = vpack.c.bf16 %v4986_v8, %v10891_v32  ;;  %v7858_v53 = vpack.c.bf16 %v4987_v42, %v10894_v45  ;;  %v11507_v32 = vld [vmem:[#allocation71_spill] sm:$0xff] }
 0x9f8   :  { %6317 = vmatprep.subr.bf16.mxu1 %v11502_v31  ;;  %v11012_v7 = vmul.f32 %v4455_v39, %v4432_v54  ;;  %v11014_v28 = vmul.f32 %v4459_v60, %v4428_v37  ;;  %v4429_v48 = vsel %vm341_vm4, %v4417_v33, %v10754_v3  ;;  %v4433_v41 = vsel %vm341_vm4, %v10733_v34, %v4417_v33  ;;  %v7768_v3 = vld [vmem:[%s11196_s3 + $0x20] ss:$8 sm:$0xf] }
 0x9f9   :  { %6349 = vmatpush1.bf16.msra.mxu0 %v7856_v36  ;;  %v11022_v25 = vmul.f32 %v4455_v39, %v4433_v41  ;;  %v11024_v50 = vmul.f32 %v4459_v60, %v4429_v48  ;;  %v11505_v47 = vpack.c.bf16 %v11503_v44, %v11504_v2  ;;  %v11035_v34 = vrot.slane %v7768_v3, %v11445_v29  ;;  %v11508_v13 = vld [vmem:[#allocation78_spill] sm:$0xff]  ;;  %v11513_v31 = vld [vmem:[#allocation24_spill] sm:$0xff]  ;;  %v11514_v33 = vld [vmem:[#allocation47_spill] sm:$0xff] }
 0x9fa   :  { %v4411_v30 = vpop.permute.xlu1 %4410  ;;  %v11038_v21 = vrot.slane %v7768_v3, %v11446_v62  ;;  %6350 = vmatprep.subr.bf16.mxu0 %v7858_v53  ;;  %v11510_v8 = vld [vmem:[#allocation82_spill] sm:$0xff]  ;;  %v7861_v29 = vpack.c.bf16 %v10968_v27, %v10958_v51  ;;  %v7862_v27 = vpack.c.bf16 %v10966_v14, %v10956_v0  ;;  %v11515_v48 = vld [vmem:[#allocation27_spill] sm:$0xff]  ;;  %v11517_v14 = vld [vmem:[#allocation28_spill] sm:$0xff] }
 0x9fb   :  { %6318 = vmatpush2.bf16.msra.mxu1 %v11505_v47  ;;  %v4426_v11 = vsel %vm341_vm4, %v4411_v30, %v11506_v57  ;;  %v4430_v45 = vsel %vm341_vm4, %v11507_v32, %v4411_v30  ;;  %v4413_v46 = vpop.permute.xlu0 %4412  ;;  %v7744_v54 = vld [vmem:[#allocation2 + $0x58] ss:$592 sps:$4 sm:$0xff]   ;;  %v11516_v47 = vld [vmem:[#allocation45_spill] sm:$0xff] }
 0x9fc   :  { %6319 = vmatprep.subr.bf16.mxu1 %v7209_v58  ;;  %v11048_v19 = vmul.f32 %v4455_v39, %v4430_v45  ;;  %v11050_v5 = vmul.f32 %v4459_v60, %v4426_v11  ;;  %v4427_v1 = vsel %vm341_vm4, %v4413_v46, %v11508_v13  ;;  %v4431_v10 = vsel %vm341_vm4, %v11509_v12, %v4413_v46  ;;  %v11518_v11 = vld [vmem:[#allocation42_spill] sm:$0xff]  ;;  %v11519_v45 = vld [vmem:[#allocation40_spill] sm:$0xff]  ;;  %v11521_v12 = vld [vmem:[#allocation83_spill] sm:$0xff] }
 0x9fd   :  { %6351 = vmatpush1.bf16.msra.mxu0 %v7857_v9  ;;  %v11058_v40 = vmul.f32 %v4455_v39, %v4431_v10  ;;  %v4471_v43 = vmul.f32 %v4459_v60, %v4427_v1  ;;  %v11511_v39 = vld [vmem:[#allocation80_spill] sm:$0xff]  ;;  %v7749_v13 = vld [vmem:[#allocation2 + $0x23c] ss:$-40 sps:$4 sm:$0xff]  }
 0x9fe   :  { %6352 = vmatprep.subr.bf16.mxu0 %v7859_v61  ;;  %v5355_v26 = vpop.permute.xlu1 %5354 }
 0x9ff   :  { %6320 = vmatpush2.bf16.msra.mxu1 %v7208_v15  ;;  %v5360_v42 = vsel %vm591_vm8, %v11510_v8, %v5355_v26  ;;  %v5372_v60 = vsel %vm591_vm8, %v5355_v26, %v11511_v39  ;;  %v4733_v56 = vpop.permute.xlu0 %4732  ;;  %v11523_v8 = vld [vmem:[#allocation43_spill] sm:$0xff] }
 0xa00   :  { %6321 = vmatprep.subr.bf16.mxu1 %v7743_v38  ;;  %v11075_v20 = vmul.f32 %v11035_v34, %v5360_v42  ;;  %v5407_v62 = vmul.f32 %v11038_v21, %v5372_v60  ;;  %v4737_v49 = vsel %vm417_vm3, %v11512_v35, %v4733_v56  ;;  %v4749_v36 = vsel %vm417_vm3, %v4733_v56, %v11513_v31 }
 0xa01   :  { %6353 = vmatpush1.bf16.msra.mxu0 %v7860_v17  ;;  %v4786_v59 = vmul.f32 %v10773_v6, %v4737_v49  ;;  %v4787_v37 = vmul.f32 %v10777_v63, %v4749_v36  ;;  %v7863_v6 = vpack.c.bf16 %v11024_v50, %v11014_v28  ;;  %v7866_v50 = vpack.c.bf16 %v11022_v25, %v11012_v7  ;;  %v11520_v7 = vld [vmem:[#allocation84_spill] sm:$0xff] }
 0xa02   :  { %6354 = vmatprep.subr.bf16.mxu0 %v7746_v22  ;;  %v4321_v51 = vpop.permute.xlu1 %4320 }
 0xa03   :  { %6322 = vmatpush2.bf16.msra.mxu1 %v7741_v4  ;;  %v4328_v58 = vsel %vm283_vm5, %v4321_v51, %v11514_v33  ;;  %v4330_v41 = vsel %vm283_vm5, %v11515_v48, %v4321_v51  ;;  %v4323_v44 = vpop.permute.xlu0 %4322  ;;  %v7864_v3 = vpack.c.bf16 %v4786_v59, %v10988_v16  ;;  %v7865_v15 = vpack.c.bf16 %v4787_v37, %v10991_v24 }
 0xa04   :  { %6323 = vmatprep.subr.bf16.mxu1 %v7861_v29  ;;  %v4360_v63 = vmul.f32 %v4349_v52, %v4330_v41  ;;  %v4361_v2 = vmul.f32 %v4353_v55, %v4328_v58  ;;  %v4329_v0 = vsel %vm283_vm5, %v4323_v44, %v11516_v47  ;;  %v4331_v9 = vsel %vm283_vm5, %v11517_v14, %v4323_v44 }
 0xa05   :  { %6355 = vmatpush1.bf16.msra.mxu0 %v7744_v54  ;;  %v4364_v53 = vmul.f32 %v4349_v52, %v4331_v9  ;;  %v4365_v30 = vmul.f32 %v4353_v55, %v4329_v0  ;;  %v7867_v16 = vpack.c.bf16 %v4471_v43, %v11050_v5  ;;  %v7747_v5 = vld [vmem:[#allocation2 + $0x238] ss:$-40 sps:$4 sm:$0xff]   ;;  %v7868_v52 = vpack.c.bf16 %v11058_v40, %v11048_v19  ;;  %v11522_v55 = vld [vmem:[#allocation44_spill] sm:$0xff]  ;;  %v6393_v9 = vld [vmem:[%s11194_s1 + $0xe0] sm:$0x3] }
 0xa06   :  { %v7409_v57 = vpack.c.bf16 %v4361_v2, %v4360_v63  ;;  %v5351_v28 = vpop.permute.xlu1 %5350  ;;  %6356 = vmatprep.subr.bf16.mxu0 %v7865_v15 }
 0xa07   :  { %6324 = vmatpush2.bf16.msra.mxu1 %v7862_v27  ;;  %v5358_v32 = vsel %vm591_vm8, %v11518_v11, %v5351_v28  ;;  %v5370_v46 = vsel %vm591_vm8, %v5351_v28, %v11519_v45  ;;  %v5357_v61 = vpop.permute.xlu0 %5356  ;;  %v7869_v39 = vpack.c.bf16 %v4365_v30, %v4361_v2  ;;  %v7872_v19 = vpack.c.bf16 %v4364_v53, %v4360_v63 }
 0xa08   :  { %6325 = vmatprep.subr.bf16.mxu1 %v7863_v6  ;;  %4391 = vst [vmem:[#allocation2 + $0x180] sm:$0xff] %v7409_v57  ;;  %v5398_v24 = vmul.f32 %v11035_v34, %v5358_v32  ;;  %v5399_v1 = vmul.f32 %v11038_v21, %v5370_v46  ;;  %v5361_v25 = vsel %vm591_vm8, %v11520_v7, %v5357_v61 }
 0xa09   :  { %v5373_v10 = vsel %vm591_vm8, %v5357_v61, %v11521_v12  ;;  %6357 = vmatpush1.bf16.msra.mxu0 %v7864_v3  ;;  %v5410_v38 = vmul.f32 %v11035_v34, %v5361_v25 }
 0xa0a   :  { %v5411_v26 = vmul.f32 %v11038_v21, %v5373_v10  ;;  %6368 = vmatprep.subr.bf16.mxu0 %v7749_v13 }
 0xa0b   :  { %6326 = vmatpush2.bf16.msra.mxu1 %v7866_v50  ;;  %v5353_v43 = vpop.permute.xlu0 %5352  ;;  %v7870_v4 = vpack.c.bf16 %v5410_v38, %v11075_v20 }
 0xa0c   :  { %6327 = vmatprep.subr.bf16.mxu1 %v7867_v16  ;;  %v5359_v17 = vsel %vm591_vm8, %v11522_v55, %v5353_v43  ;;  %v5371_v42 = vsel %vm591_vm8, %v5353_v43, %v11523_v8  ;;  %v7871_v29 = vpack.c.bf16 %v5411_v26, %v5407_v62 }
 0xa0d   :  { %6369 = vmatpush2.bf16.msra.mxu0 %v7747_v5  ;;  %v5402_v60 = vmul.f32 %v11035_v34, %v5359_v17  ;;  %v5403_v56 = vmul.f32 %v11038_v21, %v5371_v42  ;;  %v11525_v34 = vld [vmem:[#allocation11_spill] sm:$0xff] }
 0xa0e   :  { %6370 = vmatprep.subr.bf16.mxu0 %v7871_v29 }
 0xa0f   :  { %6328 = vmatpush2.bf16.msra.mxu1 %v7868_v52  ;;  %v7873_v40 = vpack.c.bf16 %v5402_v60, %v5398_v24  ;;  %v7874_v22 = vpack.c.bf16 %v5403_v56, %v5399_v1 }
 0xa10   :  { %6329 = vmatprep.subr.bf16.mxu1 %v7869_v39 }
 0xa11   :  { %6371 = vmatpush2.bf16.msra.mxu0 %v7870_v4 }
 0xa12   :  { %6372 = vmatprep.subr.bf16.mxu0 %v7874_v22 }
 0xa13   :  { %6330 = vmatpush2.bf16.msra.mxu1 %v7872_v19  ;;  %v5643_v20 = vpop.permute.xlu1 %5642 }
 0xa15   :  { %6373 = vmatpush2.bf16.msra.mxu0 %v7873_v40 }
 0xa16   :  { %6332 = vmatmul.mubr.bf16.vlgmr.msra.gmra.mxu1 %v10888_v23 }
 0xa17   :  { %v6402_v17 = vpop.permute.xlu1 %6401 }
 0xa18   :  { %6375 = vmatmul.mubr.bf16.vlgmr.msra.gmra.mxu0 %v11524_v18  ;;  %v5648_v31 = vpop.permute.xlu0 %5647 }
 0xa19   :  { %6439 = vmatprep.mubr.bf16.mxu0 %v11525_v34 }
 0xa96   :  { %v6290_v21 = vpop.f32.mrf.mxu1 }
 0xa98   :  { %v6292_v35 = vpop.f32.mrf.mxu1 }
 0xa9a   :  { %v6294_v59 = vpop.f32.mrf.mxu1 }
 0xa9c   :  { %v6296_v48 = vpop.f32.mrf.mxu1 }
 0xaac   :  { %v6247_v49 = vpop.f32.mrf.mxu0 }
 0xaad   :  { %v6248_v37 = vadd.f32 %v6247_v49, %v5643_v20 }
 0xaae   :  { %v6249_v62 = vpop.f32.mrf.mxu0 }
 0xaaf   :  { %v6250_v36 = vadd.f32 %v6249_v62, %v5643_v20  ;;  %v6291_v41 = vadd.f32 %v6290_v21, %v6248_v37 }
 0xab0   :  { %v6251_v51 = vpop.f32.mrf.mxu0 }
 0xab1   :  { %v6252_v27 = vadd.f32 %v6251_v51, %v5648_v31  ;;  %v6293_v33 = vadd.f32 %v6292_v35, %v6250_v36  ;;  %v6385_v47 = vmax.f32 %v6291_v41, 0.0 }
 0xab2   :  { %v6253_v54 = vpop.f32.mrf.mxu0 }
 0xab3   :  { %v6295_v58 = vadd.f32 %v6294_v59, %v6252_v27  ;;  %v6254_v23 = vadd.f32 %v6253_v54, %v5648_v31  ;;  %v6386_v63 = vmax.f32 %v6293_v33, 0.0 }
 0xab5   :  { %v6297_v44 = vadd.f32 %v6296_v48, %v6254_v23  ;;  %v6389_v6 = vmax.f32 %v6295_v58, 0.0 }
 0xab7   :  { %v6390_v2 = vmax.f32 %v6297_v44, 0.0  ;;  %v6394_v14 = vpack.c.bf16 %v6389_v6, %v6385_v47  ;;  %v7891_v47 = vmov 1966171168  }
 0xab9   :  { %v6395_v0 = vpack.c.bf16 %v6390_v2, %v6386_v63 }
 0xabb   :  { %6421 = vmatprep.subr.bf16.mxu0 %v6395_v0  ;;  %v6576_v0 = vunpack.c.l.s4 %v7891_v47 }
 0xabc   :  { %6422 = vmatpush1.bf16.msra.mxu0 %v6394_v14 }
 0xabf   :  { %7264 = vmatmul.mubr.msk.bf16.vlgmr.msra.gmra.mxu0 %vm880_vm0, %v6393_v9 }
 0xac0   :  { %6480 = vmatprep.mubr.bf16.mxu0 %v11525_v34 }
 0xad6   :  { %v6333_v53 = vpop.f32.mrf.mxu1 }
 0xad7   :  { %v6334_v32 = vadd.f32 %v6333_v53, %v5643_v20 }
 0xad8   :  { %v6335_v30 = vpop.f32.mrf.mxu1  ;;  %v6376_v3 = vpop.f32.mrf.mxu0 }
 0xad9   :  { %v6336_v28 = vadd.f32 %v6335_v30, %v5643_v20  ;;  %v6377_v13 = vadd.f32 %v6376_v3, %v6334_v32 }
 0xada   :  { %v6337_v15 = vpop.f32.mrf.mxu1  ;;  %v6378_v57 = vpop.f32.mrf.mxu0 }
 0xadb   :  { %v6338_v50 = vadd.f32 %v6337_v15, %v5648_v31  ;;  %v6379_v61 = vadd.f32 %v6378_v57, %v6336_v28  ;;  %v6387_v10 = vmax.f32 %v6377_v13, 0.0 }
 0xadc   :  { %v6339_v11 = vpop.f32.mrf.mxu1  ;;  %v6380_v45 = vpop.f32.mrf.mxu0 }
 0xadd   :  { %v6340_v46 = vadd.f32 %v6339_v11, %v5648_v31  ;;  %v6381_v16 = vadd.f32 %v6380_v45, %v6338_v50  ;;  %v6388_v25 = vmax.f32 %v6379_v61, 0.0 }
 0xade   :  { %v6382_v24 = vpop.f32.mrf.mxu0 }
 0xadf   :  { %v6383_v1 = vadd.f32 %v6382_v24, %v6340_v46  ;;  %v6391_v7 = vmax.f32 %v6381_v16, 0.0  ;;  %v6577_v46 = vunpack.c.0.s8 %v6576_v0 }
 0xae1   :  { %v6392_v12 = vmax.f32 %v6383_v1, 0.0  ;;  %v6396_v26 = vpack.c.bf16 %v6391_v7, %v6387_v10 }
 0xae3   :  { %v6397_v38 = vpack.c.bf16 %v6392_v12, %v6388_v25 }
 0xae5   :  { %6462 = vmatprep.subr.bf16.mxu0 %v6397_v38 }
 0xae6   :  { %6463 = vmatpush1.bf16.msra.mxu0 %v6396_v26  ;;  %v11526_v26 = vld [vmem:[#allocation3_spill] sm:$0xff] }
 0xae9   :  { %7265 = vmatmul.mubr.msk.bf16.vlgmr.msra.gmra.mxu0 %vm880_vm0, %v6393_v9 }
 0xb7f   :  { %v6441_v5 = vpop.f32.mrf.mxu0 }
 0xb80   :  { %v6442_v8 = vadd.f32 %v6441_v5, %v6402_v17  ;;  %v11159_v5 = vsub.s32 %v6577_v46, %v11526_v26 }
 0xb81   :  { %v6443_v43 = vpop.f32.mrf.mxu0 }
 0xb82   :  { %v6444_v42 = vadd.f32 %v6443_v43, %v6402_v17  ;;  %v6493_v39 = vmul.f32 %v6442_v8, %v6442_v8  ;;  %v6513_v35 = vmul.f32 -2.0, %v6442_v8  ;;  %v6521_v49 = vmul.f32 2.0, %v6442_v8 }
 0xb83   :  { %v6445_v52 = vpop.f32.mrf.mxu0  ;;  %v6489_v41 = vmax.f32 %v6442_v8, 0.0 }
 0xb84   :  { %v6494_v60 = vmul.f32 %v6444_v42, %v6444_v42  ;;  %v6497_v56 = vadd.f32 1.0, %v6493_v39  ;;  %v6505_v18 = vsub.f32 1.0, %v6493_v39  ;;  %v6514_v59 = vmul.f32 -2.0, %v6444_v42 }
 0xb85   :  { %v6446_v55 = vpop.f32.mrf.mxu0  ;;  %v6522_v54 = vmul.f32 2.0, %v6444_v42  ;;  %v6490_v2 = vmax.f32 %v6444_v42, 0.0  ;;  %v6537_v15 = vrot.slane %v6489_v41, 1  ;;  %v6553_v57 = vrot.slane %v6489_v41, 2 }
 0xb86   :  { %v6498_v4 = vadd.f32 1.0, %v6494_v60  ;;  %7750 = vrcp.f32 %v6497_v56  ;;  %v6506_v36 = vsub.f32 1.0, %v6494_v60 }
 0xb87   :  { %v6538_v32 = vrot.slane %v6490_v2, 1  ;;  %v6554_v45 = vrot.slane %v6490_v2, 2 }
 0xb88   :  { %7752 = vrcp.f32 %v6498_v4 }
 0xb93   :  { %v7751_v40 = vpop.eup %7750 }
 0xb94   :  { %v6509_v31 = vmul.f32 %v7751_v40, %v6505_v18  ;;  %v6517_v51 = vmul.f32 %v7751_v40, %v6513_v35  ;;  %v6525_v27 = vmul.f32 %v7751_v40, %v6521_v49 }
 0xb95   :  { %v7753_v21 = vpop.eup %7752 }
 0xb96   :  { %v6510_v23 = vmul.f32 %v7753_v21, %v6506_v36  ;;  %v6518_v48 = vmul.f32 %v7753_v21, %v6514_v59  ;;  %v6526_v44 = vmul.f32 %v7753_v21, %v6522_v54  ;;  %v6529_v63 = vmul.f32 %v6509_v31, %v6509_v31 }
 0xb97   :  { %v6549_v14 = vmul.f32 %v6517_v51, %v6517_v51  ;;  %v6603_v9 = vmul.f32 %v6525_v27, %v6509_v31  ;;  %v6611_v53 = vmul.f32 %v6517_v51, %v6509_v31  ;;  %v6654_v11 = vmul.f32 %v6525_v27, %v6525_v27 }
 0xb98   :  { %v6530_v30 = vmul.f32 %v6510_v23, %v6510_v23  ;;  %v6550_v3 = vmul.f32 %v6518_v48, %v6518_v48  ;;  %v6604_v28 = vmul.f32 %v6526_v44, %v6510_v23  ;;  %v6612_v50 = vmul.f32 %v6518_v48, %v6510_v23 }
 0xb99   :  { %v6545_v61 = vmul.f32 %v6537_v15, %v6529_v63  ;;  %v6561_v16 = vmul.f32 %v6553_v57, %v6549_v14  ;;  %v6607_v13 = vmul.f32 %v6603_v9, %v6537_v15  ;;  %v6615_v24 = vmul.f32 %v6611_v53, %v6553_v57 }
 0xb9a   :  { %v6546_v1 = vmul.f32 %v6538_v32, %v6530_v30  ;;  %v6562_v7 = vmul.f32 %v6554_v45, %v6550_v3  ;;  %v6608_v25 = vmul.f32 %v6604_v28, %v6538_v32  ;;  %v6616_v12 = vmul.f32 %v6612_v50, %v6554_v45 }
 0xb9b   :  { %v6655_v10 = vmul.f32 %v6526_v44, %v6526_v44  ;;  %v11161_v43 = vadd.f32 %v6561_v16, %v6545_v61  ;;  %v11163_v52 = vadd.f32 %v6615_v24, %v6607_v13  ;;  %v6658_v55 = vmul.f32 %v6654_v11, %v6537_v15 }
 0xb9c   :  { %v6663_v8 = vmul.f32 %v6554_v45, %v6530_v30  ;;  %v6566_v4 = vadd.f32 %v6562_v7, %v6546_v1 }
 0xb9d   :  { %v6659_v40 = vmul.f32 %v6655_v10, %v6538_v32 }
 0xb9e   :  { %v6573_v45 = vcombine.low %v11161_v43, %v6566_v4 }
 0xb9f   :  { %v6667_v41 = vadd.f32 %v6663_v8, %v6659_v40 }
 0xba0   :  { %v6581_v26 = vrot.slane %v6573_v45, %v11159_v5 }
 0xba9   :  { %v6482_v29 = vpop.f32.mrf.mxu0 }
 0xbaa   :  { %v11143_v19 = vadd.f32 %v6482_v29, %v6402_v17  ;;  %v6620_v29 = vadd.f32 %v6616_v12, %v6608_v25 }
 0xbab   :  { %v6484_v22 = vpop.f32.mrf.mxu0 }
 0xbac   :  { %v11147_v34 = vmul.f32 %v11143_v19, %v11143_v19  ;;  %v11149_v20 = vadd.f32 %v6484_v22, %v6402_v17  ;;  %v6491_v38 = vmax.f32 %v11143_v19, 0.0  ;;  %v6662_v17 = vmul.f32 %v6553_v57, %v6529_v63 }
 0xbad   :  { %v6486_v62 = vpop.f32.mrf.mxu0  ;;  %v6515_v39 = vmul.f32 -2.0, %v11143_v19  ;;  %v6523_v60 = vmul.f32 2.0, %v11143_v19  ;;  %v6627_v13 = vcombine.low %v11163_v52, %v6620_v29 }
 0xbae   :  { %v6499_v37 = vadd.f32 1.0, %v11147_v34  ;;  %v11154_v33 = vmul.f32 %v11149_v20, %v11149_v20  ;;  %v6507_v42 = vsub.f32 1.0, %v11147_v34  ;;  %v6539_v22 = vrot.slane %v6491_v38, 1 }
 0xbaf   :  { %v6487_v58 = vpop.f32.mrf.mxu0  ;;  %v6492_v49 = vmax.f32 %v11149_v20, 0.0  ;;  %v6555_v62 = vrot.slane %v6491_v38, 2  ;;  %v6516_v36 = vmul.f32 -2.0, %v11149_v20  ;;  %v6524_v34 = vmul.f32 2.0, %v11149_v20 }
 0xbb0   :  { %7754 = vrcp.f32 %v6499_v37  ;;  %v6500_v6 = vadd.f32 1.0, %v11154_v33  ;;  %v6508_v31 = vsub.f32 1.0, %v11154_v33  ;;  %v6666_v28 = vadd.f32 %v6662_v17, %v6658_v55 }
 0xbb1   :  { %v6556_v63 = vrot.slane %v6492_v49, 2  ;;  %v6635_v8 = vrot.slane %v6627_v13, %v11159_v5 }
 0xbb2   :  { %7756 = vrcp.f32 %v6500_v6  ;;  %v6540_v6 = vrot.slane %v6492_v49, 1  ;;  %v6674_v7 = vcombine.low %v6666_v28, %v6667_v41 }
 0xbbd   :  { %v7755_v56 = vpop.eup %7754 }
 0xbbe   :  { %v6511_v18 = vmul.f32 %v7755_v56, %v6507_v42  ;;  %v6519_v21 = vmul.f32 %v7755_v56, %v6515_v39  ;;  %v6527_v35 = vmul.f32 %v7755_v56, %v6523_v60  ;;  %v6682_v42 = vrot.slane %v6674_v7, %v11159_v5 }
 0xbbf   :  { %v7757_v59 = vpop.eup %7756  ;;  %v11527_v60 = vlaneseq }
 0xbc0   :  { %v6531_v37 = vmul.f32 %v6511_v18, %v6511_v18  ;;  %v6551_v19 = vmul.f32 %v6519_v21, %v6519_v21  ;;  %v6605_v51 = vmul.f32 %v6527_v35, %v6511_v18  ;;  %v6613_v27 = vmul.f32 %v6519_v21, %v6511_v18 }
 0xbc1   :  { %v6656_v54 = vmul.f32 %v6527_v35, %v6527_v35  ;;  %v6512_v58 = vmul.f32 %v7757_v59, %v6508_v31  ;;  %v6520_v23 = vmul.f32 %v7757_v59, %v6516_v36  ;;  %v6528_v48 = vmul.f32 %v7757_v59, %v6524_v34 }
 0xbc2   :  { %v6547_v44 = vmul.f32 %v6539_v22, %v6531_v37  ;;  %v6563_v2 = vmul.f32 %v6555_v62, %v6551_v19  ;;  %v6609_v47 = vmul.f32 %v6605_v51, %v6539_v22  ;;  %v6617_v14 = vmul.f32 %v6613_v27, %v6555_v62 }
 0xbc3   :  { %v6532_v33 = vmul.f32 %v6512_v58, %v6512_v58  ;;  %v6552_v0 = vmul.f32 %v6520_v23, %v6520_v23  ;;  %v6660_v9 = vmul.f32 %v6656_v54, %v6539_v22  ;;  %v6606_v20 = vmul.f32 %v6528_v48, %v6512_v58 }
 0xbc4   :  { %v6614_v53 = vmul.f32 %v6520_v23, %v6512_v58  ;;  %v6664_v30 = vmul.f32 %v6555_v62, %v6531_v37  ;;  %v6657_v57 = vmul.f32 %v6528_v48, %v6528_v48  ;;  %v6567_v46 = vadd.f32 %v6563_v2, %v6547_v44 }
 0xbc5   :  { %v6548_v3 = vmul.f32 %v6540_v6, %v6532_v33  ;;  %v6564_v15 = vmul.f32 %v6556_v63, %v6552_v0  ;;  %v6610_v50 = vmul.f32 %v6606_v20, %v6540_v6  ;;  %v6665_v32 = vmul.f32 %v6556_v63, %v6532_v33 }
 0xbc6   :  { %v6618_v11 = vmul.f32 %v6614_v53, %v6556_v63  ;;  %v6661_v16 = vmul.f32 %v6657_v57, %v6540_v6  ;;  %v6621_v24 = vadd.f32 %v6617_v14, %v6609_v47  ;;  %v6668_v25 = vadd.f32 %v6664_v30, %v6660_v9 }
 0xbc7   :  { %v6568_v61 = vadd.f32 %v6564_v15, %v6548_v3  ;;  %vm6600_vm11 = vcmp.lt.s32.totalorder %v11527_v60, 512 }
 0xbc8   :  { %v6622_v1 = vadd.f32 %v6618_v11, %v6610_v50  ;;  %v6669_v10 = vadd.f32 %v6665_v32, %v6661_v16 }
 0xbc9   :  { %v6574_v12 = vcombine.low %v6567_v46, %v6568_v61 }
 0xbca   :  { %v6628_v38 = vcombine.low %v6621_v24, %v6622_v1  ;;  %v6675_v17 = vcombine.low %v6668_v25, %v6669_v10 }
 0xbcb   :  { %v6588_v55 = vrot.slane %v6574_v12, %v11159_v5 }
 0xbcc   :  { %v6642_v43 = vrot.slane %v6628_v38, %v11159_v5  ;;  %v6689_v52 = vrot.slane %v6675_v17, %v11159_v5 }
 0xbcd   :  { %v6589_v39 = vcombine.low %v6581_v26, %v6588_v55 }
 0xbce   :  { %v6643_v56 = vcombine.low %v6635_v8, %v6642_v43  ;;  %v6690_v29 = vcombine.low %v6682_v42, %v6689_v52 }
 0xbcf   :  { %v6596_v4 = vrot.slane %v6589_v39, %v11159_v5 }
 0xbd0   :  { %v6650_v40 = vrot.slane %v6643_v56, %v11159_v5  ;;  %v6697_v22 = vrot.slane %v6690_v29, %v11159_v5 }
 0xbd1   :  { %6602 = vst.msk [vmem:[%s11200_s7] ss:$4 sm:$0xf] %vm6600_vm11, %v6596_v4 }
 0xbd2   :  { %7266 = vst.msk [vmem:[%s11200_s7 + $0x1] ss:$4 sm:$0xf] %vm6600_vm11, %v6650_v40  ;;  %7267 = vst.msk [vmem:[%s11200_s7 + $0x2] ss:$4 sm:$0xf] %vm6600_vm11, %v6697_v22 }

</bundles_post_ra>
